<compile_context>
chip_gen: v7x
topology: tpu7x:2x2x1
jax: 0.10.0
libtpu: 0.0.40
codegen_flags: <defaults>
</compile_context>

<pallas_src>
import functools
import math

import jax
import jax.numpy as jnp
from jax.experimental import pallas as pl
from jax.experimental.pallas import tpu as pltpu


def _focal_loss_kernel(x_ref, t_ref, w_ref, e_ref, o_ref, *, alpha, gamma):
    # Cast to f32 inside the kernel (inputs are streamed in their native,
    # possibly narrow, dtype — no wrapper-side astype copies).
    x = x_ref[...].astype(jnp.float32)          # (tile_m, L) logits, lane-dense
    t = t_ref[...].astype(jnp.float32)          # (tile_m, L) one-hot targets
    w = w_ref[...].astype(jnp.float32)          # (tile_m, G) per-anchor weights
    expand = e_ref[...]                         # (G, L) one-hot expansion, resident

    # Expand per-anchor weights to per-element weights on the otherwise-idle
    # MXU: w_dense[m, l] = w[m, l // C].  precision=HIGHEST keeps the f32
    # weights exact (exactly one nonzero term per output element).
    w_dense = jnp.dot(w, expand,
                      precision=jax.lax.Precision.HIGHEST,
                      preferred_element_type=jnp.float32)

    # Fused sigmoid + BCE log-term around a single exp(-|x|):
    #   x >= 0: sigmoid(x) = 1/(1+e)  with e = exp(-x)
    #   x <  0: sigmoid(x) = e/(1+e)  with e = exp(+x)
    e = jnp.exp(-jnp.abs(x))
    inv = 1.0 / (1.0 + e)
    p = jnp.where(x >= 0.0, inv, e * inv)       # pred_sigmoid

    # One-hot algebra (exact rewrites of the module formulas):
    #   alpha_w = t*a + (1-t)*(1-a) = (1-a) + t*(2a-1)
    #   pt      = t*(1-p) + (1-t)*p = p + t*(1-2p)
    alpha_w = (1.0 - alpha) + t * (2.0 * alpha - 1.0)
    pt = p + t * (1.0 - 2.0 * p)

    # pt ** gamma: repeated multiplies for small integer gamma (default 2.0);
    # jnp.power (EUP exp+log) only for non-integer gamma.
    g_int = int(round(gamma))
    if abs(gamma - g_int) < 1e-12 and 0 <= g_int <= 8:
        if g_int == 0:
            pt_pow = jnp.ones_like(pt)
        else:
            pt_pow = pt
            for _ in range(g_int - 1):
                pt_pow = pt_pow * pt
    else:
        pt_pow = jnp.power(pt, gamma)

    # bce = max(x, 0) - x*t + log1p(exp(-|x|))   (reuses e; keeps log1p accuracy)
    bce = jnp.maximum(x, 0.0) - x * t + jnp.log1p(e)

    o_ref[...] = (alpha_w * pt_pow * bce * w_dense).astype(o_ref.dtype)


def _sublane_quantum(dt):
    # second-minor tiling quantum per dtype width (f32:8, bf16:16, int8/fp8:32)
    return {4: 8, 2: 16, 1: 32}.get(jnp.dtype(dt).itemsize, 8)


def sigmoid_focal_classification_loss(logits, targets, weights,
                                      gamma=2.0, alpha=0.25,
                                      target_block_bytes=None):
    """logits/targets: (B, A, C) float (any float dtype); weights: (B, A) float.
    Returns the weighted focal loss of shape (B, A, C)."""
    B, A, C = logits.shape
    assert targets.shape == (B, A, C)
    assert weights.shape == (B, A)

    R = B * A

    out_dt = jnp.result_type(logits.dtype, targets.dtype, weights.dtype)
    if not jnp.issubdtype(out_dt, jnp.floating):
        out_dt = jnp.float32

    # ---- lane-dense view: flat elements -> (M, L), L a multiple of 128 ----
    L_unit = 128 * C // math.gcd(128, C)          # lcm(C, 128)
    G_unit = L_unit // C                          # anchors per L_unit lanes
    G = None
    for k in (8, 4, 2, 1):                        # prefer wide, copy-free rows
        if G_unit * k * C <= 1024 and R % (G_unit * k) == 0:
            G = G_unit * k
            break
    pad_rows = 0
    if G is None:
        # Fallback: callers should guarantee B*A % G_unit == 0 (pad anchors at
        # model level) to stay on the zero-copy path; this pads < G_unit rows.
        G = G_unit
        pad_rows = (-R) % G
    L = G * C
    Rp = R + pad_rows
    M = Rp // G

    if pad_rows:
        x2 = jnp.pad(logits.reshape(R, C), ((0, pad_rows), (0, 0)))
        t2 = jnp.pad(targets.reshape(R, C), ((0, pad_rows), (0, 0)))
        w1 = jnp.pad(weights.reshape(R), ((0, pad_rows),))
        xd = x2.reshape(M, L)
        td = t2.reshape(M, L)
        wd = w1.reshape(M, G)
    else:
        xd = logits.reshape(M, L)                 # pure reshapes: no HBM copy
        td = targets.reshape(M, L)
        wd = weights.reshape(M, G)

    # (G, L) one-hot expansion matrix: expand[g, l] = 1 iff l // C == g.
    # Built once per call, DMA'd once per core (constant index_map below).
    l_idx = jnp.arange(L, dtype=jnp.int32)
    expand = (l_idx[None, :] // C == jnp.arange(G, dtype=jnp.int32)[:, None])
    expand = expand.astype(jnp.float32)

    # ---- block sizing ----
    try:
        big_vmem = pltpu.get_tpu_info().vmem_capacity_bytes >= 100 * 1024 * 1024
    except Exception:
        big_vmem = False
    if target_block_bytes is None:
        # ~4 MiB blocks on 128 MiB-VMEM parts (v5e/v6e), ~2 MiB on v7x (64 MiB)
        target_block_bytes = (4 if big_vmem else 2) * 1024 * 1024

    min_tile = max(_sublane_quantum(xd.dtype), _sublane_quantum(td.dtype),
                   _sublane_quantum(wd.dtype), _sublane_quantum(out_dt))
    rows_budget = max(min_tile,
                      (target_block_bytes // (L * 4)) // min_tile * min_tile)

    if M <= rows_budget:
        if M >= 2 * min_tile:
            # split into >=2 grid steps so both v7x TensorCores get work
            half = pl.cdiv(M, 2)
            tile_m = min(M, ((half + min_tile - 1) // min_tile) * min_tile)
        else:
            tile_m = M                            # full extent is always legal
    else:
        tile_m = rows_budget
    grid_m = pl.cdiv(M, tile_m)

    # prefer an even number of grid steps for a balanced 2-TC split (v7x)
    if grid_m >= 3 and grid_m % 2 == 1:
        t2 = ((pl.cdiv(M, grid_m + 1) + min_tile - 1) // min_tile) * min_tile
        if t2 >= min_tile and pl.cdiv(M, t2) % 2 == 0:
            tile_m = t2
            grid_m = pl.cdiv(M, tile_m)

    # ---- explicit VMEM budget (double-buffered streams + scratch headroom) ----
    isz = lambda dt: jnp.dtype(dt).itemsize
    blk_x = tile_m * L * isz(xd.dtype)
    blk_t = tile_m * L * isz(td.dtype)
    blk_o = tile_m * L * isz(out_dt)
    blk_w = tile_m * G * isz(wd.dtype)
    blk_e = G * L * 4
    # headroom: w_dense matmul result + elementwise temporaries + Mosaic scratch
    headroom = 3 * tile_m * L * 4 + (1 << 20)
    vmem_needed = 2 * (blk_x + blk_t + blk_o + blk_w + blk_e) + headroom
    vmem_cap = (96 if big_vmem else 48) * 1024 * 1024
    vmem_limit = int(min(vmem_cap, max(16 * 1024 * 1024, vmem_needed)))

    kernel = functools.partial(_focal_loss_kernel,
                               alpha=float(alpha), gamma=float(gamma))

    out = pl.pallas_call(
        kernel,
        out_shape=jax.ShapeDtypeStruct((M, L), out_dt),
        grid_spec=pltpu.PrefetchScalarGridSpec(
            num_scalar_prefetch=0,
            grid=(grid_m,),
            in_specs=[
                pl.BlockSpec((tile_m, L), lambda i: (i, 0)),
                pl.BlockSpec((tile_m, L), lambda i: (i, 0)),
                pl.BlockSpec((tile_m, G), lambda i: (i, 0)),
                pl.BlockSpec((G, L), lambda i: (0, 0)),   # resident: DMA'd once
            ],
            out_specs=pl.BlockSpec((tile_m, L), lambda i: (i, 0)),
        ),
        compiler_params=pltpu.CompilerParams(
            dimension_semantics=("parallel",),
            vmem_limit_bytes=vmem_limit),
    )(xd, td, wd, expand)

    out_flat = out.reshape(Rp, C)
    if pad_rows:
        out_flat = out_flat[:R]
    return out_flat.reshape(B, A, C)


def _reference(logits, targets, weights, gamma=2.0, alpha=0.25):
    """Plain-JAX mirror of the PyTorch module (unoptimized formulas)."""
    p = jax.nn.sigmoid(logits)
    alpha_w = targets * alpha + (1.0 - targets) * (1.0 - alpha)
    pt = targets * (1.0 - p) + (1.0 - targets) * p
    focal_w = alpha_w * jnp.power(pt, gamma)
    bce = (jnp.maximum(logits, 0.0) - logits * targets
           + jnp.log1p(jnp.exp(-jnp.abs(logits))))
    return focal_w * bce * weights[..., None]


if __name__ == "__main__":
    key = jax.random.PRNGKey(0)
    k1, k2, k3 = jax.random.split(key, 3)

    # B * A = 256 is a multiple of the anchor group G = 128 -> zero-copy path.
    B, A, C = 2, 128, 8   # batch, #anchors, #classes
    logits = jax.random.normal(k1, (B, A, C), dtype=jnp.float32) * 3.0
    cls_idx = jax.random.randint(k2, (B, A), 0, C)
    # narrow targets stream: one-hot 0/1 is exact in bf16, cast inside kernel
    targets = jax.nn.one_hot(cls_idx, C, dtype=jnp.bfloat16)
    weights = jax.random.uniform(k3, (B, A), dtype=jnp.float32)

    out = sigmoid_focal_classification_loss(logits, targets, weights)
    out = jax.block_until_ready(out)

    ref = _reference(logits, targets.astype(jnp.float32), weights)
    assert out.shape == (B, A, C)
    assert out.dtype == jnp.float32
    assert jnp.allclose(out, ref, atol=1e-5, rtol=1e-4), "mismatch vs reference"

    print("KERNEL_OK")
</pallas_src>

<mosaic_0001>
module attributes {stable_mosaic.version = 11 : i64} {
  func.func @_focal_loss_kernel(%arg0: i32, %arg1: memref<2x1024xf32, #tpu.memory_space<vmem>>, %arg2: memref<2x1024xbf16, #tpu.memory_space<vmem>>, %arg3: memref<2x128xf32, #tpu.memory_space<vmem>>, %arg4: memref<128x1024xf32, #tpu.memory_space<vmem>>, %arg5: memref<2x1024xf32, #tpu.memory_space<vmem>>) attributes {dimension_semantics = [#tpu.dimension_semantics<parallel>], iteration_bounds = array<i64: 1>, scalar_prefetch = 0 : i64, scratch_operands = 0 : i64, tpu.core_type = #tpu.core_type<tc>, window_params = [{transform_indices = @transform_0, window_bounds = array<i64: 2, 1024>}, {transform_indices = @transform_1, window_bounds = array<i64: 2, 1024>}, {transform_indices = @transform_2, window_bounds = array<i64: 2, 128>}, {pipeline_mode = #tpu.pipeline_mode<synchronous>, transform_indices = @transform_3, window_bounds = array<i64: 128, 1024>}, {transform_indices = @transform_4, window_bounds = array<i64: 2, 1024>}]} {
    %c0 = arith.constant 0 : index
    %c0_0 = arith.constant 0 : index
    %0 = vector.load %arg1[%c0, %c0_0] : memref<2x1024xf32, #tpu.memory_space<vmem>>, vector<2x1024xf32>
    %c0_1 = arith.constant 0 : index
    %c0_2 = arith.constant 0 : index
    %1 = vector.load %arg2[%c0_1, %c0_2] : memref<2x1024xbf16, #tpu.memory_space<vmem>>, vector<2x1024xbf16>
    %2 = arith.extf %1 : vector<2x1024xbf16> to vector<2x1024xf32>
    %c0_3 = arith.constant 0 : index
    %c0_4 = arith.constant 0 : index
    %3 = vector.load %arg3[%c0_3, %c0_4] : memref<2x128xf32, #tpu.memory_space<vmem>>, vector<2x128xf32>
    %c0_5 = arith.constant 0 : index
    %c0_6 = arith.constant 0 : index
    %4 = vector.load %arg4[%c0_5, %c0_6] : memref<128x1024xf32, #tpu.memory_space<vmem>>, vector<128x1024xf32>
    %cst = arith.constant dense<0.000000e+00> : vector<2x1024xf32>
    %5 = tpu.matmul %3, %4, %cst {dimension_numbers = #tpu.dot_dimension_numbers<[1], [0], [0], [1], [0, 0, 1, 1], [], []>, precision = #tpu.contract_precision<fp32>} : vector<2x128xf32>, vector<128x1024xf32>, vector<2x1024xf32> -> vector<2x1024xf32>
    %6 = math.absf %0 : vector<2x1024xf32>
    %cst_7 = arith.constant 0.000000e+00 : f32
    %7 = vector.broadcast %cst_7 : f32 to vector<2x1024xf32>
    %8 = arith.subf %7, %6 : vector<2x1024xf32>
    %9 = math.exp %8 : vector<2x1024xf32>
    %cst_8 = arith.constant 1.000000e+00 : f32
    %10 = vector.broadcast %cst_8 : f32 to vector<2x1024xf32>
    %11 = arith.addf %10, %9 : vector<2x1024xf32>
    %cst_9 = arith.constant 1.000000e+00 : f32
    %12 = vector.broadcast %cst_9 : f32 to vector<2x1024xf32>
    %13 = arith.divf %12, %11 : vector<2x1024xf32>
    %cst_10 = arith.constant 0.000000e+00 : f32
    %14 = vector.broadcast %cst_10 : f32 to vector<2x1024xf32>
    %15 = arith.cmpf oge, %0, %14 : vector<2x1024xf32>
    %16 = arith.mulf %9, %13 : vector<2x1024xf32>
    %17 = arith.select %15, %13, %16 : vector<2x1024xi1>, vector<2x1024xf32>
    %cst_11 = arith.constant -5.000000e-01 : f32
    %18 = vector.broadcast %cst_11 : f32 to vector<2x1024xf32>
    %19 = arith.mulf %2, %18 : vector<2x1024xf32>
    %cst_12 = arith.constant 7.500000e-01 : f32
    %20 = vector.broadcast %cst_12 : f32 to vector<2x1024xf32>
    %21 = arith.addf %20, %19 : vector<2x1024xf32>
    %cst_13 = arith.constant 2.000000e+00 : f32
    %22 = vector.broadcast %cst_13 : f32 to vector<2x1024xf32>
    %23 = arith.mulf %22, %17 : vector<2x1024xf32>
    %cst_14 = arith.constant 1.000000e+00 : f32
    %24 = vector.broadcast %cst_14 : f32 to vector<2x1024xf32>
    %25 = arith.subf %24, %23 : vector<2x1024xf32>
    %26 = arith.mulf %2, %25 : vector<2x1024xf32>
    %27 = arith.addf %17, %26 : vector<2x1024xf32>
    %28 = arith.mulf %27, %27 : vector<2x1024xf32>
    %cst_15 = arith.constant 0.000000e+00 : f32
    %29 = vector.broadcast %cst_15 : f32 to vector<2x1024xf32>
    %30 = arith.maximumf %0, %29 : vector<2x1024xf32>
    %31 = arith.mulf %0, %2 : vector<2x1024xf32>
    %32 = arith.subf %30, %31 : vector<2x1024xf32>
    %33 = math.log1p %9 : vector<2x1024xf32>
    %34 = arith.addf %32, %33 : vector<2x1024xf32>
    %35 = arith.mulf %21, %28 : vector<2x1024xf32>
    %36 = arith.mulf %35, %34 : vector<2x1024xf32>
    %37 = arith.mulf %36, %5 : vector<2x1024xf32>
    %c0_16 = arith.constant 0 : index
    %c0_17 = arith.constant 0 : index
    %38 = vector.load %arg5[%c0_16, %c0_17] : memref<2x1024xf32, #tpu.memory_space<vmem>>, vector<2x1024xf32>
    tpu.vector_store %arg5[%c0_16, %c0_17], %37 {strides = array<i32>} : memref<2x1024xf32, #tpu.memory_space<vmem>>, vector<2x1024xf32>,
    return
  }
  func.func @transform_0(%arg0: i32) -> (i32, i32) {
    %c0_i32 = arith.constant 0 : i32
    %c0_i32_0 = arith.constant 0 : i32
    return %arg0, %c0_i32 : i32, i32
  }
  func.func @transform_1(%arg0: i32) -> (i32, i32) {
    %c0_i32 = arith.constant 0 : i32
    %c0_i32_0 = arith.constant 0 : i32
    return %arg0, %c0_i32 : i32, i32
  }
  func.func @transform_2(%arg0: i32) -> (i32, i32) {
    %c0_i32 = arith.constant 0 : i32
    %c0_i32_0 = arith.constant 0 : i32
    return %arg0, %c0_i32 : i32, i32
  }
  func.func @transform_3(%arg0: i32) -> (i32, i32) {
    %c0_i32 = arith.constant 0 : i32
    %c0_i32_0 = arith.constant 0 : i32
    %c0_i32_1 = arith.constant 0 : i32
    return %c0_i32, %c0_i32_0 : i32, i32
  }
  func.func @transform_4(%arg0: i32) -> (i32, i32) {
    %c0_i32 = arith.constant 0 : i32
    %c0_i32_0 = arith.constant 0 : i32
    return %arg0, %c0_i32 : i32, i32
  }
}

</mosaic_0001>

<bundles_post_ra>
// kernel: tpu_custom_call.1
= control target key start
LH: loop header
LB: loop body
LE: loop exit
PB: predicated region body
PF: predicated region fallthrough
CT: control target
= control target key end

     0   :  { %9 = vsyncpa [#allocation3], 0  ;;  %s6514_s0 = inlined_call_operand.hbm [shape: f32[2,1024], index: 0, kind: input, shape index: {}]   ;;  %s6515_s1 = inlined_call_operand.hbm [shape: bf16[2,1024], index: 1, kind: input, shape index: {}]   ;;  %s6516_s2 = inlined_call_operand.vmem [shape: f32[2,128], index: 2, kind: input, shape index: {}]   ;;  %s6517_s3 = inlined_call_operand.hbm [shape: f32[128,1024], index: 3, kind: input, shape index: {}]   ;;  %s6518_s4 = inlined_call_operand.hbm [shape: f32[2,1024], index: 4, kind: output, shape index: {}]  }
   0x1   :  { %10 = vsyncpa [#allocation6], 0 }
   0x2   :  { %11 = vsyncpa [#allocation4], 0  ;;  %s4659_s15 = smov [#allocation5]   ;;  %s4660_s17 = smov [#allocation2]  }
   0x3   :  { %s28_s16 = sshll.u32 %s4659_s15, 4  ;;  %s18_s18 = sshll.u32 %s4660_s17, 4  ;;  %s29_s16 = int_to_ptr.vmem [resolvable:$true] %s28_s16  ;;  %s19_s18 = int_to_ptr.vmem [resolvable:$true] %s18_s18 }
   0x4   :  { %s4565_s21 = scalar_lea.hbm %s6515_s1, 128 }
   0x5   :  { %p4566_p0 = scmp.ne.s32.totalorder %s6515_s1, %s4565_s21  ;;  %p4569_p1 = scmp.lt.u32.totalorder %s4565_s21, %s6515_s1 }
   0x7   :  { %p4571_p2 = pnand %p4569_p1, %p4566_p0 }
   0x9   :  { %4574 = shalt.err (!%p4571_p2)
}
   0xa   :  { %s4575_s26 = scalar_lea.vmem %s29_s16, 128  ;;  %p4580_p4 = scmp.lt.s32.totalorder %s29_s16, %s29_s16 }
   0xb   :  { %p4576_p3 = scmp.ne.s32.totalorder %s29_s16, %s4575_s26  ;;  %p4581_p5 = scmp.lt.s32.totalorder %s4575_s26, %s4575_s26 }
   0xd   :  { %p4582_p6 = por %p4581_p5, %p4580_p4 }
   0xf   :  { %p4583_p7 = pnand %p4582_p6, %p4576_p3 }
  0x11   :  { %4586 = shalt.err (!%p4583_p7)
}
  0x12   :  { %31 = dma.hbm_to_vmem [thread:$0]  %s6515_s1, 128, %s29_s16, [#allocation6]  }
  0x13   :  { %s4587_s5 = scalar_lea.hbm %s6514_s0, 256 }
  0x14   :  { %p4588_p8 = scmp.ne.s32.totalorder %s6514_s0, %s4587_s5  ;;  %p4591_p9 = scmp.lt.u32.totalorder %s4587_s5, %s6514_s0 }
  0x16   :  { %p4593_p10 = pnand %p4591_p9, %p4588_p8 }
  0x18   :  { %4596 = shalt.err (!%p4593_p10)
}
  0x19   :  { %s4597_s10 = scalar_lea.vmem %s19_s18, 256  ;;  %p4602_p12 = scmp.lt.s32.totalorder %s19_s18, %s19_s18 }
  0x1a   :  { %p4598_p11 = scmp.ne.s32.totalorder %s19_s18, %s4597_s10  ;;  %p4603_p13 = scmp.lt.s32.totalorder %s4597_s10, %s4597_s10 }
  0x1c   :  { %p4604_p0 = por %p4603_p13, %p4602_p12 }
  0x1e   :  { %p4605_p1 = pnand %p4604_p0, %p4598_p11 }
  0x20   :  { %4608 = shalt.err (!%p4605_p1)
}
  0x21   :  { %21 = dma.hbm_to_vmem [thread:$0]  %s6514_s0, 256, %s19_s18, [#allocation3]  }
  0x22   :  { %s4661_s12 = smov [#allocation7]   ;;  %s4609_s16 = scalar_lea.hbm %s6517_s3, 16384 }
  0x23   :  { %s39_s13 = sshll.u32 %s4661_s12, 4  ;;  %p4610_p2 = scmp.ne.s32.totalorder %s6517_s3, %s4609_s16  ;;  %s40_s13 = int_to_ptr.vmem [resolvable:$true] %s39_s13 }
  0x24   :  { %p4613_p3 = scmp.lt.u32.totalorder %s4609_s16, %s6517_s3 }
  0x26   :  { %p4615_p4 = pnand %p4613_p3, %p4610_p2 }
  0x28   :  { %4618 = shalt.err (!%p4615_p4)
}
  0x29   :  { %s4619_s22 = scalar_lea.vmem %s40_s13, 16384  ;;  %p4624_p6 = scmp.lt.s32.totalorder %s40_s13, %s40_s13 }
  0x2a   :  { %p4620_p5 = scmp.ne.s32.totalorder %s40_s13, %s4619_s22  ;;  %p4625_p7 = scmp.lt.s32.totalorder %s4619_s22, %s4619_s22 }
  0x2c   :  { %p4626_p8 = por %p4625_p7, %p4624_p6 }
  0x2e   :  { %p4627_p9 = pnand %p4626_p8, %p4620_p5 }
  0x30   :  { %4630 = shalt.err (!%p4627_p9)
}
  0x31   :  { %s4662_s0 = smov 1024   ;;  %s4663_s18 = smov 64  }
  0x32   :  { %45 = dma.hbm_to_vmem [thread:$0]  %s6517_s3, 16384, %s40_s13, [#allocation6], %s4662_s0, %s4662_s0, %s4663_s18  }
  0x33   :  { %4653 = dma.done.wait [#allocation3], 256  }
  0x34   :  { %4654 = vsyncadd [#allocation3], 4294967040 }
  0x35   :  { %4655 = dma.done.wait [#allocation6], 16512  }
  0x36   :  { %4656 = vsyncadd [#allocation6], 4294950784  ;;  %v6519_v0 = vmov 0.0   ;;  %v62_v1 = vld [vmem:[#allocation7 + $0x8] sm:$0xff]  ;;  %v64_v3 = vld [vmem:[#allocation7 + $0x18] sm:$0xff] }
  0x37   :  { %285 = vmatprep.mubr.f32.mxu0 %v6519_v0  ;;  %1140 = vmatprep.mubr.f32.mxu1 %v6519_v0  ;;  %v70_v2 = vld [vmem:[#allocation7 + $0x48] sm:$0xff]  ;;  %v189_v4 = vand.u32 4294901760, %v62_v1  ;;  %v72_v6 = vld [vmem:[#allocation7 + $0x58] sm:$0xff]  ;;  %v1044_v7 = vand.u32 4294901760, %v64_v3  ;;  %v61_v8 = vld [vmem:[#allocation7] sm:$0xff] }
  0x38   :  { %v193_v5 = vand.u32 4294901760, %v70_v2  ;;  %v69_v9 = vld [vmem:[#allocation7 + $0x40] sm:$0xff]  ;;  %v1048_v10 = vand.u32 4294901760, %v72_v6  ;;  %v191_v11 = vand.u32 4294901760, %v61_v8  ;;  %v63_v13 = vld [vmem:[#allocation7 + $0x10] sm:$0xff]  ;;  %v78_v15 = vld [vmem:[#allocation7 + $0x88] sm:$0xff] }
  0x39   :  { %v195_v12 = vand.u32 4294901760, %v69_v9  ;;  %v71_v14 = vld [vmem:[#allocation7 + $0x50] sm:$0xff]  ;;  %v4732_v17 = vsub.f32 %v62_v1, %v189_v4  ;;  %v4736_v19 = vsub.f32 %v64_v3, %v1044_v7  ;;  %v86_v20 = vld [vmem:[#allocation7 + $0xc8] sm:$0xff]  ;;  %v80_v21 = vld [vmem:[#allocation7 + $0x98] sm:$0xff]  ;;  %v1046_v29 = vand.u32 4294901760, %v63_v13 }
  0x3a   :  { %v4730_v16 = vpack.c.bf16 %v193_v5, %v189_v4  ;;  %v4734_v18 = vsub.f32 %v70_v2, %v193_v5  ;;  %v88_v22 = vld [vmem:[#allocation7 + $0xd8] sm:$0xff]  ;;  %v4738_v23 = vpack.c.bf16 %v1048_v10, %v1044_v7  ;;  %v4740_v24 = vsub.f32 %v72_v6, %v1048_v10  ;;  %v77_v27 = vld [vmem:[#allocation7 + $0x80] sm:$0xff]  ;;  %v79_v37 = vld [vmem:[#allocation7 + $0x90] sm:$0xff] }
  0x3b   :  { %6855 = vst [vmem:[#allocation13_spill] sm:$0xff] %v4732_v17  ;;  %6857 = vst [vmem:[#allocation15_spill] sm:$0xff] %v4736_v19  ;;  %v4742_v25 = vpack.c.bf16 %v195_v12, %v191_v11  ;;  %v4744_v26 = vsub.f32 %v61_v8, %v191_v11  ;;  %v4747_v28 = vsub.f32 %v69_v9, %v195_v12  ;;  %v1050_v30 = vand.u32 4294901760, %v71_v14  ;;  %v85_v32 = vld [vmem:[#allocation7 + $0xc0] sm:$0xff]  ;;  %v87_v38 = vld [vmem:[#allocation7 + $0xd0] sm:$0xff] }
  0x3c   :  { %6854 = vst [vmem:[#allocation12_spill] sm:$0xff] %v4730_v16  ;;  %6856 = vst [vmem:[#allocation14_spill] sm:$0xff] %v4734_v18  ;;  %3738 = vmatprep.subr.bf16.mxu0 %v4730_v16  ;;  %v197_v31 = vand.u32 4294901760, %v78_v15  ;;  %3930 = vmatprep.subr.bf16.mxu1 %v4738_v23  ;;  %v201_v33 = vand.u32 4294901760, %v86_v20  ;;  %v1052_v34 = vand.u32 4294901760, %v80_v21  ;;  %v1056_v35 = vand.u32 4294901760, %v88_v22 }
  0x3d   :  { %6858 = vst [vmem:[#allocation16_spill] sm:$0xff] %v4738_v23  ;;  %6859 = vst [vmem:[#allocation17_spill] sm:$0xff] %v4740_v24  ;;  %3740 = vmatpush1.bf16.msra.mxu0 %v4742_v25  ;;  %v199_v36 = vand.u32 4294901760, %v77_v27  ;;  %v4751_v39 = vpack.c.bf16 %v1050_v30, %v1046_v29  ;;  %v4753_v40 = vsub.f32 %v63_v13, %v1046_v29  ;;  %v94_v43 = vld [vmem:[#allocation7 + $0x108] sm:$0xff]  ;;  %v96_v45 = vld [vmem:[#allocation7 + $0x118] sm:$0xff]  ;;  %v203_v52 = vand.u32 4294901760, %v85_v32 }
  0x3e   :  { %6860 = vst [vmem:[#allocation18_spill] sm:$0xff] %v4742_v25  ;;  %6861 = vst [vmem:[#allocation19_spill] sm:$0xff] %v4747_v28  ;;  %v4755_v41 = vsub.f32 %v71_v14, %v1050_v30  ;;  %v4757_v42 = vsub.f32 %v78_v15, %v197_v31  ;;  %v102_v44 = vld [vmem:[#allocation7 + $0x148] sm:$0xff]  ;;  %v4759_v46 = vpack.c.bf16 %v201_v33, %v197_v31  ;;  %v104_v50 = vld [vmem:[#allocation7 + $0x158] sm:$0xff]  ;;  %v1054_v54 = vand.u32 4294901760, %v79_v37 }
  0x3f   :  { %6862 = vst [vmem:[#allocation20_spill] sm:$0xff] %v4751_v39  ;;  %v4761_v47 = vsub.f32 %v86_v20, %v201_v33  ;;  %v4763_v48 = vpack.c.bf16 %v1056_v35, %v1052_v34  ;;  %v4765_v49 = vsub.f32 %v80_v21, %v1052_v34  ;;  %3932 = vmatpush1.bf16.msra.mxu1 %v4751_v39  ;;  %v1058_v55 = vand.u32 4294901760, %v87_v38  ;;  %v93_v59 = vld [vmem:[#allocation7 + $0x100] sm:$0xff]  ;;  %v95_v2 = vld [vmem:[#allocation7 + $0x110] sm:$0xff]  ;;  %v110_v4 = vld [vmem:[#allocation7 + $0x188] sm:$0xff] }
  0x40   :  { %6863 = vst [vmem:[#allocation21_spill] sm:$0xff] %v4759_v46  ;;  %v4768_v51 = vsub.f32 %v88_v22, %v1056_v35  ;;  %v4770_v53 = vsub.f32 %v77_v27, %v199_v36  ;;  %3742 = vmatprep.subr.bf16.mxu0 %v4759_v46  ;;  %v205_v56 = vand.u32 4294901760, %v94_v43  ;;  %v209_v57 = vand.u32 4294901760, %v102_v44  ;;  %v101_v60 = vld [vmem:[#allocation7 + $0x140] sm:$0xff]  ;;  %v103_v3 = vld [vmem:[#allocation7 + $0x150] sm:$0xff]  ;;  %v118_v9 = vld [vmem:[#allocation7 + $0x1c8] sm:$0xff] }
  0x41   :  { %6864 = vst [vmem:[#allocation22_spill] sm:$0xff] %v4763_v48  ;;  %3934 = vmatprep.subr.bf16.mxu1 %v4763_v48  ;;  %v1060_v58 = vand.u32 4294901760, %v96_v45  ;;  %v4774_v61 = vpack.c.bf16 %v203_v52, %v199_v36  ;;  %v4776_v62 = vsub.f32 %v85_v32, %v203_v52  ;;  %v4778_v63 = vsub.f32 %v79_v37, %v1054_v54  ;;  %v112_v10 = vld [vmem:[#allocation7 + $0x198] sm:$0xff]  ;;  %v109_v33 = vld [vmem:[#allocation7 + $0x180] sm:$0xff]  ;;  %v143_v39 = vld [vmem:[#allocation7 + $0x290] sm:$0xff] }
  0x42   :  { %v1064_v1 = vand.u32 4294901760, %v104_v50  ;;  %v4780_v5 = vpack.c.bf16 %v1058_v55, %v1054_v54  ;;  %v4782_v6 = vsub.f32 %v87_v38, %v1058_v55  ;;  %v4784_v7 = vpack.c.bf16 %v209_v57, %v205_v56  ;;  %v120_v11 = vld [vmem:[#allocation7 + $0x1d8] sm:$0xff]  ;;  %v117_v38 = vld [vmem:[#allocation7 + $0x1c0] sm:$0xff]  ;;  %v126_v55 = vld [vmem:[#allocation7 + $0x208] sm:$0xff] }
  0x43   :  { %6865 = vst [vmem:[#allocation23_spill] sm:$0xff] %v4774_v61  ;;  %v4786_v8 = vsub.f32 %v94_v43, %v205_v56  ;;  %3744 = vmatpush1.bf16.msra.mxu0 %v4774_v61  ;;  %v4789_v12 = vsub.f32 %v102_v44, %v209_v57  ;;  %v4793_v14 = vsub.f32 %v96_v45, %v1060_v58  ;;  %v207_v20 = vand.u32 4294901760, %v93_v59  ;;  %v111_v43 = vld [vmem:[#allocation7 + $0x190] sm:$0xff]  ;;  %v134_v56 = vld [vmem:[#allocation7 + $0x248] sm:$0xff]  ;;  %v128_v57 = vld [vmem:[#allocation7 + $0x218] sm:$0xff] }
  0x44   :  { %6866 = vst [vmem:[#allocation24_spill] sm:$0xff] %v4780_v5  ;;  %6867 = vst [vmem:[#allocation25_spill] sm:$0xff] %v4784_v7  ;;  %v4791_v13 = vpack.c.bf16 %v1064_v1, %v1060_v58  ;;  %v4795_v15 = vsub.f32 %v104_v50, %v1064_v1  ;;  %3936 = vmatpush1.bf16.msra.mxu1 %v4780_v5  ;;  %3746 = vmatprep.subr.bf16.mxu0 %v4784_v7  ;;  %v211_v21 = vand.u32 4294901760, %v101_v60  ;;  %v119_v44 = vld [vmem:[#allocation7 + $0x1d0] sm:$0xff]  ;;  %v133_v0 = vld [vmem:[#allocation7 + $0x240] sm:$0xff] }
  0x45   :  { %v1062_v22 = vand.u32 4294901760, %v95_v2  ;;  %v1066_v27 = vand.u32 4294901760, %v103_v3  ;;  %v213_v29 = vand.u32 4294901760, %v110_v4  ;;  %v217_v30 = vand.u32 4294901760, %v118_v9  ;;  %v144_v48 = vld [vmem:[#allocation7 + $0x298] sm:$0xff]  ;;  %v151_v16 = vld [vmem:[#allocation7 + $0x2d0] sm:$0xff] }
  0x46   :  { %6868 = vst [vmem:[#allocation26_spill] sm:$0xff] %v4791_v13  ;;  %3938 = vmatprep.subr.bf16.mxu1 %v4791_v13  ;;  %v1068_v31 = vand.u32 4294901760, %v112_v10  ;;  %v1072_v32 = vand.u32 4294901760, %v120_v11  ;;  %v4800_v34 = vpack.c.bf16 %v211_v21, %v207_v20  ;;  %v4802_v35 = vsub.f32 %v93_v59, %v207_v20  ;;  %v150_v13 = vld [vmem:[#allocation7 + $0x2c8] sm:$0xff] }
  0x47   :  { %v4804_v36 = vsub.f32 %v101_v60, %v211_v21  ;;  %v4806_v37 = vpack.c.bf16 %v1066_v27, %v1062_v22  ;;  %v4808_v45 = vsub.f32 %v95_v2, %v1062_v22  ;;  %v4810_v50 = vsub.f32 %v103_v3, %v1066_v27  ;;  %v136_v21 = vld [vmem:[#allocation7 + $0x258] sm:$0xff] }
  0x48   :  { %6869 = vst [vmem:[#allocation27_spill] sm:$0xff] %v4800_v34  ;;  %v4812_v52 = vpack.c.bf16 %v217_v30, %v213_v29  ;;  %v4814_v54 = vsub.f32 %v110_v4, %v213_v29  ;;  %3748 = vmatpush1.bf16.msra.mxu0 %v4800_v34  ;;  %v4818_v58 = vsub.f32 %v118_v9, %v217_v30  ;;  %v215_v1 = vand.u32 4294901760, %v109_v33  ;;  %v125_v30 = vld [vmem:[#allocation7 + $0x200] sm:$0xff]  ;;  %v142_v34 = vld [vmem:[#allocation7 + $0x288] sm:$0xff] }
  0x49   :  { %6870 = vst [vmem:[#allocation28_spill] sm:$0xff] %v4806_v37  ;;  %3940 = vmatpush1.bf16.msra.mxu1 %v4806_v37  ;;  %v4820_v59 = vpack.c.bf16 %v1072_v32, %v1068_v31  ;;  %v4822_v60 = vsub.f32 %v112_v10, %v1068_v31  ;;  %v4825_v2 = vsub.f32 %v120_v11, %v1072_v32  ;;  %v219_v3 = vand.u32 4294901760, %v117_v38  ;;  %v127_v10 = vld [vmem:[#allocation7 + $0x210] sm:$0xff] }
  0x4a   :  { %6871 = vst [vmem:[#allocation29_spill] sm:$0xff] %v4812_v52  ;;  %3750 = vmatprep.subr.bf16.mxu0 %v4812_v52  ;;  %v1070_v4 = vand.u32 4294901760, %v111_v43  ;;  %v1074_v20 = vand.u32 4294901760, %v119_v44  ;;  %v4828_v22 = vsub.f32 %v109_v33, %v215_v1  ;;  %v221_v27 = vand.u32 4294901760, %v126_v55  ;;  %v135_v52 = vld [vmem:[#allocation7 + $0x250] sm:$0xff] }
  0x4b   :  { %6872 = vst [vmem:[#allocation30_spill] sm:$0xff] %v4820_v59  ;;  %3942 = vmatprep.subr.bf16.mxu1 %v4820_v59  ;;  %v225_v9 = vand.u32 4294901760, %v134_v56  ;;  %v1076_v29 = vand.u32 4294901760, %v128_v57  ;;  %v4830_v31 = vpack.c.bf16 %v219_v3, %v215_v1  ;;  %v4832_v37 = vsub.f32 %v117_v38, %v219_v3 }
  0x4c   :  { %v4834_v11 = vpack.c.bf16 %v1074_v20, %v1070_v4  ;;  %v4836_v32 = vsub.f32 %v111_v43, %v1070_v4  ;;  %v4838_v59 = vsub.f32 %v119_v44, %v1074_v20  ;;  %v4842_v5 = vsub.f32 %v126_v55, %v221_v27  ;;  %v152_v55 = vld [vmem:[#allocation7 + $0x2d8] sm:$0xff] }
  0x4d   :  { %6873 = vst [vmem:[#allocation31_spill] sm:$0xff] %v4830_v31  ;;  %v4840_v33 = vpack.c.bf16 %v225_v9, %v221_v27  ;;  %v4844_v7 = vsub.f32 %v134_v56, %v225_v9  ;;  %3752 = vmatpush1.bf16.msra.mxu0 %v4830_v31  ;;  %v1080_v38 = vand.u32 4294901760, %v136_v21  ;;  %v4848_v1 = vsub.f32 %v128_v57, %v1076_v29  ;;  %v141_v57 = vld [vmem:[#allocation7 + $0x280] sm:$0xff] }
  0x4e   :  { %6874 = vst [vmem:[#allocation32_spill] sm:$0xff] %v4834_v11  ;;  %6875 = vst [vmem:[#allocation33_spill] sm:$0xff] %v4836_v32  ;;  %3944 = vmatpush1.bf16.msra.mxu1 %v4834_v11  ;;  %v223_v43 = vand.u32 4294901760, %v125_v30  ;;  %v227_v3 = vand.u32 4294901760, %v133_v0  ;;  %v1078_v4 = vand.u32 4294901760, %v127_v10  ;;  %v1082_v44 = vand.u32 4294901760, %v135_v52 }
  0x4f   :  { %6876 = vst [vmem:[#allocation34_spill] sm:$0xff] %v4838_v59  ;;  %6877 = vst [vmem:[#allocation35_spill] sm:$0xff] %v4840_v33  ;;  %3754 = vmatprep.subr.bf16.mxu0 %v4840_v33  ;;  %v229_v20 = vand.u32 4294901760, %v142_v34  ;;  %v233_v61 = vand.u32 4294901760, %v150_v13  ;;  %v4851_v27 = vpack.c.bf16 %v1080_v38, %v1076_v29  ;;  %v4853_v56 = vsub.f32 %v136_v21, %v1080_v38  ;;  %v149_v31 = vld [vmem:[#allocation7 + $0x2c0] sm:$0xff]  ;;  %v158_v29 = vld [vmem:[#allocation7 + $0x308] sm:$0xff] }
  0x50   :  { %6878 = vst [vmem:[#allocation36_spill] sm:$0xff] %v4842_v5  ;;  %6879 = vst [vmem:[#allocation37_spill] sm:$0xff] %v4844_v7  ;;  %v4855_v9 = vpack.c.bf16 %v227_v3, %v223_v43  ;;  %v4857_v11 = vsub.f32 %v125_v30, %v223_v43  ;;  %v4859_v46 = vsub.f32 %v133_v0, %v227_v3  ;;  %v1084_v0 = vand.u32 4294901760, %v144_v48 }
  0x51   :  { %6880 = vst [vmem:[#allocation38_spill] sm:$0xff] %v4848_v1  ;;  %6881 = vst [vmem:[#allocation39_spill] sm:$0xff] %v4851_v27  ;;  %v4861_v33 = vpack.c.bf16 %v1082_v44, %v1078_v4  ;;  %v4863_v25 = vsub.f32 %v127_v10, %v1078_v4  ;;  %v4865_v23 = vsub.f32 %v135_v52, %v1082_v44  ;;  %v166_v1 = vld [vmem:[#allocation7 + $0x348] sm:$0xff]  ;;  %3946 = vmatprep.subr.bf16.mxu1 %v4851_v27 }
  0x52   :  { %6882 = vst [vmem:[#allocation40_spill] sm:$0xff] %v4853_v56  ;;  %6883 = vst [vmem:[#allocation41_spill] sm:$0xff] %v4855_v9  ;;  %3756 = vmatpush1.bf16.msra.mxu0 %v4855_v9  ;;  %v4869_v21 = vpack.c.bf16 %v233_v61, %v229_v20  ;;  %v4871_v30 = vsub.f32 %v142_v34, %v229_v20  ;;  %v4873_v38 = vsub.f32 %v150_v13, %v233_v61  ;;  %v182_v56 = vld [vmem:[#allocation7 + $0x3c8] sm:$0xff] }
  0x53   :  { %6884 = vst [vmem:[#allocation42_spill] sm:$0xff] %v4857_v11  ;;  %6885 = vst [vmem:[#allocation43_spill] sm:$0xff] %v4859_v46  ;;  %3948 = vmatpush1.bf16.msra.mxu1 %v4861_v33  ;;  %v1088_v10 = vand.u32 4294901760, %v152_v55  ;;  %v231_v43 = vand.u32 4294901760, %v141_v57  ;;  %v235_v52 = vand.u32 4294901760, %v149_v31  ;;  %v1086_v3 = vand.u32 4294901760, %v143_v39 }
  0x54   :  { %6886 = vst [vmem:[#allocation44_spill] sm:$0xff] %v4861_v33  ;;  %6887 = vst [vmem:[#allocation45_spill] sm:$0xff] %v4863_v25  ;;  %3758 = vmatprep.subr.bf16.mxu0 %v4869_v21  ;;  %v4877_v4 = vsub.f32 %v144_v48, %v1084_v0  ;;  %v1090_v44 = vand.u32 4294901760, %v151_v16  ;;  %v237_v27 = vand.u32 4294901760, %v158_v29  ;;  %v241_v9 = vand.u32 4294901760, %v166_v1  ;;  %v168_v25 = vld [vmem:[#allocation7 + $0x358] sm:$0xff] }
  0x55   :  { %6888 = vst [vmem:[#allocation46_spill] sm:$0xff] %v4865_v23  ;;  %6889 = vst [vmem:[#allocation47_spill] sm:$0xff] %v4869_v21  ;;  %v160_v23 = vld [vmem:[#allocation7 + $0x318] sm:$0xff]  ;;  %v4879_v34 = vpack.c.bf16 %v1088_v10, %v1084_v0  ;;  %v4881_v61 = vsub.f32 %v152_v55, %v1088_v10  ;;  %v4883_v13 = vpack.c.bf16 %v235_v52, %v231_v43  ;;  %v157_v33 = vld [vmem:[#allocation7 + $0x300] sm:$0xff] }
  0x56   :  { %6890 = vst [vmem:[#allocation48_spill] sm:$0xff] %v4871_v30  ;;  %6891 = vst [vmem:[#allocation49_spill] sm:$0xff] %v4873_v38  ;;  %v4885_v20 = vsub.f32 %v141_v57, %v231_v43  ;;  %v165_v38 = vld [vmem:[#allocation7 + $0x340] sm:$0xff]  ;;  %v159_v30 = vld [vmem:[#allocation7 + $0x310] sm:$0xff]  ;;  %v4887_v46 = vsub.f32 %v149_v31, %v235_v52  ;;  %v4889_v48 = vpack.c.bf16 %v1090_v44, %v1086_v3  ;;  %v1092_v31 = vand.u32 4294901760, %v160_v23 }
  0x57   :  { %6892 = vst [vmem:[#allocation50_spill] sm:$0xff] %v4877_v4  ;;  %6893 = vst [vmem:[#allocation51_spill] sm:$0xff] %v4879_v34  ;;  %v4891_v21 = vsub.f32 %v143_v39, %v1086_v3  ;;  %v4893_v4 = vsub.f32 %v151_v16, %v1090_v44  ;;  %v167_v11 = vld [vmem:[#allocation7 + $0x350] sm:$0xff]  ;;  %v174_v0 = vld [vmem:[#allocation7 + $0x388] sm:$0xff]  ;;  %3950 = vmatprep.subr.bf16.mxu1 %v4879_v34  ;;  %3760 = vmatpush1.bf16.msra.mxu0 %v4883_v13  ;;  %v1096_v39 = vand.u32 4294901760, %v168_v25 }
  0x58   :  { %6894 = vst [vmem:[#allocation52_spill] sm:$0xff] %v4881_v61  ;;  %6895 = vst [vmem:[#allocation53_spill] sm:$0xff] %v4883_v13  ;;  %v4897_v55 = vpack.c.bf16 %v241_v9, %v237_v27  ;;  %v4899_v57 = vsub.f32 %v158_v29, %v237_v27  ;;  %v4901_v10 = vsub.f32 %v166_v1, %v241_v9  ;;  %3952 = vmatpush1.bf16.msra.mxu1 %v4889_v48 }
  0x59   :  { %6896 = vst [vmem:[#allocation54_spill] sm:$0xff] %v4885_v20  ;;  %6897 = vst [vmem:[#allocation55_spill] sm:$0xff] %v4887_v46  ;;  %v239_v43 = vand.u32 4294901760, %v157_v33  ;;  %v243_v16 = vand.u32 4294901760, %v165_v38  ;;  %v1094_v52 = vand.u32 4294901760, %v159_v30  ;;  %v4905_v3 = vsub.f32 %v160_v23, %v1092_v31  ;;  %v183_v20 = vld [vmem:[#allocation7 + $0x3d0] sm:$0xff] }
  0x5a   :  { %6898 = vst [vmem:[#allocation56_spill] sm:$0xff] %v4889_v48  ;;  %6899 = vst [vmem:[#allocation57_spill] sm:$0xff] %v4891_v21  ;;  %3762 = vmatprep.subr.bf16.mxu0 %v4897_v55  ;;  %v1098_v44 = vand.u32 4294901760, %v167_v11  ;;  %v245_v34 = vand.u32 4294901760, %v174_v0  ;;  %v249_v13 = vand.u32 4294901760, %v182_v56  ;;  %v184_v21 = vld [vmem:[#allocation7 + $0x3d8] sm:$0xff]  ;;  %v4907_v27 = vpack.c.bf16 %v1096_v39, %v1092_v31 }
  0x5b   :  { %6900 = vst [vmem:[#allocation58_spill] sm:$0xff] %v4893_v4  ;;  %6901 = vst [vmem:[#allocation59_spill] sm:$0xff] %v4897_v55  ;;  %v176_v4 = vld [vmem:[#allocation7 + $0x398] sm:$0xff]  ;;  %v4909_v1 = vsub.f32 %v168_v25, %v1096_v39  ;;  %v4911_v9 = vpack.c.bf16 %v243_v16, %v239_v43  ;;  %v4913_v29 = vsub.f32 %v157_v33, %v239_v43  ;;  %v173_v48 = vld [vmem:[#allocation7 + $0x380] sm:$0xff] }
  0x5c   :  { %6902 = vst [vmem:[#allocation60_spill] sm:$0xff] %v4899_v57  ;;  %6903 = vst [vmem:[#allocation61_spill] sm:$0xff] %v4901_v10  ;;  %v181_v10 = vld [vmem:[#allocation7 + $0x3c0] sm:$0xff]  ;;  %v175_v57 = vld [vmem:[#allocation7 + $0x390] sm:$0xff]  ;;  %v4915_v46 = vsub.f32 %v165_v38, %v243_v16  ;;  %v4917_v23 = vpack.c.bf16 %v1098_v44, %v1094_v52  ;;  %v4919_v55 = vsub.f32 %v159_v30, %v1094_v52  ;;  %3954 = vmatprep.subr.bf16.mxu1 %v4907_v27 }
  0x5d   :  { %6904 = vst [vmem:[#allocation62_spill] sm:$0xff] %v4905_v3  ;;  %6905 = vst [vmem:[#allocation63_spill] sm:$0xff] %v4907_v27  ;;  %v4921_v3 = vsub.f32 %v167_v11, %v1098_v44  ;;  %3764 = vmatpush1.bf16.msra.mxu0 %v4911_v9  ;;  %v4925_v25 = vpack.c.bf16 %v249_v13, %v245_v34  ;;  %v4927_v33 = vsub.f32 %v174_v0, %v245_v34 }
  0x5e   :  { %6906 = vst [vmem:[#allocation64_spill] sm:$0xff] %v4911_v9  ;;  %6907 = vst [vmem:[#allocation65_spill] sm:$0xff] %v4917_v23  ;;  %v4929_v31 = vsub.f32 %v182_v56, %v249_v13  ;;  %v1100_v39 = vand.u32 4294901760, %v176_v4  ;;  %3956 = vmatpush1.bf16.msra.mxu1 %v4917_v23  ;;  %v1104_v38 = vand.u32 4294901760, %v184_v21  ;;  %v247_v43 = vand.u32 4294901760, %v173_v48 }
  0x5f   :  { %6908 = vst [vmem:[#allocation66_spill] sm:$0xff] %v4925_v25  ;;  %v251_v30 = vand.u32 4294901760, %v181_v10  ;;  %v1102_v16 = vand.u32 4294901760, %v175_v57  ;;  %3766 = vmatprep.subr.bf16.mxu0 %v4925_v25  ;;  %v1106_v52 = vand.u32 4294901760, %v183_v20  ;;  %v6595_v9 = vand.u32 4294901760, %v4734_v18 }
  0x60   :  { %6909 = vst [vmem:[#allocation67_spill] sm:$0xff] %v4929_v31  ;;  %v4933_v11 = vsub.f32 %v176_v4, %v1100_v39  ;;  %v4937_v34 = vpack.c.bf16 %v1104_v38, %v1100_v39  ;;  %v4939_v56 = vsub.f32 %v184_v21, %v1104_v38  ;;  %v4943_v0 = vsub.f32 %v173_v48, %v247_v43  ;;  %v60_v23 = vld [vmem:[%s6516_s2] sm:$0x3]  ;;  %s4666_s2 = smov [#allocation8]  }
  0x61   :  { %v4941_v13 = vpack.c.bf16 %v251_v30, %v247_v43  ;;  %v4948_v25 = vsub.f32 %v181_v10, %v251_v30  ;;  %v4950_v4 = vpack.c.bf16 %v1106_v52, %v1102_v16  ;;  %v4952_v27 = vsub.f32 %v175_v57, %v1102_v16  ;;  %s3727_s26 = sshll.u32 %s4666_s2, 4  ;;  %s3728_s26 = int_to_ptr.vmem [resolvable:$true] %s3727_s26 }
  0x62   :  { %6910 = vst [vmem:[#allocation68_spill] sm:$0xff] %v4933_v11  ;;  %6911 = vst [vmem:[#allocation69_spill] sm:$0xff] %v4937_v34  ;;  %v4954_v44 = vsub.f32 %v183_v20, %v1106_v52  ;;  %3958 = vmatprep.subr.bf16.mxu1 %v4937_v34  ;;  %v6919_v21 = vand.u32 4294901760, %v4732_v17  ;;  %v312_v39 = vsub.f32 %v4734_v18, %v6595_v9  ;;  %v6600_v10 = vand.u32 4294901760, %v4736_v19  ;;  %s4631_s27 = scalar_lea.vmem %s3728_s26, 256  ;;  %p4636_p11 = scmp.lt.s32.totalorder %s3728_s26, %s3728_s26 }
  0x63   :  { %6912 = vst [vmem:[#allocation70_spill] sm:$0xff] %v4939_v56  ;;  %6913 = vst [vmem:[#allocation71_spill] sm:$0xff] %v4941_v13  ;;  %3768 = vmatpush1.bf16.msra.mxu0 %v4941_v13  ;;  %v6605_v38 = vand.u32 4294901760, %v4740_v24  ;;  %3960 = vmatpush1.bf16.msra.mxu1 %v4950_v4  ;;  %v4967_v20 = vand.u32 4294901760, %v60_v23  ;;  %v6612_v57 = vand.u32 4294901760, %v4744_v26  ;;  %v6613_v43 = vand.u32 4294901760, %v4747_v28  ;;  %p4632_p10 = scmp.ne.s32.totalorder %s3728_s26, %s4631_s27  ;;  %p4637_p12 = scmp.lt.s32.totalorder %s4631_s27, %s4631_s27 }
  0x64   :  { %6914 = vst [vmem:[#allocation72_spill] sm:$0xff] %v4943_v0  ;;  %6915 = vst [vmem:[#allocation73_spill] sm:$0xff] %v4948_v25  ;;  %v300_v48 = vsub.f32 %v4732_v17, %v6919_v21  ;;  %v6619_v30 = vand.u32 4294901760, %v4753_v40  ;;  %v313_v52 = vand.u32 4294901760, %v312_v39  ;;  %v1155_v21 = vsub.f32 %v4736_v19, %v6600_v10 }
  0x65   :  { %6916 = vst [vmem:[#allocation74_spill] sm:$0xff] %v4950_v4  ;;  %6917 = vst [vmem:[#allocation75_spill] sm:$0xff] %v4952_v27  ;;  %v1167_v9 = vsub.f32 %v4740_v24, %v6605_v38  ;;  %v4979_v4 = vsub.f32 %v60_v23, %v4967_v20  ;;  %v306_v13 = vsub.f32 %v4744_v26, %v6612_v57  ;;  %v6617_v38 = vand.u32 4294901760, %v4755_v41  ;;  %p4638_p13 = por %p4637_p12, %p4636_p11 }
  0x66   :  { %6918 = vst [vmem:[#allocation76_spill] sm:$0xff] %v4954_v44  ;;  %6920 = vst [vmem:[#allocation77_spill] sm:$0xff] %v4967_v20  ;;  %v301_v16 = vand.u32 4294901760, %v300_v48  ;;  %v318_v48 = vsub.f32 %v4747_v28, %v6613_v43  ;;  %v1161_v39 = vsub.f32 %v4753_v40, %v6619_v30  ;;  %v1156_v34 = vand.u32 4294901760, %v1155_v21 }
  0x67   :  { %6921 = vst [vmem:[#allocation78_spill] sm:$0xff] %v4979_v4  ;;  %v1168_v19 = vand.u32 4294901760, %v1167_v9  ;;  %v4992_v23 = vand.u32 4294901760, %v4979_v4  ;;  %v307_v20 = vand.u32 4294901760, %v306_v13  ;;  %v1173_v43 = vsub.f32 %v4755_v41, %v6617_v38  ;;  %p4639_p0 = pnand %p4638_p13, %p4632_p10 }
  0x68   :  { %v3769_v10 = vpack.c.bf16 %v313_v52, %v301_v16  ;;  %v319_v24 = vand.u32 4294901760, %v318_v48  ;;  %v1162_v18 = vand.u32 4294901760, %v1161_v39  ;;  %v6616_v28 = vand.u32 4294901760, %v4757_v42 }
  0x69   :  { %6922 = vst [vmem:[#allocation79_spill] sm:$0xff] %v4992_v23  ;;  %v3961_v57 = vpack.c.bf16 %v1168_v19, %v1156_v34  ;;  %v6618_v16 = vand.u32 4294901760, %v4761_v47  ;;  %v289_v9 = vsub.f32 %v4979_v4, %v4992_v23  ;;  %v6620_v21 = vand.u32 4294901760, %v4765_v49 }
  0x6a   :  { %3770 = vmatprep.subr.bf16.mxu0 %v3769_v10  ;;  %v3771_v52 = vpack.c.bf16 %v319_v24, %v307_v20  ;;  %v6621_v13 = vand.u32 4294901760, %v4768_v51  ;;  %v1174_v48 = vand.u32 4294901760, %v1173_v43  ;;  %v324_v19 = vsub.f32 %v4757_v42, %v6616_v28 }
  0x6b   :  { %3962 = vmatprep.subr.bf16.mxu1 %v3961_v57  ;;  %v336_v34 = vsub.f32 %v4761_v47, %v6618_v16  ;;  %v6622_v10 = vand.u32 4294901760, %v4770_v53  ;;  %v5010_v39 = vand.u32 4294901760, %v289_v9  ;;  %v1179_v24 = vsub.f32 %v4765_v49, %v6620_v21 }
  0x6c   :  { %v1191_v20 = vsub.f32 %v4768_v51, %v6621_v13  ;;  %v6631_v57 = vand.u32 4294901760, %v4776_v62  ;;  %v3963_v43 = vpack.c.bf16 %v1174_v48, %v1162_v18  ;;  %v325_v28 = vand.u32 4294901760, %v324_v19 }
  0x6d   :  { %6923 = vst [vmem:[#allocation80_spill] sm:$0xff] %v5010_v39  ;;  %v337_v38 = vand.u32 4294901760, %v336_v34  ;;  %v330_v16 = vsub.f32 %v4770_v53, %v6622_v10  ;;  %291 = vmatmul.mubr.f32.vlgmr.msra.gmra.mrb[0].mxu0 %v5010_v39  ;;  %1146 = vmatmul.mubr.f32.vlgmr.msra.gmra.mrb[0].mxu1 %v5010_v39  ;;  %v1180_v9 = vand.u32 4294901760, %v1179_v24  ;;  %v6627_v13 = vand.u32 4294901760, %v4778_v63 }
  0x6e   :  { %v1192_v30 = vand.u32 4294901760, %v1191_v20  ;;  %v342_v21 = vsub.f32 %v4776_v62, %v6631_v57  ;;  %3772 = vmatpush1.bf16.msra.mxu0 %v3771_v52  ;;  %3964 = vmatpush1.bf16.msra.mxu1 %v3963_v43  ;;  %v6628_v19 = vand.u32 4294901760, %v4782_v6  ;;  %v6629_v34 = vand.u32 4294901760, %v4786_v8 }
  0x6f   :  { %v3773_v18 = vpack.c.bf16 %v337_v38, %v325_v28  ;;  %v331_v48 = vand.u32 4294901760, %v330_v16  ;;  %v1185_v24 = vsub.f32 %v4778_v63, %v6627_v13  ;;  %v6630_v20 = vand.u32 4294901760, %v4789_v12 }
  0x70   :  { %v3965_v10 = vpack.c.bf16 %v1192_v30, %v1180_v9  ;;  %v343_v23 = vand.u32 4294901760, %v342_v21  ;;  %v6924_v39 = vmov 0.0   ;;  %v1197_v28 = vsub.f32 %v4782_v6, %v6628_v19 }
  0x71   :  { %521 = vmatprep.mubr.f32.mxu0 %v6924_v39  ;;  %1376 = vmatprep.mubr.f32.mxu1 %v6924_v39  ;;  %v348_v38 = vsub.f32 %v4786_v8, %v6629_v34  ;;  %v6632_v30 = vand.u32 4294901760, %v4793_v14  ;;  %v6643_v16 = vand.u32 4294901760, %v4795_v15  ;;  %v1186_v21 = vand.u32 4294901760, %v1185_v24 }
  0x72   :  { %3774 = vmatprep.subr.bf16.mxu0 %v3773_v18  ;;  %3966 = vmatprep.subr.bf16.mxu1 %v3965_v10  ;;  %v3775_v52 = vpack.c.bf16 %v343_v23, %v331_v48  ;;  %v360_v43 = vsub.f32 %v4789_v12, %v6630_v20  ;;  %v6635_v9 = vand.u32 4294901760, %v4802_v35  ;;  %v1198_v18 = vand.u32 4294901760, %v1197_v28 }
  0x73   :  { %v349_v13 = vand.u32 4294901760, %v348_v38  ;;  %v1203_v19 = vsub.f32 %v4793_v14, %v6632_v30  ;;  %v1215_v34 = vsub.f32 %v4795_v15, %v6643_v16  ;;  %v6636_v48 = vand.u32 4294901760, %v4804_v36 }
  0x74   :  { %3776 = vmatpush1.bf16.msra.mxu0 %v3775_v52  ;;  %v361_v10 = vand.u32 4294901760, %v360_v43  ;;  %v354_v23 = vsub.f32 %v4802_v35, %v6635_v9  ;;  %v6640_v24 = vand.u32 4294901760, %v4808_v45  ;;  %v3967_v28 = vpack.c.bf16 %v1198_v18, %v1186_v21 }
  0x75   :  { %v1204_v38 = vand.u32 4294901760, %v1203_v19  ;;  %v1216_v20 = vand.u32 4294901760, %v1215_v34  ;;  %v6637_v57 = vand.u32 4294901760, %v4810_v50  ;;  %v366_v52 = vsub.f32 %v4804_v36, %v6636_v48 }
  0x76   :  { %v3777_v30 = vpack.c.bf16 %v361_v10, %v349_v13  ;;  %v355_v4 = vand.u32 4294901760, %v354_v23  ;;  %v1209_v43 = vsub.f32 %v4808_v45, %v6640_v24  ;;  %3968 = vmatpush1.bf16.msra.mxu1 %v3967_v28  ;;  %v6638_v19 = vand.u32 4294901760, %v4814_v54 }
  0x77   :  { %v3969_v9 = vpack.c.bf16 %v1216_v20, %v1204_v38  ;;  %v1221_v21 = vsub.f32 %v4810_v50, %v6637_v57  ;;  %v6639_v34 = vand.u32 4294901760, %v4818_v58  ;;  %v367_v13 = vand.u32 4294901760, %v366_v52 }
  0x78   :  { %3778 = vmatprep.subr.bf16.mxu0 %v3777_v30  ;;  %v1210_v18 = vand.u32 4294901760, %v1209_v43  ;;  %v6641_v10 = vand.u32 4294901760, %v4822_v60  ;;  %v6642_v23 = vand.u32 4294901760, %v4825_v2  ;;  %v372_v20 = vsub.f32 %v4814_v54, %v6638_v19 }
  0x79   :  { %3970 = vmatprep.subr.bf16.mxu1 %v3969_v9  ;;  %v1222_v48 = vand.u32 4294901760, %v1221_v21  ;;  %v384_v28 = vsub.f32 %v4818_v58, %v6639_v34  ;;  %v6646_v38 = vand.u32 4294901760, %v4828_v22  ;;  %v3779_v57 = vpack.c.bf16 %v367_v13, %v355_v4 }
  0x7a   :  { %v1227_v30 = vsub.f32 %v4822_v60, %v6641_v10  ;;  %v1239_v9 = vsub.f32 %v4825_v2, %v6642_v23  ;;  %v6645_v52 = vand.u32 4294901760, %v4832_v37  ;;  %v373_v21 = vand.u32 4294901760, %v372_v20 }
  0x7b   :  { %v3971_v43 = vpack.c.bf16 %v1222_v48, %v1210_v18  ;;  %v385_v19 = vand.u32 4294901760, %v384_v28  ;;  %v378_v34 = vsub.f32 %v4828_v22, %v6646_v38  ;;  %3780 = vmatpush1.bf16.msra.mxu0 %v3779_v57  ;;  %v6644_v10 = vand.u32 4294901760, %v4836_v32 }
  0x7c   :  { %v1228_v24 = vand.u32 4294901760, %v1227_v30  ;;  %v1240_v4 = vand.u32 4294901760, %v1239_v9  ;;  %v390_v13 = vsub.f32 %v4832_v37, %v6645_v52  ;;  %v6649_v48 = vand.u32 4294901760, %v4838_v59 }
  0x7d   :  { %3972 = vmatpush1.bf16.msra.mxu1 %v3971_v43  ;;  %v3781_v23 = vpack.c.bf16 %v385_v19, %v373_v21  ;;  %v379_v16 = vand.u32 4294901760, %v378_v34  ;;  %v6650_v18 = vand.u32 4294901760, %v4842_v5  ;;  %v1233_v57 = vsub.f32 %v4836_v32, %v6644_v10  ;;  %v6925_v34 = vld [vmem:[#allocation38_spill] sm:$0xff]  ;;  %v6926_v21 = vld [vmem:[#allocation40_spill] sm:$0xff] }
  0x7e   :  { %v3973_v20 = vpack.c.bf16 %v1240_v4, %v1228_v24  ;;  %v391_v28 = vand.u32 4294901760, %v390_v13  ;;  %v6651_v30 = vand.u32 4294901760, %v4844_v7  ;;  %v1245_v9 = vsub.f32 %v4838_v59, %v6649_v48 }
  0x7f   :  { %3782 = vmatprep.subr.bf16.mxu0 %v3781_v23  ;;  %v396_v19 = vsub.f32 %v4842_v5, %v6650_v18  ;;  %v6659_v43 = vand.u32 4294901760, %v6925_v34  ;;  %v6662_v24 = vand.u32 4294901760, %v6926_v21  ;;  %v1234_v13 = vand.u32 4294901760, %v1233_v57  ;;  %v6927_v23 = vld [vmem:[#allocation42_spill] sm:$0xff] }
  0x80   :  { %3974 = vmatprep.subr.bf16.mxu1 %v3973_v20  ;;  %v3783_v4 = vpack.c.bf16 %v391_v28, %v379_v16  ;;  %v408_v10 = vsub.f32 %v4844_v7, %v6651_v30  ;;  %v6661_v52 = vand.u32 4294901760, %v6927_v23  ;;  %v1246_v38 = vand.u32 4294901760, %v1245_v9  ;;  %v6928_v28 = vld [vmem:[#allocation43_spill] sm:$0xff]  ;;  %v6929_v30 = vld [vmem:[#allocation45_spill] sm:$0xff]  ;;  %v6930_v7 = vld [vmem:[#allocation46_spill] sm:$0xff] }
  0x81   :  { %v397_v32 = vand.u32 4294901760, %v396_v19  ;;  %v1251_v48 = vsub.f32 %v6925_v34, %v6659_v43  ;;  %v1263_v18 = vsub.f32 %v6926_v21, %v6662_v24  ;;  %v6664_v57 = vand.u32 4294901760, %v6928_v28 }
  0x82   :  { %3784 = vmatpush1.bf16.msra.mxu0 %v3783_v4  ;;  %v409_v20 = vand.u32 4294901760, %v408_v10  ;;  %v402_v16 = vsub.f32 %v6927_v23, %v6661_v52  ;;  %v6667_v59 = vand.u32 4294901760, %v6929_v30  ;;  %v3975_v9 = vpack.c.bf16 %v1246_v38, %v1234_v13  ;;  %v6932_v13 = vld [vmem:[#allocation49_spill] sm:$0xff] }
  0x83   :  { %v1252_v19 = vand.u32 4294901760, %v1251_v48  ;;  %v1264_v39 = vand.u32 4294901760, %v1263_v18  ;;  %v6666_v5 = vand.u32 4294901760, %v6930_v7  ;;  %v414_v4 = vsub.f32 %v6928_v28, %v6664_v57  ;;  %v6931_v48 = vld [vmem:[#allocation48_spill] sm:$0xff] }
  0x84   :  { %v3785_v43 = vpack.c.bf16 %v409_v20, %v397_v32  ;;  %v403_v34 = vand.u32 4294901760, %v402_v16  ;;  %v1257_v10 = vsub.f32 %v6929_v30, %v6667_v59  ;;  %3976 = vmatpush1.bf16.msra.mxu1 %v3975_v9  ;;  %v6669_v18 = vand.u32 4294901760, %v6931_v48  ;;  %v6933_v16 = vld [vmem:[#allocation50_spill] sm:$0xff] }
  0x85   :  { %v3977_v52 = vpack.c.bf16 %v1264_v39, %v1252_v19  ;;  %v1269_v38 = vsub.f32 %v6930_v7, %v6666_v5  ;;  %v6670_v24 = vand.u32 4294901760, %v6932_v13  ;;  %v415_v32 = vand.u32 4294901760, %v414_v4  ;;  %v6934_v19 = vld [vmem:[#allocation54_spill] sm:$0xff]  ;;  %v6935_v4 = vld [vmem:[#allocation55_spill] sm:$0xff] }
  0x86   :  { %3786 = vmatprep.subr.bf16.mxu0 %v3785_v43  ;;  %v1258_v20 = vand.u32 4294901760, %v1257_v10  ;;  %v6672_v23 = vand.u32 4294901760, %v6933_v16  ;;  %v6674_v57 = vand.u32 4294901760, %v4881_v61  ;;  %v420_v39 = vsub.f32 %v6931_v48, %v6669_v18  ;;  %v6937_v48 = vld [vmem:[#allocation58_spill] sm:$0xff] }
  0x87   :  { %3978 = vmatprep.subr.bf16.mxu1 %v3977_v52  ;;  %v1270_v28 = vand.u32 4294901760, %v1269_v38  ;;  %v432_v9 = vsub.f32 %v6932_v13, %v6670_v24  ;;  %v6681_v5 = vand.u32 4294901760, %v6934_v19  ;;  %v3787_v59 = vpack.c.bf16 %v415_v32, %v403_v34 }
  0x88   :  { %v1275_v43 = vsub.f32 %v6933_v16, %v6672_v23  ;;  %v1287_v52 = vsub.f32 %v4881_v61, %v6674_v57  ;;  %v6679_v10 = vand.u32 4294901760, %v6935_v4  ;;  %v421_v7 = vand.u32 4294901760, %v420_v39  ;;  %v6936_v23 = vld [vmem:[#allocation57_spill] sm:$0xff] }
  0x89   :  { %v3979_v38 = vpack.c.bf16 %v1270_v28, %v1258_v20  ;;  %v433_v18 = vand.u32 4294901760, %v432_v9  ;;  %v426_v24 = vsub.f32 %v6934_v19, %v6681_v5  ;;  %3788 = vmatpush1.bf16.msra.mxu0 %v3787_v59  ;;  %v6680_v16 = vand.u32 4294901760, %v6936_v23  ;;  %v6938_v20 = vld [vmem:[#allocation60_spill] sm:$0xff] }
  0x8a   :  { %v1276_v13 = vand.u32 4294901760, %v1275_v43  ;;  %v1288_v34 = vand.u32 4294901760, %v1287_v52  ;;  %v438_v32 = vsub.f32 %v6935_v4, %v6679_v10  ;;  %v6682_v28 = vand.u32 4294901760, %v6937_v48  ;;  %v6939_v43 = vld [vmem:[#allocation61_spill] sm:$0xff] }
  0x8b   :  { %3980 = vmatpush1.bf16.msra.mxu1 %v3979_v38  ;;  %v3789_v57 = vpack.c.bf16 %v433_v18, %v421_v7  ;;  %v427_v61 = vand.u32 4294901760, %v426_v24  ;;  %v6683_v39 = vand.u32 4294901760, %v6938_v20  ;;  %v1281_v59 = vsub.f32 %v6936_v23, %v6680_v16  ;;  %v6940_v24 = vld [vmem:[#allocation62_spill] sm:$0xff] }
  0x8c   :  { %v3981_v9 = vpack.c.bf16 %v1288_v34, %v1276_v13  ;;  %v439_v30 = vand.u32 4294901760, %v438_v32  ;;  %v6684_v52 = vand.u32 4294901760, %v6939_v43  ;;  %v1293_v10 = vsub.f32 %v6937_v48, %v6682_v28 }
  0x8d   :  { %3790 = vmatprep.subr.bf16.mxu0 %v3789_v57  ;;  %v444_v7 = vsub.f32 %v6938_v20, %v6683_v39  ;;  %v6686_v18 = vand.u32 4294901760, %v6940_v24  ;;  %v6696_v13 = vand.u32 4294901760, %v4909_v1  ;;  %v1282_v34 = vand.u32 4294901760, %v1281_v59 }
  0x8e   :  { %3982 = vmatprep.subr.bf16.mxu1 %v3981_v9  ;;  %v3791_v38 = vpack.c.bf16 %v439_v30, %v427_v61  ;;  %v456_v32 = vsub.f32 %v6939_v43, %v6684_v52  ;;  %v6688_v57 = vand.u32 4294901760, %v4913_v29  ;;  %v1294_v16 = vand.u32 4294901760, %v1293_v10 }
  0x8f   :  { %v445_v5 = vand.u32 4294901760, %v444_v7  ;;  %v1299_v28 = vsub.f32 %v6940_v24, %v6686_v18  ;;  %v1311_v39 = vsub.f32 %v4909_v1, %v6696_v13  ;;  %v6689_v30 = vand.u32 4294901760, %v4915_v46 }
  0x90   :  { %3792 = vmatpush1.bf16.msra.mxu0 %v3791_v38  ;;  %v457_v9 = vand.u32 4294901760, %v456_v32  ;;  %v450_v61 = vsub.f32 %v4913_v29, %v6688_v57  ;;  %v6693_v59 = vand.u32 4294901760, %v4919_v55  ;;  %v3983_v10 = vpack.c.bf16 %v1294_v16, %v1282_v34 }
  0x91   :  { %v1300_v7 = vand.u32 4294901760, %v1299_v28  ;;  %v1312_v52 = vand.u32 4294901760, %v1311_v39  ;;  %v6690_v43 = vand.u32 4294901760, %v4921_v3  ;;  %v462_v38 = vsub.f32 %v4915_v46, %v6689_v30 }
  0x92   :  { %v3793_v18 = vpack.c.bf16 %v457_v9, %v445_v5  ;;  %v451_v24 = vand.u32 4294901760, %v450_v61  ;;  %v1305_v32 = vsub.f32 %v4919_v55, %v6693_v59  ;;  %3984 = vmatpush1.bf16.msra.mxu1 %v3983_v10  ;;  %v6691_v28 = vand.u32 4294901760, %v4927_v33 }
  0x93   :  { %v3985_v57 = vpack.c.bf16 %v1312_v52, %v1300_v7  ;;  %v1317_v16 = vsub.f32 %v4921_v3, %v6690_v43  ;;  %v6692_v39 = vand.u32 4294901760, %v4929_v31  ;;  %v463_v5 = vand.u32 4294901760, %v462_v38 }
  0x94   :  { %3794 = vmatprep.subr.bf16.mxu0 %v3793_v18  ;;  %v1306_v34 = vand.u32 4294901760, %v1305_v32  ;;  %v6694_v9 = vand.u32 4294901760, %v4933_v11  ;;  %v6695_v61 = vand.u32 4294901760, %v4939_v56  ;;  %v468_v52 = vsub.f32 %v4927_v33, %v6691_v28 }
  0x95   :  { %3986 = vmatprep.subr.bf16.mxu1 %v3985_v57  ;;  %v1318_v30 = vand.u32 4294901760, %v1317_v16  ;;  %v480_v10 = vsub.f32 %v4929_v31, %v6692_v39  ;;  %v6700_v7 = vand.u32 4294901760, %v4943_v0  ;;  %v3795_v43 = vpack.c.bf16 %v463_v5, %v451_v24 }
  0x96   :  { %v1323_v18 = vsub.f32 %v4933_v11, %v6694_v9  ;;  %v1335_v57 = vsub.f32 %v4939_v56, %v6695_v61  ;;  %v6697_v38 = vand.u32 4294901760, %v4948_v25  ;;  %v469_v16 = vand.u32 4294901760, %v468_v52 }
  0x97   :  { %v3987_v32 = vpack.c.bf16 %v1318_v30, %v1306_v34  ;;  %v481_v28 = vand.u32 4294901760, %v480_v10  ;;  %v474_v39 = vsub.f32 %v4943_v0, %v6700_v7  ;;  %3796 = vmatpush1.bf16.msra.mxu0 %v3795_v43  ;;  %v6698_v9 = vand.u32 4294901760, %v4952_v27  ;;  %v6947_v7 = vld [vmem:[#allocation37_spill] sm:$0xff] }
  0x98   :  { %v1324_v59 = vand.u32 4294901760, %v1323_v18  ;;  %v1336_v24 = vand.u32 4294901760, %v1335_v57  ;;  %v486_v5 = vsub.f32 %v4948_v25, %v6697_v38  ;;  %v6699_v30 = vand.u32 4294901760, %v4954_v44  ;;  %v6941_v18 = vld [vmem:[#allocation14_spill] sm:$0xff] }
  0x99   :  { %3988 = vmatpush1.bf16.msra.mxu1 %v3987_v32  ;;  %v3797_v61 = vpack.c.bf16 %v481_v28, %v469_v16  ;;  %v475_v13 = vand.u32 4294901760, %v474_v39  ;;  %v1329_v10 = vsub.f32 %v4952_v27, %v6698_v9  ;;  %v3801_v57 = vpack.c.bf16 %v6941_v18, %v4732_v17  ;;  %v6942_v16 = vld [vmem:[#allocation15_spill] sm:$0xff] }
  0x9a   :  { %v3989_v34 = vpack.c.bf16 %v1336_v24, %v1324_v59  ;;  %v487_v52 = vand.u32 4294901760, %v486_v5  ;;  %v1341_v43 = vsub.f32 %v4954_v44, %v6699_v30  ;;  %v6943_v59 = vld [vmem:[#allocation17_spill] sm:$0xff]  ;;  %v6944_v5 = vld [vmem:[#allocation19_spill] sm:$0xff]  ;;  %v6948_v18 = vmov 0.0  }
  0x9b   :  { %3798 = vmatprep.subr.bf16.mxu0 %v3797_v61  ;;  %v1330_v28 = vand.u32 4294901760, %v1329_v10  ;;  %v3993_v24 = vpack.c.bf16 %v6943_v59, %v6942_v16  ;;  %v3803_v38 = vpack.c.bf16 %v6944_v5, %v4744_v26  ;;  %v3805_v61 = vpack.c.bf16 %v4761_v47, %v4757_v42  ;;  %v6945_v30 = vld [vmem:[#allocation77_spill] sm:$0xff] }
  0x9c   :  { %3990 = vmatprep.subr.bf16.mxu1 %v3989_v34  ;;  %v3799_v32 = vpack.c.bf16 %v487_v52, %v475_v13  ;;  %v1342_v39 = vand.u32 4294901760, %v1341_v43  ;;  %v3995_v13 = vpack.c.bf16 %v4755_v41, %v4753_v40  ;;  %v3997_v34 = vpack.c.bf16 %v4768_v51, %v4765_v49 }
  0x9d   :  { %v3807_v52 = vpack.c.bf16 %v4776_v62, %v4770_v53  ;;  %v3999_v10 = vpack.c.bf16 %v4782_v6, %v4778_v63  ;;  %v3809_v43 = vpack.c.bf16 %v4789_v12, %v4786_v8  ;;  %v6949_v17 = vand.u32 4294901760, %v6942_v16 }
  0x9e   :  { %3800 = vmatpush1.bf16.msra.mxu0 %v3799_v32  ;;  %v3991_v9 = vpack.c.bf16 %v1342_v39, %v1330_v28  ;;  %v4003_v32 = vpack.c.bf16 %v4810_v50, %v4808_v45  ;;  %v3813_v28 = vpack.c.bf16 %v4818_v58, %v4814_v54  ;;  %v3815_v39 = vpack.c.bf16 %v4832_v37, %v4828_v22 }
  0x9f   :  { %3802 = vmatprep.subr.bf16.mxu0 %v3801_v57  ;;  %v3811_v57 = vpack.c.bf16 %v4804_v36, %v4802_v35  ;;  %v6950_v44 = vand.u32 4294901760, %v6943_v59  ;;  %v6951_v25 = vand.u32 4294901760, %v4744_v26  ;;  %v6953_v56 = vand.u32 4294901760, %v4753_v40 }
  0xa0   :  { %3992 = vmatpush1.bf16.msra.mxu1 %v3991_v9  ;;  %v4001_v9 = vpack.c.bf16 %v4795_v15, %v4793_v14  ;;  %v6954_v11 = vand.u32 4294901760, %v4755_v41  ;;  %v6955_v16 = vand.u32 4294901760, %v4757_v42  ;;  %v6957_v26 = vand.u32 4294901760, %v4765_v49 }
  0xa1   :  { %523 = vmatmul.mubr.f32.vlgmr.msra.gmra.mrb[0].mxu0 %v6945_v30  ;;  %3994 = vmatprep.subr.bf16.mxu1 %v3993_v24  ;;  %v6946_v24 = vld [vmem:[#allocation36_spill] sm:$0xff]  ;;  %v5268_v27 = vpack.c.bf16 %v6950_v44, %v6949_v17  ;;  %v6956_v17 = vand.u32 4294901760, %v4761_v47  ;;  %v6958_v59 = vand.u32 4294901760, %v4768_v51  ;;  %v6959_v40 = vand.u32 4294901760, %v4770_v53 }
  0xa2   :  { %3804 = vmatpush1.bf16.msra.mxu0 %v3803_v38  ;;  %v4005_v38 = vpack.c.bf16 %v4825_v2, %v4822_v60  ;;  %657 = vmatprep.mubr.f32.mxu0 %v6948_v18  ;;  %v5281_v31 = vpack.c.bf16 %v6954_v11, %v6953_v56  ;;  %v6960_v41 = vand.u32 4294901760, %v4776_v62  ;;  %v6961_v42 = vand.u32 4294901760, %v4778_v63 }
  0xa3   :  { %3806 = vmatprep.subr.bf16.mxu0 %v3805_v61  ;;  %1378 = vmatmul.mubr.f32.vlgmr.msra.gmra.mrb[0].mxu1 %v6945_v30  ;;  %v3817_v61 = vpack.c.bf16 %v6947_v7, %v6946_v24  ;;  %v6952_v30 = vand.u32 4294901760, %v6944_v5  ;;  %v5287_v44 = vpack.c.bf16 %v6956_v17, %v6955_v16  ;;  %v6962_v47 = vand.u32 4294901760, %v4782_v6 }
  0xa4   :  { %3996 = vmatpush1.bf16.msra.mxu1 %v3995_v13  ;;  %1512 = vmatprep.mubr.f32.mxu1 %v6948_v18  ;;  %v5299_v11 = vpack.c.bf16 %v6960_v41, %v6959_v40  ;;  %v6964_v49 = vand.u32 4294901760, %v4789_v12  ;;  %v6965_v5 = vand.u32 4294901760, %v4793_v14  ;;  %v6966_v53 = vand.u32 4294901760, %v4795_v15  ;;  %v6983_v41 = vld [vmem:[#allocation38_spill] sm:$0xff] }
  0xa5   :  { %v5275_v0 = vpack.c.bf16 %v6952_v30, %v6951_v25  ;;  %3998 = vmatprep.subr.bf16.mxu1 %v3997_v34  ;;  %v5293_v25 = vpack.c.bf16 %v6958_v59, %v6957_v26  ;;  %v5305_v56 = vpack.c.bf16 %v6962_v47, %v6961_v42  ;;  %v6963_v30 = vand.u32 4294901760, %v4786_v8  ;;  %v6979_v59 = vld [vmem:[#allocation34_spill] sm:$0xff] }
  0xa6   :  { %3808 = vmatpush1.bf16.msra.mxu0 %v3807_v52  ;;  %v5317_v62 = vpack.c.bf16 %v6966_v53, %v6965_v5  ;;  %v6967_v13 = vand.u32 4294901760, %v4802_v35  ;;  %v6968_v63 = vand.u32 4294901760, %v4804_v36  ;;  %v6969_v34 = vand.u32 4294901760, %v4808_v45  ;;  %v6986_v47 = vld [vmem:[#allocation42_spill] sm:$0xff] }
  0xa7   :  { %3810 = vmatprep.subr.bf16.mxu0 %v3809_v43  ;;  %v5311_v51 = vpack.c.bf16 %v6964_v49, %v6963_v30  ;;  %v6970_v8 = vand.u32 4294901760, %v4810_v50  ;;  %v6971_v12 = vand.u32 4294901760, %v4814_v54  ;;  %v6972_v14 = vand.u32 4294901760, %v4818_v58  ;;  %v6977_v50 = vld [vmem:[#allocation33_spill] sm:$0xff]  ;;  %v6988_v49 = vld [vmem:[#allocation43_spill] sm:$0xff] }
  0xa8   :  { %v5323_v6 = vpack.c.bf16 %v6968_v63, %v6967_v13  ;;  %v6973_v15 = vand.u32 4294901760, %v4822_v60  ;;  %v6974_v35 = vand.u32 4294901760, %v4825_v2  ;;  %v6975_v36 = vand.u32 4294901760, %v4828_v22  ;;  %4000 = vmatpush1.bf16.msra.mxu1 %v3999_v10  ;;  %v6991_v13 = vld [vmem:[#allocation45_spill] sm:$0xff]  ;;  %v6993_v63 = vld [vmem:[#allocation46_spill] sm:$0xff] }
  0xa9   :  { %v5329_v52 = vpack.c.bf16 %v6970_v8, %v6969_v34  ;;  %v5335_v43 = vpack.c.bf16 %v6972_v14, %v6971_v12  ;;  %v6976_v45 = vand.u32 4294901760, %v4832_v37  ;;  %v6978_v26 = vand.u32 4294901760, %v6977_v50  ;;  %4002 = vmatprep.subr.bf16.mxu1 %v4001_v9  ;;  %v6998_v12 = vld [vmem:[#allocation49_spill] sm:$0xff] }
  0xaa   :  { %v5341_v16 = vpack.c.bf16 %v6974_v35, %v6973_v15  ;;  %v6980_v54 = vand.u32 4294901760, %v6979_v59  ;;  %v6981_v58 = vand.u32 4294901760, %v6946_v24  ;;  %v6982_v60 = vand.u32 4294901760, %v6947_v7  ;;  %3812 = vmatpush1.bf16.msra.mxu0 %v3811_v57  ;;  %v6996_v7 = vld [vmem:[#allocation48_spill] sm:$0xff]  ;;  %v7001_v35 = vld [vmem:[#allocation50_spill] sm:$0xff] }
  0xab   :  { %v5347_v17 = vpack.c.bf16 %v6976_v45, %v6975_v36  ;;  %v6984_v42 = vand.u32 4294901760, %v6983_v41  ;;  %v6985_v22 = vand.u32 4294901760, %v6926_v21  ;;  %v6987_v30 = vand.u32 4294901760, %v6986_v47  ;;  %v7003_v45 = vld [vmem:[#allocation52_spill] sm:$0xff]  ;;  %3814 = vmatprep.subr.bf16.mxu0 %v3813_v28 }
  0xac   :  { %v5353_v40 = vpack.c.bf16 %v6980_v54, %v6978_v26  ;;  %v5359_v2 = vpack.c.bf16 %v6982_v60, %v6981_v58  ;;  %v6989_v5 = vand.u32 4294901760, %v6988_v49  ;;  %v6992_v10 = vand.u32 4294901760, %v6991_v13  ;;  %4004 = vmatpush1.bf16.msra.mxu1 %v4003_v32 }
  0xad   :  { %v5365_v37 = vpack.c.bf16 %v6985_v22, %v6984_v42  ;;  %v6994_v24 = vand.u32 4294901760, %v6993_v63  ;;  %v6997_v8 = vand.u32 4294901760, %v6996_v7  ;;  %v6999_v14 = vand.u32 4294901760, %v6998_v12  ;;  %4006 = vmatprep.subr.bf16.mxu1 %v4005_v38 }
  0xae   :  { %v5371_v53 = vpack.c.bf16 %v6989_v5, %v6987_v30  ;;  %v7002_v36 = vand.u32 4294901760, %v7001_v35  ;;  %v7004_v26 = vand.u32 4294901760, %v7003_v45  ;;  %v7006_v58 = vand.u32 4294901760, %v6934_v19  ;;  %v7013_v5 = vld [vmem:[#allocation61_spill] sm:$0xff]  ;;  %3816 = vmatpush1.bf16.msra.mxu0 %v3815_v39 }
  0xaf   :  { %v5377_v34 = vpack.c.bf16 %v6994_v24, %v6992_v10  ;;  %v5383_v15 = vpack.c.bf16 %v6999_v14, %v6997_v8  ;;  %v7007_v60 = vand.u32 4294901760, %v6935_v4  ;;  %v7009_v9 = vand.u32 4294901760, %v6936_v23  ;;  %v7016_v8 = vld [vmem:[#allocation62_spill] sm:$0xff]  ;;  %3818 = vmatprep.subr.bf16.mxu0 %v3817_v61 }
  0xb0   :  { %6990 = vst [vmem:[#allocation40_spill] sm:$0xff] %v5371_v53  ;;  %v5389_v54 = vpack.c.bf16 %v7004_v26, %v7002_v36  ;;  %v7010_v57 = vand.u32 4294901760, %v6937_v48  ;;  %v7012_v30 = vand.u32 4294901760, %v6938_v20  ;;  %v7014_v10 = vand.u32 4294901760, %v7013_v5 }
  0xb1   :  { %6995 = vst [vmem:[#allocation54_spill] sm:$0xff] %v5377_v34  ;;  %7000 = vst [vmem:[#allocation55_spill] sm:$0xff] %v5383_v15  ;;  %v5395_v42 = vpack.c.bf16 %v7007_v60, %v7006_v58  ;;  %v7017_v14 = vand.u32 4294901760, %v7016_v8  ;;  %v7018_v36 = vand.u32 4294901760, %v4909_v1  ;;  %v7020_v28 = vand.u32 4294901760, %v4913_v29 }
  0xb2   :  { %7005 = vst [vmem:[#allocation57_spill] sm:$0xff] %v5389_v54  ;;  %v5401_v22 = vpack.c.bf16 %v7010_v57, %v7009_v9  ;;  %v5407_v24 = vpack.c.bf16 %v7014_v10, %v7012_v30  ;;  %v7021_v58 = vand.u32 4294901760, %v4915_v46  ;;  %v7023_v9 = vand.u32 4294901760, %v4919_v55  ;;  %v7027_v10 = vld [vmem:[#allocation67_spill] sm:$0xff] }
  0xb3   :  { %7008 = vst [vmem:[#allocation58_spill] sm:$0xff] %v5395_v42  ;;  %v5413_v26 = vpack.c.bf16 %v7018_v36, %v7017_v14  ;;  %v7024_v57 = vand.u32 4294901760, %v4921_v3  ;;  %v7026_v30 = vand.u32 4294901760, %v4927_v33  ;;  %v7030_v14 = vld [vmem:[#allocation68_spill] sm:$0xff]  ;;  %v3821_v32 = vpack.c.bf16 %v6998_v12, %v6996_v7  ;;  %v7052_v7 = vld [vmem:[#allocation26_spill] sm:$0xff]  ;;  %v7053_v12 = vld [vmem:[#allocation27_spill] sm:$0xff] }
  0xb4   :  { %7011 = vst [vmem:[#allocation60_spill] sm:$0xff] %v5401_v22  ;;  %7015 = vst [vmem:[#allocation15_spill] sm:$0xff] %v5407_v24  ;;  %v5419_v60 = vpack.c.bf16 %v7021_v58, %v7020_v28  ;;  %v7028_v24 = vand.u32 4294901760, %v7027_v10  ;;  %v7031_v36 = vand.u32 4294901760, %v7030_v14  ;;  %v7034_v28 = vld [vmem:[#allocation72_spill] sm:$0xff]  ;;  %v4013_v38 = vpack.c.bf16 %v7003_v45, %v7001_v35  ;;  %v7056_v45 = vld [vmem:[#allocation30_spill] sm:$0xff] }
  0xb5   :  { %7019 = vst [vmem:[#allocation17_spill] sm:$0xff] %v5413_v26  ;;  %v5425_v22 = vpack.c.bf16 %v7024_v57, %v7023_v9  ;;  %v7032_v26 = vld [vmem:[#allocation70_spill] sm:$0xff]  ;;  %v7035_v58 = vand.u32 4294901760, %v7034_v28  ;;  %v4007_v9 = vpack.c.bf16 %v6979_v59, %v6977_v50  ;;  %v7038_v57 = vld [vmem:[#allocation75_spill] sm:$0xff]  ;;  %v4011_v50 = vpack.c.bf16 %v6993_v63, %v6991_v13  ;;  %v7050_v13 = vld [vmem:[#allocation25_spill] sm:$0xff] }
  0xb6   :  { %7022 = vst [vmem:[#allocation19_spill] sm:$0xff] %v5419_v60  ;;  %v5431_v42 = vpack.c.bf16 %v7028_v24, %v7026_v30  ;;  %v7033_v54 = vand.u32 4294901760, %v7032_v26  ;;  %v7036_v60 = vld [vmem:[#allocation73_spill] sm:$0xff]  ;;  %v7040_v24 = vld [vmem:[#allocation76_spill] sm:$0xff]  ;;  %v3823_v39 = vpack.c.bf16 %v6935_v4, %v6934_v19  ;;  %v4015_v61 = vpack.c.bf16 %v6937_v48, %v6936_v23 }
  0xb7   :  { %7025 = vst [vmem:[#allocation36_spill] sm:$0xff] %v5425_v22  ;;  %v7037_v15 = vand.u32 4294901760, %v7036_v60  ;;  %v7039_v22 = vand.u32 4294901760, %v7038_v57  ;;  %v7041_v30 = vand.u32 4294901760, %v7040_v24  ;;  %4008 = vmatpush1.bf16.msra.mxu1 %v4007_v9  ;;  %v4017_v59 = vpack.c.bf16 %v4909_v1, %v7016_v8  ;;  %v7042_v1 = vld [vmem:[#allocation12_spill] sm:$0xff]  ;;  %v7066_v9 = vld [vmem:[#allocation59_spill] sm:$0xff] }
  0xb8   :  { %7029 = vst [vmem:[#allocation37_spill] sm:$0xff] %v5431_v42  ;;  %v5437_v34 = vpack.c.bf16 %v7033_v54, %v7031_v36  ;;  %v4009_v54 = vpack.c.bf16 %v6926_v21, %v6983_v41  ;;  %v3819_v36 = vpack.c.bf16 %v6988_v49, %v6986_v47  ;;  %v3825_v21 = vpack.c.bf16 %v7013_v5, %v6938_v20  ;;  %v7047_v20 = vld [vmem:[#allocation20_spill] sm:$0xff]  ;;  %v7048_v47 = vld [vmem:[#allocation22_spill] sm:$0xff]  ;;  %v7049_v49 = vld [vmem:[#allocation23_spill] sm:$0xff] }
  0xb9   :  { %v5443_v53 = vpack.c.bf16 %v7037_v15, %v7035_v58  ;;  %v5451_v42 = vpack.c.bf16 %v7041_v30, %v7039_v22  ;;  %v3827_v41 = vpack.c.bf16 %v4915_v46, %v4913_v29  ;;  %v3829_v19 = vpack.c.bf16 %v7027_v10, %v4927_v33  ;;  %v7043_v29 = vld [vmem:[#allocation78_spill] sm:$0xff]  ;;  %v7046_v33 = vld [vmem:[#allocation21_spill] sm:$0xff]  ;;  %v7051_v63 = vld [vmem:[#allocation24_spill] sm:$0xff] }
  0xba   :  { %4010 = vmatprep.subr.bf16.mxu1 %v4009_v54  ;;  %3820 = vmatpush1.bf16.msra.mxu0 %v3819_v36  ;;  %v4019_v4 = vpack.c.bf16 %v4921_v3, %v4919_v55  ;;  %v4021_v23 = vpack.c.bf16 %v7032_v26, %v7030_v14  ;;  %v3831_v48 = vpack.c.bf16 %v7036_v60, %v7034_v28  ;;  %v7044_v55 = vld [vmem:[#allocation16_spill] sm:$0xff]  ;;  %v7045_v3 = vld [vmem:[#allocation18_spill] sm:$0xff]  ;;  %v7054_v15 = vld [vmem:[#allocation29_spill] sm:$0xff] }
  0xbb   :  { %3822 = vmatprep.subr.bf16.mxu0 %v3821_v32  ;;  %4012 = vmatpush1.bf16.msra.mxu1 %v4011_v50  ;;  %v4023_v46 = vpack.c.bf16 %v7040_v24, %v7038_v57  ;;  %v7055_v35 = vld [vmem:[#allocation28_spill] sm:$0xff]  ;;  %v7057_v22 = vld [vmem:[#allocation31_spill] sm:$0xff]  ;;  %v7061_v60 = vld [vmem:[#allocation41_spill] sm:$0xff] }
  0xbc   :  { %4014 = vmatprep.subr.bf16.mxu1 %v4013_v38  ;;  %v7058_v5 = vld [vmem:[#allocation35_spill] sm:$0xff]  ;;  %v7059_v8 = vld [vmem:[#allocation32_spill] sm:$0xff]  ;;  %v7065_v58 = vld [vmem:[#allocation53_spill] sm:$0xff] }
  0xbd   :  { %v7060_v26 = vld [vmem:[#allocation39_spill] sm:$0xff]  ;;  %v7063_v14 = vld [vmem:[#allocation44_spill] sm:$0xff]  ;;  %v7070_v54 = vld [vmem:[#allocation66_spill] sm:$0xff] }
  0xbe   :  { %3824 = vmatpush1.bf16.msra.mxu0 %v3823_v39  ;;  %v7062_v10 = vld [vmem:[#allocation47_spill] sm:$0xff]  ;;  %v7067_v57 = vld [vmem:[#allocation56_spill] sm:$0xff]  ;;  %v7071_v36 = vld [vmem:[#allocation13_spill] sm:$0xff] }
  0xbf   :  { %3826 = vmatprep.subr.bf16.mxu0 %v3825_v21  ;;  %4016 = vmatpush1.bf16.msra.mxu1 %v4015_v61  ;;  %v7064_v28 = vld [vmem:[#allocation51_spill] sm:$0xff]  ;;  %v7069_v30 = vld [vmem:[#allocation64_spill] sm:$0xff]  ;;  %v7072_v32 = vand.u32 4294901760, %v7071_v36  ;;  %v7073_v50 = vld [vmem:[#allocation14_spill] sm:$0xff] }
  0xc0   :  { %4018 = vmatprep.subr.bf16.mxu1 %v4017_v59  ;;  %v7068_v24 = vld [vmem:[#allocation63_spill] sm:$0xff]  ;;  %v7074_v38 = vand.u32 4294901760, %v7073_v50  ;;  %v7075_v21 = vld [vmem:[#allocation65_spill] sm:$0xff] }
  0xc1   :  { %v7076_v61 = vld [vmem:[#allocation69_spill] sm:$0xff]  ;;  %v7077_v59 = vld [vmem:[#allocation71_spill] sm:$0xff] }
  0xc2   :  { %3828 = vmatpush1.bf16.msra.mxu0 %v3827_v41  ;;  %v3865_v39 = vpack.c.bf16 %v7074_v38, %v7072_v32  ;;  %v7078_v41 = vld [vmem:[#allocation74_spill] sm:$0xff]  ;;  %v84_v50 = vld [vmem:[#allocation7 + $0xb8] sm:$0xff] }
  0xc3   :  { %3830 = vmatprep.subr.bf16.mxu0 %v3829_v19  ;;  %4020 = vmatpush1.bf16.msra.mxu1 %v4019_v4  ;;  %v7079_v19 = vld [vmem:[#allocation79_spill] sm:$0xff]  ;;  %v7080_v4 = vld [vmem:[#allocation40_spill] sm:$0xff]  ;;  %v92_v38 = vld [vmem:[#allocation7 + $0xf8] sm:$0xff] }
  0xc4   :  { %4022 = vmatprep.subr.bf16.mxu1 %v4021_v23  ;;  %v82_v23 = vld [vmem:[#allocation7 + $0xa8] sm:$0xff] }
  0xc6   :  { %3832 = vmatpush1.bf16.msra.mxu0 %v3831_v48  ;;  %v90_v48 = vld [vmem:[#allocation7 + $0xe8] sm:$0xff] }
  0xc7   :  { %3834 = vmatprep.subr.bf16.mxu0 %v7042_v1  ;;  %4024 = vmatpush1.bf16.msra.mxu1 %v4023_v46  ;;  %v7081_v46 = vld [vmem:[#allocation55_spill] sm:$0xff] }
  0xc8   :  { %4026 = vmatprep.subr.bf16.mxu1 %v7044_v55 }
  0xc9   :  { %660 = vmatmul.mubr.f32.vlgmr.msra.gmra.mrb[0].mxu0 %v7043_v29 }
  0xca   :  { %3836 = vmatpush1.bf16.msra.mxu0 %v7045_v3  ;;  %762 = vmatprep.mubr.f32.mxu0 %v6948_v18 }
  0xcb   :  { %3838 = vmatprep.subr.bf16.mxu0 %v7046_v33  ;;  %1515 = vmatmul.mubr.f32.vlgmr.msra.gmra.mrb[0].mxu1 %v7043_v29  ;;  %v1911_v29 = vand.u32 4294901760, %v90_v48 }
  0xcc   :  { %4028 = vmatpush1.bf16.msra.mxu1 %v7047_v20  ;;  %1617 = vmatprep.mubr.f32.mxu1 %v6948_v18 }
  0xcd   :  { %4030 = vmatprep.subr.bf16.mxu1 %v7048_v47 }
  0xce   :  { %3840 = vmatpush1.bf16.msra.mxu0 %v7049_v49 }
  0xcf   :  { %3842 = vmatprep.subr.bf16.mxu0 %v7050_v13 }
  0xd0   :  { %4032 = vmatpush1.bf16.msra.mxu1 %v7051_v63 }
  0xd1   :  { %4034 = vmatprep.subr.bf16.mxu1 %v7052_v7 }
  0xd2   :  { %3844 = vmatpush1.bf16.msra.mxu0 %v7053_v12 }
  0xd3   :  { %3846 = vmatprep.subr.bf16.mxu0 %v7054_v15 }
  0xd4   :  { %4036 = vmatpush1.bf16.msra.mxu1 %v7055_v35 }
  0xd5   :  { %4038 = vmatprep.subr.bf16.mxu1 %v7056_v45 }
  0xd6   :  { %3848 = vmatpush1.bf16.msra.mxu0 %v7057_v22 }
  0xd7   :  { %3850 = vmatprep.subr.bf16.mxu0 %v7058_v5 }
  0xd8   :  { %4040 = vmatpush1.bf16.msra.mxu1 %v7059_v8 }
  0xd9   :  { %4042 = vmatprep.subr.bf16.mxu1 %v7060_v26 }
  0xda   :  { %3852 = vmatpush1.bf16.msra.mxu0 %v7061_v60 }
  0xdb   :  { %3854 = vmatprep.subr.bf16.mxu0 %v7062_v10 }
  0xdc   :  { %4044 = vmatpush1.bf16.msra.mxu1 %v7063_v14 }
  0xdd   :  { %4046 = vmatprep.subr.bf16.mxu1 %v7064_v28 }
  0xde   :  { %3856 = vmatpush1.bf16.msra.mxu0 %v7065_v58 }
  0xdf   :  { %3858 = vmatprep.subr.bf16.mxu0 %v7066_v9 }
  0xe0   :  { %4048 = vmatpush1.bf16.msra.mxu1 %v7067_v57 }
  0xe1   :  { %4050 = vmatprep.subr.bf16.mxu1 %v7068_v24  ;;  %v98_v24 = vld [vmem:[#allocation7 + $0x128] sm:$0xff] }
  0xe2   :  { %3860 = vmatpush1.bf16.msra.mxu0 %v7069_v30  ;;  %v2766_v30 = vand.u32 4294901760, %v92_v38 }
  0xe3   :  { %3862 = vmatprep.subr.bf16.mxu0 %v7070_v54  ;;  %v2762_v54 = vand.u32 4294901760, %v84_v50 }
  0xe4   :  { %4052 = vmatpush1.bf16.msra.mxu1 %v7075_v21  ;;  %v83_v21 = vld [vmem:[#allocation7 + $0xb0] sm:$0xff] }
  0xe5   :  { %4054 = vmatprep.subr.bf16.mxu1 %v7076_v61  ;;  %v7087_v61 = vld [vmem:[#allocation57_spill] sm:$0xff] }
  0xe6   :  { %3864 = vmatpush1.bf16.msra.mxu0 %v7077_v59  ;;  %v89_v59 = vld [vmem:[#allocation7 + $0xe0] sm:$0xff] }
  0xe7   :  { %3866 = vmatprep.subr.bf16.mxu0 %v3865_v39  ;;  %v7084_v39 = vld [vmem:[#allocation54_spill] sm:$0xff] }
  0xe8   :  { %4056 = vmatpush1.bf16.msra.mxu1 %v7078_v41  ;;  %v81_v41 = vld [vmem:[#allocation7 + $0xa0] sm:$0xff] }
  0xe9   :  { %766 = vmatmul.mubr.f32.vlgmr.msra.gmra.mrb[0].mxu0 %v7079_v19  ;;  %4058 = vmatprep.subr.bf16.mxu1 %v5268_v27  ;;  %v66_v27 = vld [vmem:[#allocation7 + $0x28] sm:$0xff] }
  0xea   :  { %3868 = vmatpush1.bf16.msra.mxu0 %v5275_v0  ;;  %932 = vmatprep.mubr.f32.mxu0 %v6948_v18  ;;  %v68_v0 = vld [vmem:[#allocation7 + $0x38] sm:$0xff] }
  0xeb   :  { %3870 = vmatprep.subr.bf16.mxu0 %v5287_v44  ;;  %1621 = vmatmul.mubr.f32.vlgmr.msra.gmra.mrb[0].mxu1 %v7079_v19  ;;  %v76_v44 = vld [vmem:[#allocation7 + $0x78] sm:$0xff] }
  0xec   :  { %4060 = vmatpush1.bf16.msra.mxu1 %v5281_v31  ;;  %1787 = vmatprep.mubr.f32.mxu1 %v6948_v18  ;;  %v74_v31 = vld [vmem:[#allocation7 + $0x68] sm:$0xff] }
  0xed   :  { %4062 = vmatprep.subr.bf16.mxu1 %v5293_v25  ;;  %v65_v25 = vld [vmem:[#allocation7 + $0x20] sm:$0xff] }
  0xee   :  { %3872 = vmatpush1.bf16.msra.mxu0 %v5299_v11  ;;  %v73_v11 = vld [vmem:[#allocation7 + $0x60] sm:$0xff] }
  0xef   :  { %3874 = vmatprep.subr.bf16.mxu0 %v5311_v51  ;;  %v1903_v51 = vand.u32 4294901760, %v74_v31 }
  0xf0   :  { %4064 = vmatpush1.bf16.msra.mxu1 %v5305_v56  ;;  %v1899_v56 = vand.u32 4294901760, %v66_v27 }
  0xf1   :  { %4066 = vmatprep.subr.bf16.mxu1 %v5317_v62  ;;  %v2754_v62 = vand.u32 4294901760, %v68_v0  ;;  %v5551_v19 = vsub.f32 %v74_v31, %v1903_v51  ;;  %v7092_v31 = vld [vmem:[#allocation15_spill] sm:$0xff] }
  0xf2   :  { %3876 = vmatpush1.bf16.msra.mxu0 %v5323_v6  ;;  %v2758_v6 = vand.u32 4294901760, %v76_v44  ;;  %v5548_v36 = vsub.f32 %v66_v27, %v1899_v56 }
  0xf3   :  { %3878 = vmatprep.subr.bf16.mxu0 %v5335_v43  ;;  %v67_v43 = vld [vmem:[#allocation7 + $0x30] sm:$0xff]  ;;  %7085 = vst [vmem:[#allocation38_spill] sm:$0xff] %v5551_v19  ;;  %v5557_v27 = vsub.f32 %v68_v0, %v2754_v62 }
  0xf4   :  { %4068 = vmatpush1.bf16.msra.mxu1 %v5329_v52  ;;  %v75_v52 = vld [vmem:[#allocation7 + $0x70] sm:$0xff]  ;;  %7083 = vst [vmem:[#allocation34_spill] sm:$0xff] %v5548_v36  ;;  %v2756_v32 = vand.u32 4294901760, %v67_v43 }
  0xf5   :  { %4070 = vmatprep.subr.bf16.mxu1 %v5341_v16  ;;  %v1901_v16 = vand.u32 4294901760, %v65_v25  ;;  %7089 = vst [vmem:[#allocation43_spill] sm:$0xff] %v5557_v27  ;;  %v7111_v27 = vld [vmem:[#allocation36_spill] sm:$0xff] }
  0xf6   :  { %3880 = vmatpush1.bf16.msra.mxu0 %v5347_v17  ;;  %v1905_v17 = vand.u32 4294901760, %v73_v11  ;;  %v5570_v0 = vsub.f32 %v67_v43, %v2756_v32  ;;  %v5581_v43 = vsub.f32 %v90_v48, %v1911_v29 }
  0xf7   :  { %3882 = vmatprep.subr.bf16.mxu0 %v5359_v2  ;;  %v5546_v2 = vpack.c.bf16 %v1903_v51, %v1899_v56  ;;  %v5559_v56 = vsub.f32 %v76_v44, %v2758_v6  ;;  %v5564_v51 = vsub.f32 %v65_v25, %v1901_v16  ;;  %v1909_v44 = vand.u32 4294901760, %v81_v41 }
  0xf8   :  { %4072 = vmatpush1.bf16.msra.mxu1 %v5353_v40  ;;  %v2760_v40 = vand.u32 4294901760, %v75_v52  ;;  %7096 = vst [vmem:[#allocation52_spill] sm:$0xff] %v5570_v0  ;;  %v2764_v25 = vand.u32 4294901760, %v83_v21  ;;  %7103 = vst [vmem:[#allocation68_spill] sm:$0xff] %v5581_v43  ;;  %v97_v0 = vld [vmem:[#allocation7 + $0x120] sm:$0xff]  ;;  %v114_v43 = vld [vmem:[#allocation7 + $0x1a8] sm:$0xff] }
  0xf9   :  { %4074 = vmatprep.subr.bf16.mxu1 %v5365_v37  ;;  %7082 = vst [vmem:[#allocation33_spill] sm:$0xff] %v5546_v2  ;;  %v5553_v37 = vpack.c.bf16 %v2758_v6, %v2754_v62  ;;  %7090 = vst [vmem:[#allocation45_spill] sm:$0xff] %v5559_v56  ;;  %v5561_v2 = vpack.c.bf16 %v1905_v17, %v1901_v16  ;;  %v1913_v62 = vand.u32 4294901760, %v89_v59  ;;  %v7097_v6 = vld [vmem:[#allocation60_spill] sm:$0xff] }
  0xfa   :  { %3884 = vmatpush1.bf16.msra.mxu0 %v7080_v4  ;;  %v1907_v4 = vand.u32 4294901760, %v82_v23  ;;  %7093 = vst [vmem:[#allocation48_spill] sm:$0xff] %v5564_v51  ;;  %v5568_v57 = vpack.c.bf16 %v2760_v40, %v2756_v32  ;;  %v1915_v32 = vand.u32 4294901760, %v98_v24  ;;  %v5590_v56 = vsub.f32 %v81_v41, %v1909_v44 }
  0xfb   :  { %3886 = vmatprep.subr.bf16.mxu0 %v7081_v46  ;;  %7086 = vst [vmem:[#allocation42_spill] sm:$0xff] %v5553_v37  ;;  %v7088_v46 = vld [vmem:[#allocation58_spill] sm:$0xff]  ;;  %7091 = vst [vmem:[#allocation46_spill] sm:$0xff] %v5561_v2  ;;  %v5566_v37 = vsub.f32 %v73_v11, %v1905_v17  ;;  %v100_v11 = vld [vmem:[#allocation7 + $0x138] sm:$0xff] }
  0xfc   :  { %4076 = vmatpush1.bf16.msra.mxu1 %v7084_v39  ;;  %v91_v39 = vld [vmem:[#allocation7 + $0xf0] sm:$0xff]  ;;  %7095 = vst [vmem:[#allocation50_spill] sm:$0xff] %v5568_v57  ;;  %v5575_v2 = vpack.c.bf16 %v1911_v29, %v1907_v4  ;;  %v108_v17 = vld [vmem:[#allocation7 + $0x178] sm:$0xff]  ;;  %v5579_v51 = vsub.f32 %v82_v23, %v1907_v4  ;;  %7108 = vst [vmem:[#allocation75_spill] sm:$0xff] %v5590_v56  ;;  %v5592_v23 = vpack.c.bf16 %v1913_v62, %v1909_v44 }
  0xfd   :  { %4078 = vmatprep.subr.bf16.mxu1 %v7087_v61  ;;  %7094 = vst [vmem:[#allocation49_spill] sm:$0xff] %v5566_v37  ;;  %v106_v61 = vld [vmem:[#allocation7 + $0x168] sm:$0xff]  ;;  %v2768_v16 = vand.u32 4294901760, %v91_v39  ;;  %v5594_v29 = vsub.f32 %v89_v59, %v1913_v62  ;;  %v2770_v48 = vand.u32 4294901760, %v100_v11  ;;  %v2774_v4 = vand.u32 4294901760, %v108_v17  ;;  %v116_v62 = vld [vmem:[#allocation7 + $0x1b8] sm:$0xff] }
  0xfe   :  { %3888 = vmatpush1.bf16.msra.mxu0 %v7088_v46  ;;  %v5573_v46 = vsub.f32 %v75_v52, %v2760_v40  ;;  %7099 = vst [vmem:[#allocation62_spill] sm:$0xff] %v5575_v2  ;;  %v7101_v37 = vld [vmem:[#allocation19_spill] sm:$0xff]  ;;  %7102 = vst [vmem:[#allocation67_spill] sm:$0xff] %v5579_v51  ;;  %v1919_v57 = vand.u32 4294901760, %v106_v61  ;;  %v7104_v52 = vld [vmem:[#allocation37_spill] sm:$0xff]  ;;  %v5584_v40 = vpack.c.bf16 %v2766_v30, %v2762_v54 }
  0xff   :  { %3890 = vmatprep.subr.bf16.mxu0 %v7092_v31  ;;  %v7100_v31 = vld [vmem:[#allocation17_spill] sm:$0xff]  ;;  %v5586_v2 = vsub.f32 %v84_v50, %v2762_v54  ;;  %7109 = vst [vmem:[#allocation76_spill] sm:$0xff] %v5592_v23  ;;  %7110 = vst [vmem:[#allocation12_spill] sm:$0xff] %v5594_v29  ;;  %v122_v51 = vld [vmem:[#allocation7 + $0x1e8] sm:$0xff]  ;;  %v5599_v54 = vsub.f32 %v83_v21, %v2764_v25  ;;  %v5603_v41 = vsub.f32 %v91_v39, %v2768_v16 }
 0x100   :  { %4080 = vmatpush1.bf16.msra.mxu1 %v7097_v6  ;;  %7098 = vst [vmem:[#allocation61_spill] sm:$0xff] %v5573_v46  ;;  %v105_v6 = vld [vmem:[#allocation7 + $0x160] sm:$0xff]  ;;  %7105 = vst [vmem:[#allocation70_spill] sm:$0xff] %v5584_v40  ;;  %v5588_v46 = vsub.f32 %v92_v38, %v2766_v30  ;;  %v1917_v30 = vand.u32 4294901760, %v97_v0  ;;  %v5605_v59 = vpack.c.bf16 %v1919_v57, %v1915_v32  ;;  %v124_v23 = vld [vmem:[#allocation7 + $0x1f8] sm:$0xff] }
 0x101   :  { %4082 = vmatprep.subr.bf16.mxu1 %v7100_v31  ;;  %7106 = vst [vmem:[#allocation72_spill] sm:$0xff] %v5586_v2  ;;  %v99_v31 = vld [vmem:[#allocation7 + $0x130] sm:$0xff]  ;;  %7113 = vst [vmem:[#allocation18_spill] sm:$0xff] %v5599_v54  ;;  %v1921_v50 = vand.u32 4294901760, %v105_v6  ;;  %v5610_v21 = vsub.f32 %v106_v61, %v1919_v57  ;;  %v113_v40 = vld [vmem:[#allocation7 + $0x1a0] sm:$0xff]  ;;  %v5612_v54 = vpack.c.bf16 %v2774_v4, %v2770_v48  ;;  %v2778_v61 = vand.u32 4294901760, %v116_v62 }
 0x102   :  { %3892 = vmatpush1.bf16.msra.mxu0 %v7101_v37  ;;  %7107 = vst [vmem:[#allocation73_spill] sm:$0xff] %v5588_v46  ;;  %v107_v37 = vld [vmem:[#allocation7 + $0x170] sm:$0xff]  ;;  %7114 = vst [vmem:[#allocation21_spill] sm:$0xff] %v5603_v41  ;;  %v2772_v38 = vand.u32 4294901760, %v99_v31  ;;  %v5616_v39 = vsub.f32 %v108_v17, %v2774_v4  ;;  %v1925_v17 = vand.u32 4294901760, %v113_v40 }
 0x103   :  { %3894 = vmatprep.subr.bf16.mxu0 %v7104_v52  ;;  %v5597_v52 = vpack.c.bf16 %v2768_v16, %v2764_v25  ;;  %7115 = vst [vmem:[#allocation20_spill] sm:$0xff] %v5605_v59  ;;  %v2776_v44 = vand.u32 4294901760, %v107_v37  ;;  %7117 = vst [vmem:[#allocation23_spill] sm:$0xff] %v5610_v21  ;;  %v1923_v25 = vand.u32 4294901760, %v114_v43  ;;  %v5618_v16 = vsub.f32 %v97_v0, %v1917_v30  ;;  %v115_v59 = vld [vmem:[#allocation7 + $0x1b0] sm:$0xff]  ;;  %v130_v21 = vld [vmem:[#allocation7 + $0x228] sm:$0xff] }
 0x104   :  { %4084 = vmatpush1.bf16.msra.mxu1 %v7111_v27  ;;  %v5608_v27 = vsub.f32 %v98_v24, %v1915_v32  ;;  %7118 = vst [vmem:[#allocation25_spill] sm:$0xff] %v5612_v54  ;;  %7120 = vst [vmem:[#allocation26_spill] sm:$0xff] %v5616_v39  ;;  %v123_v41 = vld [vmem:[#allocation7 + $0x1f0] sm:$0xff]  ;;  %v5622_v57 = vpack.c.bf16 %v1921_v50, %v1917_v30  ;;  %v5624_v24 = vsub.f32 %v105_v6, %v1921_v50  ;;  %v138_v54 = vld [vmem:[#allocation7 + $0x268] sm:$0xff] }
 0x105   :  { %7112 = vst [vmem:[#allocation16_spill] sm:$0xff] %v5597_v52  ;;  %4086 = vmatprep.subr.bf16.mxu1 %v5437_v34  ;;  %v1927_v52 = vand.u32 4294901760, %v122_v51  ;;  %v121_v34 = vld [vmem:[#allocation7 + $0x1e0] sm:$0xff]  ;;  %7121 = vst [vmem:[#allocation27_spill] sm:$0xff] %v5618_v16  ;;  %v2782_v32 = vand.u32 4294901760, %v124_v23  ;;  %v5628_v0 = vpack.c.bf16 %v2776_v44, %v2772_v38  ;;  %v5634_v6 = vsub.f32 %v107_v37, %v2776_v44  ;;  %v132_v50 = vld [vmem:[#allocation7 + $0x238] sm:$0xff] }
 0x106   :  { %3896 = vmatpush1.bf16.msra.mxu0 %v5443_v53  ;;  %7116 = vst [vmem:[#allocation22_spill] sm:$0xff] %v5608_v27  ;;  %v5614_v53 = vsub.f32 %v100_v11, %v2770_v48  ;;  %7123 = vst [vmem:[#allocation29_spill] sm:$0xff] %v5622_v57  ;;  %v5630_v11 = vsub.f32 %v99_v31, %v2772_v38  ;;  %v2780_v4 = vand.u32 4294901760, %v115_v59  ;;  %v2784_v30 = vand.u32 4294901760, %v123_v41  ;;  %v137_v57 = vld [vmem:[#allocation7 + $0x260] sm:$0xff] }
 0x107   :  { %3898 = vmatprep.subr.bf16.mxu0 %v7042_v1  ;;  %v7122_v1 = vld [vmem:[#allocation77_spill] sm:$0xff]  ;;  %7124 = vst [vmem:[#allocation28_spill] sm:$0xff] %v5624_v24  ;;  %7125 = vst [vmem:[#allocation30_spill] sm:$0xff] %v5628_v0  ;;  %v5636_v48 = vpack.c.bf16 %v1927_v52, %v1923_v25  ;;  %v5641_v31 = vsub.f32 %v122_v51, %v1927_v52  ;;  %v1931_v38 = vand.u32 4294901760, %v130_v21  ;;  %v1935_v0 = vand.u32 4294901760, %v138_v54 }
 0x108   :  { %7119 = vst [vmem:[#allocation24_spill] sm:$0xff] %v5614_v53  ;;  %4088 = vmatpush1.bf16.msra.mxu1 %v5451_v42  ;;  %7126 = vst [vmem:[#allocation31_spill] sm:$0xff] %v5630_v11  ;;  %v1929_v42 = vand.u32 4294901760, %v121_v34  ;;  %v5647_v37 = vsub.f32 %v116_v62, %v2778_v61  ;;  %v5649_v44 = vsub.f32 %v124_v23, %v2782_v32 }
 0x109   :  { %934 = vmatmul.mubr.f32.vlgmr.msra.gmra.mrb[0].mxu0 %v7122_v1  ;;  %4090 = vmatprep.subr.bf16.mxu1 %v7044_v55  ;;  %7127 = vst [vmem:[#allocation35_spill] sm:$0xff] %v5634_v6  ;;  %7128 = vst [vmem:[#allocation32_spill] sm:$0xff] %v5636_v48  ;;  %v140_v55 = vld [vmem:[#allocation7 + $0x278] sm:$0xff]  ;;  %v129_v48 = vld [vmem:[#allocation7 + $0x220] sm:$0xff]  ;;  %v5660_v62 = vpack.c.bf16 %v2784_v30, %v2780_v4 }
 0x10a   :  { %3900 = vmatpush1.bf16.msra.mxu0 %v7045_v3  ;;  %1036 = vmatprep.mubr.f32.mxu0 %v6948_v18  ;;  %v5639_v3 = vsub.f32 %v114_v43, %v1923_v25  ;;  %7130 = vst [vmem:[#allocation41_spill] sm:$0xff] %v5641_v31  ;;  %7132 = vst [vmem:[#allocation44_spill] sm:$0xff] %v5647_v37  ;;  %v131_v6 = vld [vmem:[#allocation7 + $0x230] sm:$0xff]  ;;  %v5653_v51 = vpack.c.bf16 %v1929_v42, %v1925_v17  ;;  %v2790_v52 = vand.u32 4294901760, %v140_v55  ;;  %v146_v31 = vld [vmem:[#allocation7 + $0x2a8] sm:$0xff] }
 0x10b   :  { %3902 = vmatprep.subr.bf16.mxu0 %v7046_v33  ;;  %1789 = vmatmul.mubr.f32.vlgmr.msra.gmra.mrb[0].mxu1 %v7122_v1  ;;  %v5645_v33 = vpack.c.bf16 %v2782_v32, %v2778_v61  ;;  %7133 = vst [vmem:[#allocation51_spill] sm:$0xff] %v5649_v44  ;;  %v5655_v43 = vsub.f32 %v113_v40, %v1925_v17  ;;  %v139_v25 = vld [vmem:[#allocation7 + $0x270] sm:$0xff]  ;;  %7137 = vst [vmem:[#allocation14_spill] sm:$0xff] %v5660_v62  ;;  %v1933_v40 = vand.u32 4294901760, %v129_v48  ;;  %v156_v44 = vld [vmem:[#allocation7 + $0x2f8] sm:$0xff] }
 0x10c   :  { %7129 = vst [vmem:[#allocation39_spill] sm:$0xff] %v5639_v3  ;;  %4092 = vmatpush1.bf16.msra.mxu1 %v7047_v20  ;;  %1891 = vmatprep.mubr.f32.mxu1 %v6948_v18  ;;  %7134 = vst [vmem:[#allocation53_spill] sm:$0xff] %v5653_v51  ;;  %v2786_v20 = vand.u32 4294901760, %v132_v50  ;;  %v5658_v23 = vsub.f32 %v121_v34, %v1929_v42  ;;  %v5662_v61 = vsub.f32 %v115_v59, %v2780_v4  ;;  %v153_v62 = vld [vmem:[#allocation7 + $0x2e0] sm:$0xff] }
 0x10d   :  { %7131 = vst [vmem:[#allocation47_spill] sm:$0xff] %v5645_v33  ;;  %4094 = vmatprep.subr.bf16.mxu1 %v7048_v47  ;;  %7135 = vst [vmem:[#allocation59_spill] sm:$0xff] %v5655_v43  ;;  %v154_v33 = vld [vmem:[#allocation7 + $0x2e8] sm:$0xff]  ;;  %v5664_v47 = vsub.f32 %v123_v41, %v2784_v30  ;;  %v5668_v32 = vsub.f32 %v130_v21, %v1931_v38  ;;  %v1937_v17 = vand.u32 4294901760, %v137_v57  ;;  %v148_v43 = vld [vmem:[#allocation7 + $0x2b8] sm:$0xff]  ;;  %v2788_v37 = vand.u32 4294901760, %v131_v6 }
 0x10e   :  { %3904 = vmatpush1.bf16.msra.mxu0 %v7049_v49  ;;  %7136 = vst [vmem:[#allocation13_spill] sm:$0xff] %v5658_v23  ;;  %7138 = vst [vmem:[#allocation40_spill] sm:$0xff] %v5662_v61  ;;  %v5666_v49 = vpack.c.bf16 %v1935_v0, %v1931_v38  ;;  %v1939_v34 = vand.u32 4294901760, %v146_v31  ;;  %v1943_v42 = vand.u32 4294901760, %v154_v33  ;;  %v145_v23 = vld [vmem:[#allocation7 + $0x2a0] sm:$0xff]  ;;  %v5673_v41 = vsub.f32 %v138_v54, %v1935_v0  ;;  %v162_v0 = vld [vmem:[#allocation7 + $0x328] sm:$0xff] }
 0x10f   :  { %3906 = vmatprep.subr.bf16.mxu0 %v7050_v13  ;;  %7139 = vst [vmem:[#allocation55_spill] sm:$0xff] %v5664_v47  ;;  %7141 = vst [vmem:[#allocation57_spill] sm:$0xff] %v5668_v32  ;;  %v2792_v13 = vand.u32 4294901760, %v139_v25  ;;  %v5675_v59 = vpack.c.bf16 %v2790_v52, %v2786_v20  ;;  %v5677_v21 = vsub.f32 %v132_v50, %v2786_v20  ;;  %v2794_v30 = vand.u32 4294901760, %v148_v43  ;;  %v147_v32 = vld [vmem:[#allocation7 + $0x2b0] sm:$0xff]  ;;  %v164_v20 = vld [vmem:[#allocation7 + $0x338] sm:$0xff] }
 0x110   :  { %7140 = vst [vmem:[#allocation54_spill] sm:$0xff] %v5666_v49  ;;  %4096 = vmatpush1.bf16.msra.mxu1 %v7051_v63  ;;  %7142 = vst [vmem:[#allocation58_spill] sm:$0xff] %v5673_v41  ;;  %v5680_v4 = vsub.f32 %v140_v55, %v2790_v52  ;;  %v5682_v63 = vsub.f32 %v129_v48, %v1933_v40  ;;  %v2798_v38 = vand.u32 4294901760, %v156_v44  ;;  %v155_v47 = vld [vmem:[#allocation7 + $0x2f0] sm:$0xff]  ;;  %v1945_v54 = vand.u32 4294901760, %v153_v62  ;;  %v170_v41 = vld [vmem:[#allocation7 + $0x368] sm:$0xff] }
 0x111   :  { %4098 = vmatprep.subr.bf16.mxu1 %v7052_v7  ;;  %7143 = vst [vmem:[#allocation15_spill] sm:$0xff] %v5675_v59  ;;  %v5684_v61 = vpack.c.bf16 %v1937_v17, %v1933_v40  ;;  %v5686_v7 = vsub.f32 %v137_v57, %v1937_v17  ;;  %v5689_v50 = vpack.c.bf16 %v2792_v13, %v2788_v37  ;;  %v172_v52 = vld [vmem:[#allocation7 + $0x378] sm:$0xff]  ;;  %v161_v40 = vld [vmem:[#allocation7 + $0x320] sm:$0xff]  ;;  %v1951_v59 = vand.u32 4294901760, %v170_v41 }
 0x112   :  { %3908 = vmatpush1.bf16.msra.mxu0 %v7053_v12  ;;  %v1941_v12 = vand.u32 4294901760, %v145_v23  ;;  %v5693_v48 = vsub.f32 %v139_v25, %v2792_v13  ;;  %v5695_v55 = vpack.c.bf16 %v1943_v42, %v1939_v34  ;;  %v5699_v57 = vsub.f32 %v146_v31, %v1939_v34 }
 0x113   :  { %3910 = vmatprep.subr.bf16.mxu0 %v7054_v15  ;;  %7144 = vst [vmem:[#allocation60_spill] sm:$0xff] %v5684_v61  ;;  %7145 = vst [vmem:[#allocation17_spill] sm:$0xff] %v5689_v50  ;;  %v5691_v15 = vsub.f32 %v131_v6, %v2788_v37  ;;  %v5701_v17 = vsub.f32 %v154_v33, %v1943_v42  ;;  %v2800_v61 = vand.u32 4294901760, %v155_v47  ;;  %v169_v50 = vld [vmem:[#allocation7 + $0x360] sm:$0xff]  ;;  %v163_v6 = vld [vmem:[#allocation7 + $0x330] sm:$0xff]  ;;  %v2802_v31 = vand.u32 4294901760, %v164_v20 }
 0x114   :  { %4100 = vmatpush1.bf16.msra.mxu1 %v7055_v35  ;;  %7146 = vst [vmem:[#allocation19_spill] sm:$0xff] %v5695_v55  ;;  %7147 = vst [vmem:[#allocation37_spill] sm:$0xff] %v5699_v57  ;;  %v2796_v35 = vand.u32 4294901760, %v147_v32  ;;  %v171_v37 = vld [vmem:[#allocation7 + $0x370] sm:$0xff]  ;;  %v5704_v25 = vpack.c.bf16 %v2798_v38, %v2794_v30  ;;  %v5706_v13 = vsub.f32 %v148_v43, %v2794_v30  ;;  %v1947_v55 = vand.u32 4294901760, %v162_v0 }
 0x115   :  { %4102 = vmatprep.subr.bf16.mxu1 %v7056_v45  ;;  %7148 = vst [vmem:[#allocation36_spill] sm:$0xff] %v5701_v17  ;;  %v5708_v45 = vsub.f32 %v156_v44, %v2798_v38  ;;  %v2806_v33 = vand.u32 4294901760, %v172_v52  ;;  %v1949_v34 = vand.u32 4294901760, %v161_v40  ;;  %v1953_v42 = vand.u32 4294901760, %v169_v50 }
 0x116   :  { %3912 = vmatpush1.bf16.msra.mxu0 %v7057_v22  ;;  %7149 = vst [vmem:[#allocation81_spill] sm:$0xff] %v5704_v25  ;;  %v5710_v22 = vpack.c.bf16 %v1945_v54, %v1941_v12  ;;  %v2804_v17 = vand.u32 4294901760, %v163_v6  ;;  %v2808_v57 = vand.u32 4294901760, %v171_v37  ;;  %v5717_v43 = vsub.f32 %v153_v62, %v1945_v54  ;;  %v178_v25 = vld [vmem:[#allocation7 + $0x3a8] sm:$0xff]  ;;  %v188_v54 = vld [vmem:[#allocation7 + $0x3f8] sm:$0xff] }
 0x117   :  { %3914 = vmatprep.subr.bf16.mxu0 %v7058_v5  ;;  %7150 = vst [vmem:[#allocation82_spill] sm:$0xff] %v5708_v45  ;;  %v5715_v5 = vsub.f32 %v145_v23, %v1941_v12  ;;  %v5719_v44 = vpack.c.bf16 %v2800_v61, %v2796_v35  ;;  %v5722_v30 = vsub.f32 %v147_v32, %v2796_v35  ;;  %v180_v12 = vld [vmem:[#allocation7 + $0x3b8] sm:$0xff]  ;;  %v7176_v35 = vld [vmem:[#allocation64_spill] sm:$0xff] }
 0x118   :  { %7151 = vst [vmem:[#allocation83_spill] sm:$0xff] %v5710_v22  ;;  %4104 = vmatpush1.bf16.msra.mxu1 %v7059_v8  ;;  %7153 = vst [vmem:[#allocation85_spill] sm:$0xff] %v5717_v43  ;;  %v5724_v38 = vsub.f32 %v155_v47, %v2800_v61  ;;  %v5726_v8 = vpack.c.bf16 %v1951_v59, %v1947_v55  ;;  %v5728_v22 = vsub.f32 %v162_v0, %v1947_v55 }
 0x119   :  { %4106 = vmatprep.subr.bf16.mxu1 %v7060_v26  ;;  %7152 = vst [vmem:[#allocation84_spill] sm:$0xff] %v5715_v5  ;;  %7154 = vst [vmem:[#allocation86_spill] sm:$0xff] %v5719_v44  ;;  %v186_v26 = vld [vmem:[#allocation7 + $0x3e8] sm:$0xff]  ;;  %v5730_v45 = vsub.f32 %v170_v41, %v1951_v59  ;;  %v5734_v23 = vsub.f32 %v164_v20, %v2802_v31  ;;  %v5736_v62 = vsub.f32 %v172_v52, %v2806_v33  ;;  %v177_v41 = vld [vmem:[#allocation7 + $0x3a0] sm:$0xff] }
 0x11a   :  { %3916 = vmatpush1.bf16.msra.mxu0 %v7061_v60  ;;  %7155 = vst [vmem:[#allocation87_spill] sm:$0xff] %v5722_v30  ;;  %7156 = vst [vmem:[#allocation88_spill] sm:$0xff] %v5724_v38  ;;  %v5732_v60 = vpack.c.bf16 %v2806_v33, %v2802_v31  ;;  %v5741_v61 = vsub.f32 %v161_v40, %v1949_v34  ;;  %v5743_v47 = vsub.f32 %v169_v50, %v1953_v42  ;;  %v185_v20 = vld [vmem:[#allocation7 + $0x3e0] sm:$0xff]  ;;  %v179_v52 = vld [vmem:[#allocation7 + $0x3b0] sm:$0xff] }
 0x11b   :  { %3918 = vmatprep.subr.bf16.mxu0 %v7062_v10  ;;  %7157 = vst [vmem:[#allocation89_spill] sm:$0xff] %v5726_v8  ;;  %7158 = vst [vmem:[#allocation90_spill] sm:$0xff] %v5728_v22  ;;  %v5739_v10 = vpack.c.bf16 %v1953_v42, %v1949_v34  ;;  %v5745_v32 = vpack.c.bf16 %v2808_v57, %v2804_v17  ;;  %v5749_v59 = vsub.f32 %v163_v6, %v2804_v17  ;;  %v187_v50 = vld [vmem:[#allocation7 + $0x3f0] sm:$0xff]  ;;  %v7169_v31 = vld [vmem:[#allocation43_spill] sm:$0xff] }
 0x11c   :  { %7159 = vst [vmem:[#allocation91_spill] sm:$0xff] %v5730_v45  ;;  %7160 = vst [vmem:[#allocation92_spill] sm:$0xff] %v5732_v60  ;;  %4108 = vmatpush1.bf16.msra.mxu1 %v7063_v14  ;;  %v5751_v0 = vsub.f32 %v171_v37, %v2808_v57  ;;  %v1955_v14 = vand.u32 4294901760, %v178_v25  ;;  %v1959_v55 = vand.u32 4294901760, %v186_v26  ;;  %v2810_v17 = vand.u32 4294901760, %v180_v12  ;;  %v7172_v37 = vld [vmem:[#allocation56_spill] sm:$0xff] }
 0x11d   :  { %7161 = vst [vmem:[#allocation93_spill] sm:$0xff] %v5734_v23  ;;  %7162 = vst [vmem:[#allocation94_spill] sm:$0xff] %v5736_v62  ;;  %4110 = vmatprep.subr.bf16.mxu1 %v7064_v28  ;;  %v7170_v28 = vld [vmem:[#allocation45_spill] sm:$0xff]  ;;  %v2814_v57 = vand.u32 4294901760, %v188_v54  ;;  %v1957_v6 = vand.u32 4294901760, %v177_v41  ;;  %v1961_v42 = vand.u32 4294901760, %v185_v20 }
 0x11e   :  { %7163 = vst [vmem:[#allocation95_spill] sm:$0xff] %v5739_v10  ;;  %7164 = vst [vmem:[#allocation96_spill] sm:$0xff] %v5741_v61  ;;  %3920 = vmatpush1.bf16.msra.mxu0 %v7065_v58  ;;  %v5758_v58 = vsub.f32 %v178_v25, %v1955_v14  ;;  %v7173_v10 = vld [vmem:[#allocation48_spill] sm:$0xff]  ;;  %v7174_v60 = vld [vmem:[#allocation49_spill] sm:$0xff]  ;;  %v5765_v33 = vpack.c.bf16 %v1959_v55, %v1955_v14  ;;  %v2816_v34 = vand.u32 4294901760, %v187_v50 }
 0x11f   :  { %7165 = vst [vmem:[#allocation97_spill] sm:$0xff] %v5743_v47  ;;  %7166 = vst [vmem:[#allocation98_spill] sm:$0xff] %v5745_v32  ;;  %3922 = vmatprep.subr.bf16.mxu0 %v7066_v9  ;;  %v2812_v32 = vand.u32 4294901760, %v179_v52  ;;  %v7175_v40 = vld [vmem:[#allocation63_spill] sm:$0xff]  ;;  %v7178_v25 = vld [vmem:[#allocation52_spill] sm:$0xff]  ;;  %v7182_v9 = vand.u32 4294901760, %v5551_v19  ;;  %v5788_v62 = vsub.f32 %v188_v54, %v2814_v57  ;;  %v5802_v54 = vsub.f32 %v177_v41, %v1957_v6 }
 0x120   :  { %7167 = vst [vmem:[#allocation99_spill] sm:$0xff] %v5749_v59  ;;  %7168 = vst [vmem:[#allocation100_spill] sm:$0xff] %v5751_v0  ;;  %4112 = vmatpush1.bf16.msra.mxu1 %v7172_v37  ;;  %v7179_v0 = vld [vmem:[#allocation61_spill] sm:$0xff]  ;;  %v7180_v47 = vld [vmem:[#allocation66_spill] sm:$0xff]  ;;  %v7181_v37 = vand.u32 4294901760, %v5548_v36  ;;  %v5784_v59 = vpack.c.bf16 %v2814_v57, %v2810_v17  ;;  %v5816_v41 = vsub.f32 %v185_v20, %v1961_v42 }
 0x121   :  { %7171 = vst [vmem:[#allocation101_spill] sm:$0xff] %v5758_v58  ;;  %4114 = vmatprep.subr.bf16.mxu1 %v7175_v40  ;;  %7177 = vst [vmem:[#allocation56_spill] sm:$0xff] %v5765_v33  ;;  %v2022_v44 = vsub.f32 %v5551_v19, %v7182_v9  ;;  %v7183_v40 = vand.u32 4294901760, %v7169_v31  ;;  %v5782_v33 = vsub.f32 %v186_v26, %v1959_v55  ;;  %v7188_v9 = vand.u32 4294901760, %v7173_v10  ;;  %v7190_v26 = vld [vmem:[#allocation67_spill] sm:$0xff]  ;;  %v7200_v20 = vld [vmem:[#allocation42_spill] sm:$0xff] }
 0x122   :  { %3924 = vmatpush1.bf16.msra.mxu0 %v7176_v35  ;;  %v2010_v61 = vsub.f32 %v5548_v36, %v7181_v37  ;;  %v7184_v35 = vand.u32 4294901760, %v7170_v28  ;;  %7185 = vst [vmem:[#allocation63_spill] sm:$0xff] %v5784_v59  ;;  %v7186_v37 = vld [vmem:[#allocation65_spill] sm:$0xff]  ;;  %v5791_v36 = vpack.c.bf16 %v1961_v42, %v1957_v6  ;;  %v5818_v6 = vpack.c.bf16 %v2816_v34, %v2812_v32 }
 0x123   :  { %3926 = vmatprep.subr.bf16.mxu0 %v7180_v47  ;;  %v2865_v14 = vsub.f32 %v7169_v31, %v7183_v40  ;;  %v5786_v47 = vsub.f32 %v180_v12, %v2810_v17  ;;  %v2016_v40 = vsub.f32 %v7173_v10, %v7188_v9  ;;  %v7189_v31 = vand.u32 4294901760, %v7174_v60  ;;  %v7192_v12 = vld [vmem:[#allocation71_spill] sm:$0xff]  ;;  %v7195_v10 = vld [vmem:[#allocation68_spill] sm:$0xff] }
 0x124   :  { %v2877_v58 = vsub.f32 %v7170_v28, %v7184_v35  ;;  %4116 = vmatpush1.bf16.msra.mxu1 %v7186_v37  ;;  %7187 = vst [vmem:[#allocation64_spill] sm:$0xff] %v5791_v36  ;;  %v7191_v28 = vld [vmem:[#allocation69_spill] sm:$0xff]  ;;  %v7193_v17 = vand.u32 4294901760, %v7178_v25  ;;  %v7194_v37 = vand.u32 4294901760, %v7179_v0  ;;  %v2011_v55 = vand.u32 4294901760, %v2010_v61  ;;  %7197 = vst [vmem:[#allocation66_spill] sm:$0xff] %v5818_v6 }
 0x125   :  { %v2028_v35 = vsub.f32 %v7174_v60, %v7189_v31  ;;  %4118 = vmatprep.subr.bf16.mxu1 %v7191_v28  ;;  %v7196_v60 = vld [vmem:[#allocation33_spill] sm:$0xff]  ;;  %v2023_v28 = vand.u32 4294901760, %v2022_v44  ;;  %v2866_v19 = vand.u32 4294901760, %v2865_v14  ;;  %v7198_v36 = vld [vmem:[#allocation74_spill] sm:$0xff]  ;;  %v2017_v31 = vand.u32 4294901760, %v2016_v40 }
 0x126   :  { %3928 = vmatpush1.bf16.msra.mxu0 %v7192_v12  ;;  %v5807_v57 = vsub.f32 %v7178_v25, %v7193_v17  ;;  %v5812_v9 = vsub.f32 %v7179_v0, %v7194_v37  ;;  %v2878_v12 = vand.u32 4294901760, %v2877_v58  ;;  %v6785_v17 = vand.u32 4294901760, %v5586_v2  ;;  %v7201_v58 = vld [vmem:[#allocation46_spill] sm:$0xff] }
 0x127   :  { %4122 = vmatprep.subr.bf16.mxu0 %v7196_v60  ;;  %v5824_v37 = vsub.f32 %v179_v52, %v2812_v32  ;;  %v2029_v60 = vand.u32 4294901760, %v2028_v35  ;;  %v7199_v44 = vand.u32 4294901760, %v7190_v26  ;;  %v5831_v42 = vsub.f32 %v187_v50, %v2816_v34  ;;  %v7204_v52 = vld [vmem:[#allocation62_spill] sm:$0xff] }
 0x128   :  { %4120 = vmatpush1.bf16.msra.mxu1 %v7198_v36  ;;  %v2872_v14 = vand.u32 4294901760, %v5807_v57  ;;  %v2884_v36 = vand.u32 4294901760, %v5812_v9  ;;  %v7203_v25 = vand.u32 4294901760, %v7195_v10  ;;  %v5840_v40 = vpack.c.bf16 %v2023_v28, %v2011_v55  ;;  %v7206_v9 = vld [vmem:[#allocation18_spill] sm:$0xff]  ;;  %v7207_v55 = vld [vmem:[#allocation21_spill] sm:$0xff] }
 0x129   :  { %1038 = vmatmul.mubr.f32.vlgmr.msra.gmra.mrb[0].mxu0 %v7122_v1  ;;  %v2034_v61 = vsub.f32 %v7190_v26, %v7199_v44  ;;  %4314 = vmatprep.subr.bf16.mxu1 %v7200_v20  ;;  %7202 = vst [vmem:[#allocation65_spill] sm:$0xff] %v5831_v42  ;;  %v5842_v35 = vpack.c.bf16 %v2878_v12, %v2866_v19  ;;  %v7208_v19 = vld [vmem:[#allocation50_spill] sm:$0xff]  ;;  %v7270_v26 = vld [vmem:[#allocation96_spill] sm:$0xff] }
 0x12a   :  { %4124 = vmatpush1.bf16.msra.mxu0 %v7201_v58  ;;  %v2046_v32 = vsub.f32 %v7195_v10, %v7203_v25  ;;  %1995 = vmatprep.mubr.f32.mxu0 %v6948_v18  ;;  %v2889_v34 = vsub.f32 %v5586_v2, %v6785_v17  ;;  %v7205_v25 = vand.u32 4294901760, %v5588_v46  ;;  %v5857_v12 = vpack.c.bf16 %v2029_v60, %v2017_v31  ;;  %v7209_v58 = vld [vmem:[#allocation23_spill] sm:$0xff]  ;;  %v7210_v17 = vld [vmem:[#allocation70_spill] sm:$0xff]  ;;  %v7211_v2 = vld [vmem:[#allocation76_spill] sm:$0xff] }
 0x12b   :  { %4126 = vmatprep.subr.bf16.mxu0 %v7204_v52  ;;  %1893 = vmatmul.mubr.f32.vlgmr.msra.gmra.mrb[0].mxu1 %v7122_v1  ;;  %v2035_v50 = vand.u32 4294901760, %v2034_v61  ;;  %v7213_v60 = vand.u32 4294901760, %v5590_v56  ;;  %v7214_v61 = vand.u32 4294901760, %v5594_v29  ;;  %v7220_v52 = vld [vmem:[#allocation35_spill] sm:$0xff]  ;;  %v7277_v10 = vand.u32 4294901760, %v5728_v22 }
 0x12c   :  { %v2901_v57 = vsub.f32 %v5588_v46, %v7205_v25  ;;  %4316 = vmatpush1.bf16.msra.mxu1 %v7208_v19  ;;  %2850 = vmatprep.mubr.f32.mxu1 %v6948_v18  ;;  %v2047_v25 = vand.u32 4294901760, %v2046_v32  ;;  %v7212_v46 = vld [vmem:[#allocation20_spill] sm:$0xff]  ;;  %v2890_v44 = vand.u32 4294901760, %v2889_v34  ;;  %v7215_v19 = vand.u32 4294901760, %v7206_v9 }
 0x12d   :  { %4318 = vmatprep.subr.bf16.mxu1 %v7210_v17  ;;  %v5870_v31 = vsub.f32 %v5590_v56, %v7213_v60  ;;  %v5875_v20 = vsub.f32 %v5594_v29, %v7214_v61  ;;  %v7217_v17 = vld [vmem:[#allocation16_spill] sm:$0xff]  ;;  %v7218_v61 = vand.u32 4294901760, %v5608_v27  ;;  %v7219_v34 = vand.u32 4294901760, %v7209_v58  ;;  %v7221_v29 = vld [vmem:[#allocation25_spill] sm:$0xff]  ;;  %v7249_v56 = vld [vmem:[#allocation82_spill] sm:$0xff] }
 0x12e   :  { %4128 = vmatpush1.bf16.msra.mxu0 %v7211_v2  ;;  %v2902_v28 = vand.u32 4294901760, %v2901_v57  ;;  %v7216_v2 = vand.u32 4294901760, %v7207_v55  ;;  %v7286_v22 = vand.u32 4294901760, %v7270_v26 }
 0x12f   :  { %4130 = vmatprep.subr.bf16.mxu0 %v7212_v46  ;;  %v5882_v46 = vsub.f32 %v7206_v9, %v7215_v19  ;;  %v5893_v32 = vsub.f32 %v5608_v27, %v7218_v61  ;;  %v5898_v57 = vsub.f32 %v7209_v58, %v7219_v34  ;;  %v7224_v61 = vand.u32 4294901760, %v5616_v39  ;;  %v7226_v9 = vld [vmem:[#allocation32_spill] sm:$0xff] }
 0x130   :  { %v5887_v60 = vsub.f32 %v7207_v55, %v7216_v2  ;;  %4320 = vmatpush1.bf16.msra.mxu1 %v7217_v17  ;;  %v7222_v2 = vld [vmem:[#allocation29_spill] sm:$0xff]  ;;  %v7223_v17 = vand.u32 4294901760, %v5614_v53  ;;  %v7225_v34 = vand.u32 4294901760, %v5618_v16  ;;  %v7227_v58 = vand.u32 4294901760, %v5624_v24 }
 0x131   :  { %4322 = vmatprep.subr.bf16.mxu1 %v7221_v29  ;;  %v5912_v27 = vsub.f32 %v5616_v39, %v7224_v61  ;;  %v5920_v29 = vpack.c.bf16 %v2884_v36, %v2872_v14  ;;  %v5934_v39 = vpack.c.bf16 %v2902_v28, %v2890_v44  ;;  %v7229_v36 = vld [vmem:[#allocation30_spill] sm:$0xff]  ;;  %v7232_v28 = vld [vmem:[#allocation47_spill] sm:$0xff]  ;;  %v7237_v14 = vld [vmem:[#allocation60_spill] sm:$0xff] }
 0x132   :  { %4132 = vmatpush1.bf16.msra.mxu0 %v7222_v2  ;;  %v5907_v55 = vsub.f32 %v5614_v53, %v7223_v17  ;;  %v5917_v19 = vsub.f32 %v5618_v16, %v7225_v34  ;;  %v5922_v2 = vpack.c.bf16 %v2047_v25, %v2035_v50  ;;  %v5927_v17 = vsub.f32 %v5624_v24, %v7227_v58  ;;  %v7238_v50 = vld [vmem:[#allocation44_spill] sm:$0xff]  ;;  %v7252_v58 = vld [vmem:[#allocation59_spill] sm:$0xff] }
 0x133   :  { %4134 = vmatprep.subr.bf16.mxu0 %v7226_v9  ;;  %v7228_v53 = vand.u32 4294901760, %v5630_v11  ;;  %v7230_v25 = vand.u32 4294901760, %v7220_v52  ;;  %v7240_v9 = vand.u32 4294901760, %v5682_v63  ;;  %v7243_v34 = vand.u32 4294901760, %v5691_v15 }
 0x134   :  { %4324 = vmatpush1.bf16.msra.mxu1 %v7229_v36  ;;  %v7233_v36 = vld [vmem:[#allocation14_spill] sm:$0xff]  ;;  %v7244_v16 = vand.u32 4294901760, %v5693_v48 }
 0x135   :  { %v5932_v61 = vsub.f32 %v5630_v11, %v7228_v53  ;;  %v5945_v24 = vsub.f32 %v7220_v52, %v7230_v25  ;;  %v7231_v53 = vand.u32 4294901760, %v5639_v3  ;;  %4326 = vmatprep.subr.bf16.mxu1 %v7232_v28  ;;  %v6814_v28 = vand.u32 4294901760, %v5680_v4  ;;  %v7239_v11 = vld [vmem:[#allocation51_spill] sm:$0xff] }
 0x136   :  { %4136 = vmatpush1.bf16.msra.mxu0 %v5653_v51  ;;  %v7236_v51 = vld [vmem:[#allocation15_spill] sm:$0xff]  ;;  %v7241_v25 = vand.u32 4294901760, %v5686_v7 }
 0x137   :  { %v5950_v44 = vsub.f32 %v5639_v3, %v7231_v53  ;;  %4138 = vmatprep.subr.bf16.mxu0 %v5666_v49  ;;  %v6815_v53 = vand.u32 4294901760, %v5677_v21  ;;  %v7234_v49 = vld [vmem:[#allocation41_spill] sm:$0xff] }
 0x138   :  { %4328 = vmatpush1.bf16.msra.mxu1 %v7233_v36  ;;  %v5985_v3 = vpack.c.bf16 %v7241_v25, %v7240_v9  ;;  %v7256_v9 = vand.u32 4294901760, %v5706_v13  ;;  %v7257_v25 = vand.u32 4294901760, %v7249_v56 }
 0x139   :  { %v5975_v52 = vpack.c.bf16 %v6814_v28, %v6815_v53  ;;  %4330 = vmatprep.subr.bf16.mxu1 %v7236_v51  ;;  %v5991_v28 = vpack.c.bf16 %v7244_v16, %v7243_v34  ;;  %v7246_v53 = vld [vmem:[#allocation19_spill] sm:$0xff]  ;;  %v7248_v51 = vld [vmem:[#allocation36_spill] sm:$0xff]  ;;  %v7250_v16 = vld [vmem:[#allocation17_spill] sm:$0xff]  ;;  %v7251_v34 = vand.u32 4294901760, %v7234_v49 }
 0x13a   :  { %4140 = vmatpush1.bf16.msra.mxu0 %v7237_v14  ;;  %7242 = vst [vmem:[#allocation71_spill] sm:$0xff] %v5985_v3  ;;  %v7254_v0 = vand.u32 4294901760, %v7248_v51  ;;  %v6019_v3 = vpack.c.bf16 %v7257_v25, %v7256_v9  ;;  %v7266_v9 = vand.u32 4294901760, %v5722_v30  ;;  %v7267_v25 = vand.u32 4294901760, %v5724_v38  ;;  %v7283_v38 = vld [vmem:[#allocation92_spill] sm:$0xff] }
 0x13b   :  { %7235 = vst [vmem:[#allocation69_spill] sm:$0xff] %v5975_v52  ;;  %7245 = vst [vmem:[#allocation74_spill] sm:$0xff] %v5991_v28  ;;  %4142 = vmatprep.subr.bf16.mxu0 %v7246_v53  ;;  %v7247_v52 = vld [vmem:[#allocation37_spill] sm:$0xff]  ;;  %v6006_v14 = vsub.f32 %v7234_v49, %v7251_v34  ;;  %v7260_v53 = vld [vmem:[#allocation83_spill] sm:$0xff]  ;;  %v7261_v34 = vand.u32 4294901760, %v7238_v50 }
 0x13c   :  { %4332 = vmatpush1.bf16.msra.mxu1 %v7250_v16  ;;  %v7253_v36 = vand.u32 4294901760, %v7247_v52  ;;  %7258 = vst [vmem:[#allocation36_spill] sm:$0xff] %v6019_v3  ;;  %v7259_v16 = vld [vmem:[#allocation81_spill] sm:$0xff]  ;;  %v6039_v3 = vpack.c.bf16 %v7267_v25, %v7266_v9  ;;  %v7274_v9 = vld [vmem:[#allocation86_spill] sm:$0xff]  ;;  %v7275_v25 = vand.u32 4294901760, %v7239_v11 }
 0x13d   :  { %4334 = vmatprep.subr.bf16.mxu1 %v7259_v16  ;;  %v6026_v28 = vsub.f32 %v7238_v50, %v7261_v34  ;;  %v7262_v49 = vld [vmem:[#allocation13_spill] sm:$0xff]  ;;  %v7269_v16 = vld [vmem:[#allocation94_spill] sm:$0xff]  ;;  %v7278_v50 = vand.u32 4294901760, %v5730_v45 }
 0x13e   :  { %v6013_v1 = vpack.c.bf16 %v7254_v0, %v7253_v36  ;;  %4144 = vmatpush1.bf16.msra.mxu0 %v7260_v53  ;;  %v7263_v0 = vand.u32 4294901760, %v5715_v5  ;;  %v7264_v36 = vand.u32 4294901760, %v5717_v43  ;;  %7268 = vst [vmem:[#allocation102_spill] sm:$0xff] %v6039_v3  ;;  %v7273_v5 = vld [vmem:[#allocation100_spill] sm:$0xff]  ;;  %v2949_v53 = vsub.f32 %v7239_v11, %v7275_v25  ;;  %v7285_v11 = vld [vmem:[#allocation55_spill] sm:$0xff] }
 0x13f   :  { %4146 = vmatprep.subr.bf16.mxu0 %v5726_v8  ;;  %v7276_v3 = vld [vmem:[#allocation40_spill] sm:$0xff]  ;;  %v6059_v8 = vpack.c.bf16 %v7278_v50, %v7277_v10  ;;  %v7281_v30 = vand.u32 4294901760, %v7269_v16  ;;  %v2095_v25 = vand.u32 4294901760, %v6006_v14  ;;  %v7296_v14 = vand.u32 4294901760, %v7262_v49 }
 0x140   :  { %7255 = vst [vmem:[#allocation37_spill] sm:$0xff] %v6013_v1  ;;  %v6033_v1 = vpack.c.bf16 %v7264_v36, %v7263_v0  ;;  %v7271_v0 = vld [vmem:[#allocation97_spill] sm:$0xff]  ;;  %4336 = vmatpush1.bf16.msra.mxu1 %v7274_v9  ;;  %v7280_v36 = vand.u32 4294901760, %v5734_v23  ;;  %v7284_v9 = vld [vmem:[#allocation95_spill] sm:$0xff] }
 0x141   :  { %7279 = vst [vmem:[#allocation94_spill] sm:$0xff] %v6059_v8  ;;  %4338 = vmatprep.subr.bf16.mxu1 %v7283_v38  ;;  %v7287_v45 = vand.u32 4294901760, %v7271_v0  ;;  %v7290_v8 = vand.u32 4294901760, %v7273_v5  ;;  %v2100_v34 = vsub.f32 %v7262_v49, %v7296_v14  ;;  %v7298_v0 = vand.u32 4294901760, %v5782_v33 }
 0x142   :  { %7265 = vst [vmem:[#allocation82_spill] sm:$0xff] %v6033_v1  ;;  %v7272_v1 = vld [vmem:[#allocation99_spill] sm:$0xff]  ;;  %v6065_v43 = vpack.c.bf16 %v7281_v30, %v7280_v36  ;;  %4148 = vmatpush1.bf16.msra.mxu0 %v7284_v9  ;;  %v7292_v36 = vld [vmem:[#allocation56_spill] sm:$0xff]  ;;  %v7314_v49 = vand.u32 4294901760, %v5882_v46  ;;  %v2938_v46 = vand.u32 4294901760, %v6026_v28 }
 0x143   :  { %v6075_v10 = vpack.c.bf16 %v7287_v45, %v7286_v22  ;;  %v7289_v50 = vand.u32 4294901760, %v7272_v1  ;;  %4150 = vmatprep.subr.bf16.mxu0 %v7292_v36  ;;  %v7300_v22 = vand.u32 4294901760, %v5786_v47  ;;  %v7305_v36 = vld [vmem:[#allocation57_spill] sm:$0xff] }
 0x144   :  { %7282 = vst [vmem:[#allocation96_spill] sm:$0xff] %v6065_v43  ;;  %v7293_v43 = vld [vmem:[#allocation101_spill] sm:$0xff] }
 0x145   :  { %7288 = vst [vmem:[#allocation99_spill] sm:$0xff] %v6075_v10  ;;  %v6081_v30 = vpack.c.bf16 %v7290_v8, %v7289_v50  ;;  %v7294_v8 = vld [vmem:[#allocation98_spill] sm:$0xff]  ;;  %v7295_v50 = vand.u32 4294901760, %v7252_v58  ;;  %v7297_v38 = vand.u32 4294901760, %v7293_v43  ;;  %v7301_v10 = vand.u32 4294901760, %v5788_v62 }
 0x146   :  { %4340 = vmatpush1.bf16.msra.mxu1 %v7294_v8  ;;  %v7303_v8 = vld [vmem:[#allocation64_spill] sm:$0xff] }
 0x147   :  { %7291 = vst [vmem:[#allocation100_spill] sm:$0xff] %v6081_v30  ;;  %v2088_v9 = vsub.f32 %v7252_v58, %v7295_v50  ;;  %v6103_v30 = vpack.c.bf16 %v7298_v0, %v7297_v38  ;;  %v6109_v45 = vpack.c.bf16 %v7301_v10, %v7300_v22  ;;  %4342 = vmatprep.subr.bf16.mxu1 %v5784_v59  ;;  %v7304_v50 = vand.u32 4294901760, %v7276_v3 }
 0x148   :  { %4152 = vmatpush1.bf16.msra.mxu0 %v7303_v8  ;;  %v7306_v58 = vand.u32 4294901760, %v5802_v54  ;;  %v7307_v38 = vand.u32 4294901760, %v5816_v41  ;;  %v7310_v10 = vand.u32 4294901760, %v5831_v42  ;;  %v7315_v59 = vand.u32 4294901760, %v5887_v60 }
 0x149   :  { %7299 = vst [vmem:[#allocation55_spill] sm:$0xff] %v6103_v30  ;;  %7302 = vst [vmem:[#allocation101_spill] sm:$0xff] %v6109_v45  ;;  %v2943_v14 = vsub.f32 %v7276_v3, %v7304_v50  ;;  %v7309_v30 = vand.u32 4294901760, %v5824_v37  ;;  %4154 = vmatprep.subr.bf16.mxu0 %v5840_v40  ;;  %v7312_v45 = vand.u32 4294901760, %v5870_v31  ;;  %v7313_v50 = vand.u32 4294901760, %v5875_v20 }
 0x14a   :  { %v6121_v0 = vpack.c.bf16 %v7307_v38, %v7306_v58  ;;  %v4351_v3 = vpack.c.bf16 %v7315_v59, %v7314_v49  ;;  %v7316_v58 = vand.u32 4294901760, %v7285_v11  ;;  %v7319_v40 = vand.u32 4294901760, %v5898_v57  ;;  %4344 = vmatpush1.bf16.msra.mxu1 %v5818_v6  ;;  %v7322_v49 = vld [vmem:[#allocation80_spill] sm:$0xff] }
 0x14b   :  { %v6127_v22 = vpack.c.bf16 %v7310_v10, %v7309_v30  ;;  %v4159_v8 = vpack.c.bf16 %v7313_v50, %v7312_v45  ;;  %v7318_v30 = vand.u32 4294901760, %v5893_v32  ;;  %v7320_v31 = vand.u32 4294901760, %v5907_v55  ;;  %2001 = vmatmul.mubr.f32.vlgmr.msra.gmra.mrb[2].mxu0 %v7322_v49  ;;  %4346 = vmatprep.subr.bf16.mxu1 %v5842_v35 }
 0x14c   :  { %7308 = vst [vmem:[#allocation57_spill] sm:$0xff] %v6121_v0  ;;  %v2955_v38 = vsub.f32 %v7285_v11, %v7316_v58  ;;  %v7317_v0 = vld [vmem:[#allocation58_spill] sm:$0xff]  ;;  %v7321_v20 = vand.u32 4294901760, %v5912_v27  ;;  %v2950_v60 = vand.u32 4294901760, %v2949_v53  ;;  %v7323_v59 = vand.u32 4294901760, %v5917_v19  ;;  %4156 = vmatpush1.bf16.msra.mxu0 %v5857_v12  ;;  %2231 = vmatprep.mubr.f32.mxu0 %v6948_v18 }
 0x14d   :  { %7311 = vst [vmem:[#allocation103_spill] sm:$0xff] %v6127_v22  ;;  %v6847_v42 = vand.u32 4294901760, %v7317_v0  ;;  %v4161_v10 = vpack.c.bf16 %v7319_v40, %v7318_v30  ;;  %v7324_v50 = vand.u32 4294901760, %v5927_v17  ;;  %v7325_v57 = vand.u32 4294901760, %v5932_v61  ;;  %4158 = vmatprep.subr.bf16.mxu0 %v5922_v2  ;;  %2856 = vmatmul.mubr.f32.vlgmr.msra.gmra.mrb[2].mxu1 %v7322_v49 }
 0x14e   :  { %v4353_v45 = vpack.c.bf16 %v7321_v20, %v7320_v31  ;;  %v7326_v58 = vand.u32 4294901760, %v5945_v24  ;;  %v7327_v27 = vand.u32 4294901760, %v5950_v44  ;;  %v2089_v28 = vand.u32 4294901760, %v2088_v9  ;;  %4348 = vmatpush1.bf16.msra.mxu1 %v5920_v29  ;;  %3086 = vmatprep.mubr.f32.mxu1 %v6948_v18 }
 0x14f   :  { %v4163_v32 = vpack.c.bf16 %v7324_v50, %v7323_v59  ;;  %v2101_v53 = vand.u32 4294901760, %v2100_v34  ;;  %v2944_v40 = vand.u32 4294901760, %v2943_v14  ;;  %v7328_v19 = vand.u32 4294901760, %v7305_v36  ;;  %4350 = vmatprep.subr.bf16.mxu1 %v5934_v39 }
 0x150   :  { %v4355_v55 = vpack.c.bf16 %v7326_v58, %v7325_v57  ;;  %v4165_v30 = vpack.c.bf16 %v2095_v25, %v7327_v27  ;;  %v2956_v61 = vand.u32 4294901760, %v2955_v38  ;;  %v2118_v24 = vsub.f32 %v7317_v0, %v6847_v42  ;;  %4160 = vmatpush1.bf16.msra.mxu0 %v4159_v8  ;;  %v7339_v42 = vld [vmem:[#allocation84_spill] sm:$0xff] }
 0x151   :  { %v2106_v17 = vsub.f32 %v7305_v36, %v7328_v19  ;;  %v7329_v44 = vand.u32 4294901760, %v5677_v21  ;;  %v7330_v12 = vand.u32 4294901760, %v5680_v4  ;;  %v4357_v9 = vpack.c.bf16 %v2950_v60, %v2938_v46  ;;  %4162 = vmatprep.subr.bf16.mxu0 %v4161_v10 }
 0x152   :  { %v7331_v2 = vand.u32 4294901760, %v5682_v63  ;;  %v7332_v14 = vand.u32 4294901760, %v5686_v7  ;;  %v7333_v31 = vand.u32 4294901760, %v5691_v15  ;;  %v7334_v59 = vand.u32 4294901760, %v5693_v48  ;;  %4352 = vmatpush1.bf16.msra.mxu1 %v4351_v3  ;;  %v7347_v3 = vld [vmem:[#allocation90_spill] sm:$0xff] }
 0x153   :  { %v2961_v35 = vsub.f32 %v5677_v21, %v7329_v44  ;;  %v2973_v34 = vsub.f32 %v5680_v4, %v7330_v12  ;;  %v7335_v46 = vand.u32 4294901760, %v7247_v52  ;;  %v7336_v49 = vand.u32 4294901760, %v7248_v51  ;;  %4354 = vmatprep.subr.bf16.mxu1 %v4353_v45 }
 0x154   :  { %v2112_v25 = vsub.f32 %v5682_v63, %v7331_v2  ;;  %v2124_v38 = vsub.f32 %v5686_v7, %v7332_v14  ;;  %v2967_v20 = vsub.f32 %v5691_v15, %v7333_v31  ;;  %v2979_v50 = vsub.f32 %v5693_v48, %v7334_v59  ;;  %4164 = vmatpush1.bf16.msra.mxu0 %v4163_v32 }
 0x155   :  { %v2130_v60 = vsub.f32 %v7247_v52, %v7335_v46  ;;  %v2142_v57 = vsub.f32 %v7248_v51, %v7336_v49  ;;  %v4167_v58 = vpack.c.bf16 %v2101_v53, %v2089_v28  ;;  %v2107_v27 = vand.u32 4294901760, %v2106_v17  ;;  %v7341_v28 = vld [vmem:[#allocation85_spill] sm:$0xff]  ;;  %4166 = vmatprep.subr.bf16.mxu0 %v4165_v30 }
 0x156   :  { %v7337_v29 = vand.u32 4294901760, %v5706_v13  ;;  %v7338_v44 = vand.u32 4294901760, %v7249_v56  ;;  %v4359_v2 = vpack.c.bf16 %v2956_v61, %v2944_v40  ;;  %v2119_v14 = vand.u32 4294901760, %v2118_v24  ;;  %v7343_v61 = vld [vmem:[#allocation87_spill] sm:$0xff]  ;;  %4356 = vmatpush1.bf16.msra.mxu1 %v4355_v55 }
 0x157   :  { %v2962_v31 = vand.u32 4294901760, %v2961_v35  ;;  %v2974_v59 = vand.u32 4294901760, %v2973_v34  ;;  %v2113_v46 = vand.u32 4294901760, %v2112_v25  ;;  %v2125_v49 = vand.u32 4294901760, %v2124_v38  ;;  %v7345_v34 = vld [vmem:[#allocation88_spill] sm:$0xff]  ;;  %4358 = vmatprep.subr.bf16.mxu1 %v4357_v9 }
 0x158   :  { %v2985_v19 = vsub.f32 %v5706_v13, %v7337_v29  ;;  %v2997_v12 = vsub.f32 %v7249_v56, %v7338_v44  ;;  %v7340_v39 = vand.u32 4294901760, %v7339_v42  ;;  %v7342_v53 = vand.u32 4294901760, %v7341_v28  ;;  %4168 = vmatpush1.bf16.msra.mxu0 %v4167_v58 }
 0x159   :  { %v2968_v29 = vand.u32 4294901760, %v2967_v20  ;;  %v2980_v22 = vand.u32 4294901760, %v2979_v50  ;;  %v2131_v6 = vand.u32 4294901760, %v2130_v60  ;;  %v2143_v44 = vand.u32 4294901760, %v2142_v57  ;;  %v7349_v60 = vld [vmem:[#allocation91_spill] sm:$0xff] }
 0x15a   :  { %v2136_v8 = vsub.f32 %v7339_v42, %v7340_v39  ;;  %v2148_v17 = vsub.f32 %v7341_v28, %v7342_v53  ;;  %v2986_v10 = vand.u32 4294901760, %v2985_v19  ;;  %v2998_v40 = vand.u32 4294901760, %v2997_v12  ;;  %4360 = vmatpush1.bf16.msra.mxu1 %v4359_v2 }
 0x15b   :  { %v7344_v24 = vand.u32 4294901760, %v7343_v61  ;;  %v7346_v25 = vand.u32 4294901760, %v7345_v34  ;;  %v4169_v39 = vpack.c.bf16 %v2119_v14, %v2107_v27  ;;  %v4361_v53 = vpack.c.bf16 %v2974_v59, %v2962_v31 }
 0x15c   :  { %v7348_v20 = vand.u32 4294901760, %v7347_v3  ;;  %v7350_v45 = vand.u32 4294901760, %v7349_v60  ;;  %v2137_v57 = vand.u32 4294901760, %v2136_v8  ;;  %v2149_v19 = vand.u32 4294901760, %v2148_v17 }
 0x15d   :  { %v2991_v35 = vsub.f32 %v7343_v61, %v7344_v24  ;;  %v3003_v38 = vsub.f32 %v7345_v34, %v7346_v25  ;;  %v7351_v12 = vand.u32 4294901760, %v5734_v23  ;;  %v7352_v61 = vand.u32 4294901760, %v7269_v16  ;;  %v7354_v25 = vld [vmem:[#allocation97_spill] sm:$0xff]  ;;  %4170 = vmatprep.subr.bf16.mxu0 %v4169_v39  ;;  %4362 = vmatprep.subr.bf16.mxu1 %v4361_v53 }
 0x15e   :  { %v2154_v50 = vsub.f32 %v7347_v3, %v7348_v20  ;;  %v2166_v32 = vsub.f32 %v7349_v60, %v7350_v45  ;;  %v4171_v27 = vpack.c.bf16 %v2125_v49, %v2113_v46  ;;  %v4363_v14 = vpack.c.bf16 %v2980_v22, %v2968_v29 }
 0x15f   :  { %v3009_v24 = vsub.f32 %v5734_v23, %v7351_v12  ;;  %v3021_v30 = vsub.f32 %v7269_v16, %v7352_v61  ;;  %v7353_v31 = vand.u32 4294901760, %v7270_v26  ;;  %v7355_v20 = vand.u32 4294901760, %v7354_v25 }
 0x160   :  { %v4173_v17 = vpack.c.bf16 %v2143_v44, %v2131_v6  ;;  %v4365_v45 = vpack.c.bf16 %v2998_v40, %v2986_v10  ;;  %v2992_v12 = vand.u32 4294901760, %v2991_v35  ;;  %v3004_v23 = vand.u32 4294901760, %v3003_v38  ;;  %4172 = vmatpush1.bf16.msra.mxu0 %v4171_v27  ;;  %4364 = vmatpush1.bf16.msra.mxu1 %v4363_v14 }
 0x161   :  { %v2160_v59 = vsub.f32 %v7270_v26, %v7353_v31  ;;  %v2172_v8 = vsub.f32 %v7354_v25, %v7355_v20  ;;  %v2155_v34 = vand.u32 4294901760, %v2154_v50  ;;  %v2167_v61 = vand.u32 4294901760, %v2166_v32 }
 0x162   :  { %v7356_v55 = vand.u32 4294901760, %v7293_v43  ;;  %v7357_v46 = vand.u32 4294901760, %v5782_v33  ;;  %v4175_v29 = vpack.c.bf16 %v2149_v19, %v2137_v57  ;;  %v3010_v31 = vand.u32 4294901760, %v3009_v24  ;;  %4174 = vmatprep.subr.bf16.mxu0 %v4173_v17  ;;  %4366 = vmatprep.subr.bf16.mxu1 %v4365_v45 }
 0x163   :  { %v3022_v20 = vand.u32 4294901760, %v3021_v30  ;;  %v7358_v9 = vand.u32 4294901760, %v7272_v1  ;;  %v2161_v58 = vand.u32 4294901760, %v2160_v59  ;;  %v2173_v44 = vand.u32 4294901760, %v2172_v8 }
 0x164   :  { %v2178_v22 = vsub.f32 %v7293_v43, %v7356_v55  ;;  %v2190_v49 = vsub.f32 %v5782_v33, %v7357_v46  ;;  %v7359_v10 = vand.u32 4294901760, %v7273_v5  ;;  %v7360_v35 = vand.u32 4294901760, %v5786_v47  ;;  %4176 = vmatpush1.bf16.msra.mxu0 %v4175_v29  ;;  %v7369_v29 = vld [vmem:[#allocation43_spill] sm:$0xff] }
 0x165   :  { %v3015_v6 = vsub.f32 %v7272_v1, %v7358_v9  ;;  %v7361_v39 = vand.u32 4294901760, %v5788_v62  ;;  %v7362_v32 = vand.u32 4294901760, %v5802_v54  ;;  %v7363_v57 = vand.u32 4294901760, %v5816_v41 }
 0x166   :  { %v3027_v40 = vsub.f32 %v7273_v5, %v7359_v10  ;;  %v3033_v38 = vsub.f32 %v5786_v47, %v7360_v35  ;;  %v4177_v24 = vpack.c.bf16 %v2167_v61, %v2155_v34  ;;  %v2179_v30 = vand.u32 4294901760, %v2178_v22  ;;  %v7365_v35 = vld [vmem:[#allocation65_spill] sm:$0xff] }
 0x167   :  { %v3045_v50 = vsub.f32 %v5788_v62, %v7361_v39  ;;  %v2184_v2 = vsub.f32 %v5802_v54, %v7362_v32  ;;  %v2196_v19 = vsub.f32 %v5816_v41, %v7363_v57  ;;  %v2191_v59 = vand.u32 4294901760, %v2190_v49 }
 0x168   :  { %v4367_v8 = vpack.c.bf16 %v3004_v23, %v2992_v12  ;;  %v4369_v55 = vpack.c.bf16 %v3022_v20, %v3010_v31  ;;  %v3016_v53 = vand.u32 4294901760, %v3015_v6  ;;  %v4179_v27 = vpack.c.bf16 %v2173_v44, %v2161_v58  ;;  %4178 = vmatprep.subr.bf16.mxu0 %v4177_v24  ;;  %v7367_v6 = vld [vmem:[#allocation34_spill] sm:$0xff]  ;;  %v7374_v24 = vld [vmem:[#allocation68_spill] sm:$0xff] }
 0x169   :  { %v3028_v46 = vand.u32 4294901760, %v3027_v40  ;;  %v7364_v9 = vand.u32 4294901760, %v5824_v37  ;;  %v7366_v39 = vand.u32 4294901760, %v7365_v35  ;;  %v3034_v17 = vand.u32 4294901760, %v3033_v38  ;;  %v7368_v58 = vld [vmem:[#allocation38_spill] sm:$0xff]  ;;  %v7370_v40 = vld [vmem:[#allocation45_spill] sm:$0xff] }
 0x16a   :  { %v3046_v34 = vand.u32 4294901760, %v3045_v50  ;;  %v2185_v61 = vand.u32 4294901760, %v2184_v2  ;;  %v2197_v22 = vand.u32 4294901760, %v2196_v19  ;;  %v4181_v23 = vpack.c.bf16 %v2191_v59, %v2179_v30  ;;  %4368 = vmatpush1.bf16.msra.mxu1 %v4367_v8  ;;  %4180 = vmatpush1.bf16.msra.mxu0 %v4179_v27  ;;  %v7371_v50 = vld [vmem:[#allocation48_spill] sm:$0xff]  ;;  %v7372_v2 = vld [vmem:[#allocation49_spill] sm:$0xff]  ;;  %v7373_v19 = vld [vmem:[#allocation67_spill] sm:$0xff] }
 0x16b   :  { %v3039_v10 = vsub.f32 %v5824_v37, %v7364_v9  ;;  %v3051_v32 = vsub.f32 %v7365_v35, %v7366_v39  ;;  %v4371_v14 = vpack.c.bf16 %v3028_v46, %v3016_v53  ;;  %4370 = vmatprep.subr.bf16.mxu1 %v4369_v55  ;;  %v4185_v44 = vpack.c.bf16 %v7368_v58, %v7367_v6  ;;  %v7375_v59 = vld [vmem:[#allocation77_spill] sm:$0xff]  ;;  %v7376_v8 = vld [vmem:[#allocation52_spill] sm:$0xff] }
 0x16c   :  { %v4373_v31 = vpack.c.bf16 %v3046_v34, %v3034_v17  ;;  %v4183_v20 = vpack.c.bf16 %v2197_v22, %v2185_v61  ;;  %4182 = vmatprep.subr.bf16.mxu0 %v4181_v23  ;;  %v4377_v38 = vpack.c.bf16 %v7370_v40, %v7369_v29  ;;  %v4187_v57 = vpack.c.bf16 %v7372_v2, %v7371_v50  ;;  %v7377_v55 = vld [vmem:[#allocation61_spill] sm:$0xff]  ;;  %v7378_v27 = vld [vmem:[#allocation72_spill] sm:$0xff]  ;;  %v7382_v17 = vld [vmem:[#allocation22_spill] sm:$0xff] }
 0x16d   :  { %v3040_v12 = vand.u32 4294901760, %v3039_v10  ;;  %v3052_v49 = vand.u32 4294901760, %v3051_v32  ;;  %v4189_v30 = vpack.c.bf16 %v7374_v24, %v7373_v19  ;;  %v4379_v53 = vpack.c.bf16 %v7377_v55, %v7376_v8  ;;  %v7379_v46 = vld [vmem:[#allocation73_spill] sm:$0xff]  ;;  %v7380_v10 = vld [vmem:[#allocation75_spill] sm:$0xff]  ;;  %v7381_v39 = vld [vmem:[#allocation12_spill] sm:$0xff] }
 0x16e   :  { %4372 = vmatpush1.bf16.msra.mxu1 %v4371_v14  ;;  %4184 = vmatpush1.bf16.msra.mxu0 %v4183_v20  ;;  %v4381_v9 = vpack.c.bf16 %v7379_v46, %v7378_v27  ;;  %v4191_v32 = vpack.c.bf16 %v7381_v39, %v7380_v10  ;;  %v7383_v34 = vld [vmem:[#allocation23_spill] sm:$0xff]  ;;  %v7384_v22 = vld [vmem:[#allocation18_spill] sm:$0xff]  ;;  %v7385_v23 = vld [vmem:[#allocation21_spill] sm:$0xff] }
 0x16f   :  { %v4375_v45 = vpack.c.bf16 %v3052_v49, %v3040_v12  ;;  %4374 = vmatprep.subr.bf16.mxu1 %v4373_v31  ;;  %4186 = vmatprep.subr.bf16.mxu0 %v4185_v44  ;;  %v4193_v61 = vpack.c.bf16 %v7383_v34, %v7382_v17  ;;  %v4383_v14 = vpack.c.bf16 %v7385_v23, %v7384_v22  ;;  %v7386_v12 = vld [vmem:[#allocation24_spill] sm:$0xff]  ;;  %v7387_v49 = vld [vmem:[#allocation26_spill] sm:$0xff]  ;;  %v7388_v20 = vld [vmem:[#allocation27_spill] sm:$0xff] }
 0x170   :  { %v4385_v31 = vpack.c.bf16 %v7387_v49, %v7386_v12  ;;  %v7389_v44 = vld [vmem:[#allocation28_spill] sm:$0xff]  ;;  %v7395_v22 = vld [vmem:[#allocation51_spill] sm:$0xff]  ;;  %v7397_v17 = vld [vmem:[#allocation13_spill] sm:$0xff] }
 0x171   :  { %2233 = vmatmul.mubr.f32.vlgmr.msra.gmra.mrb[2].mxu0 %v7375_v59  ;;  %v7394_v23 = vld [vmem:[#allocation44_spill] sm:$0xff] }
 0x172   :  { %4376 = vmatpush1.bf16.msra.mxu1 %v4375_v45  ;;  %4188 = vmatpush1.bf16.msra.mxu0 %v4187_v57  ;;  %v4195_v45 = vpack.c.bf16 %v7389_v44, %v7388_v20  ;;  %v7391_v57 = vld [vmem:[#allocation41_spill] sm:$0xff]  ;;  %v4201_v44 = vpack.c.bf16 %v7317_v0, %v7305_v36 }
 0x173   :  { %4378 = vmatprep.subr.bf16.mxu1 %v4377_v38  ;;  %4190 = vmatprep.subr.bf16.mxu0 %v4189_v30  ;;  %v7390_v38 = vld [vmem:[#allocation39_spill] sm:$0xff] }
 0x174   :  { %2367 = vmatprep.mubr.f32.mxu0 %v6948_v18  ;;  %v4197_v30 = vpack.c.bf16 %v7391_v57, %v7390_v38 }
 0x175   :  { %3088 = vmatmul.mubr.f32.vlgmr.msra.gmra.mrb[2].mxu1 %v7375_v59  ;;  %v7392_v59 = vld [vmem:[#allocation31_spill] sm:$0xff] }
 0x176   :  { %4380 = vmatpush1.bf16.msra.mxu1 %v4379_v53  ;;  %3222 = vmatprep.mubr.f32.mxu1 %v6948_v18  ;;  %v7393_v53 = vld [vmem:[#allocation35_spill] sm:$0xff] }
 0x177   :  { %4382 = vmatprep.subr.bf16.mxu1 %v4381_v9  ;;  %4192 = vmatpush1.bf16.msra.mxu0 %v4191_v32  ;;  %v4387_v34 = vpack.c.bf16 %v7393_v53, %v7392_v59  ;;  %v4389_v9 = vpack.c.bf16 %v7395_v22, %v7394_v23  ;;  %v7396_v32 = vld [vmem:[#allocation59_spill] sm:$0xff] }
 0x178   :  { %4194 = vmatprep.subr.bf16.mxu0 %v4193_v61  ;;  %v4199_v39 = vpack.c.bf16 %v7397_v17, %v7396_v32  ;;  %v7398_v61 = vld [vmem:[#allocation40_spill] sm:$0xff] }
 0x179   :  { %v4391_v57 = vpack.c.bf16 %v7285_v11, %v7398_v61 }
 0x17a   :  { %4384 = vmatpush1.bf16.msra.mxu1 %v4383_v14  ;;  %v4393_v14 = vpack.c.bf16 %v5680_v4, %v5677_v21  ;;  %v4209_v21 = vpack.c.bf16 %v7349_v60, %v7347_v3  ;;  %v7399_v4 = vld [vmem:[#allocation87_spill] sm:$0xff]  ;;  %v7413_v3 = vld [vmem:[#allocation29_spill] sm:$0xff]  ;;  %v7414_v60 = vld [vmem:[#allocation32_spill] sm:$0xff] }
 0x17b   :  { %4386 = vmatprep.subr.bf16.mxu1 %v4385_v31  ;;  %4196 = vmatpush1.bf16.msra.mxu0 %v4195_v45  ;;  %v4203_v31 = vpack.c.bf16 %v5686_v7, %v5682_v63  ;;  %v4205_v45 = vpack.c.bf16 %v7248_v51, %v7247_v52  ;;  %v7400_v63 = vld [vmem:[#allocation88_spill] sm:$0xff]  ;;  %v7401_v7 = vld [vmem:[#allocation93_spill] sm:$0xff]  ;;  %v4215_v52 = vpack.c.bf16 %v5816_v41, %v5802_v54  ;;  %v7408_v54 = vld [vmem:[#allocation70_spill] sm:$0xff] }
 0x17c   :  { %4198 = vmatprep.subr.bf16.mxu0 %v4197_v30  ;;  %v4395_v30 = vpack.c.bf16 %v5693_v48, %v5691_v15  ;;  %v4399_v51 = vpack.c.bf16 %v7400_v63, %v7399_v4  ;;  %v4401_v15 = vpack.c.bf16 %v7269_v16, %v7401_v7  ;;  %v4211_v48 = vpack.c.bf16 %v7354_v25, %v7270_v26  ;;  %v7409_v41 = vld [vmem:[#allocation76_spill] sm:$0xff]  ;;  %v7415_v25 = vld [vmem:[#allocation30_spill] sm:$0xff] }
 0x17d   :  { %v4407_v26 = vpack.c.bf16 %v7365_v35, %v5824_v37  ;;  %v7410_v37 = vld [vmem:[#allocation20_spill] sm:$0xff]  ;;  %v7416_v35 = vld [vmem:[#allocation47_spill] sm:$0xff]  ;;  %v7427_v4 = vld [vmem:[#allocation86_spill] sm:$0xff] }
 0x17e   :  { %4388 = vmatpush1.bf16.msra.mxu1 %v4387_v34  ;;  %v4397_v34 = vpack.c.bf16 %v7249_v56, %v5706_v13  ;;  %v4213_v56 = vpack.c.bf16 %v5782_v33, %v7293_v43  ;;  %v4403_v13 = vpack.c.bf16 %v7273_v5, %v7272_v1  ;;  %v7402_v43 = vld [vmem:[#allocation33_spill] sm:$0xff]  ;;  %v7403_v33 = vld [vmem:[#allocation78_spill] sm:$0xff]  ;;  %v7411_v16 = vld [vmem:[#allocation16_spill] sm:$0xff] }
 0x17f   :  { %4390 = vmatprep.subr.bf16.mxu1 %v4389_v9  ;;  %4200 = vmatpush1.bf16.msra.mxu0 %v4199_v39  ;;  %v4207_v39 = vpack.c.bf16 %v7341_v28, %v7339_v42  ;;  %v4405_v42 = vpack.c.bf16 %v5788_v62, %v5786_v47  ;;  %v7404_v1 = vld [vmem:[#allocation42_spill] sm:$0xff]  ;;  %v7412_v28 = vld [vmem:[#allocation25_spill] sm:$0xff]  ;;  %v7428_v63 = vld [vmem:[#allocation92_spill] sm:$0xff] }
 0x180   :  { %4202 = vmatprep.subr.bf16.mxu0 %v4201_v44  ;;  %v7405_v5 = vld [vmem:[#allocation46_spill] sm:$0xff]  ;;  %v7417_v44 = vld [vmem:[#allocation53_spill] sm:$0xff]  ;;  %v7430_v7 = vld [vmem:[#allocation56_spill] sm:$0xff] }
 0x181   :  { %v7406_v62 = vld [vmem:[#allocation62_spill] sm:$0xff] }
 0x182   :  { %4392 = vmatpush1.bf16.msra.mxu1 %v4391_v57  ;;  %v7407_v47 = vld [vmem:[#allocation50_spill] sm:$0xff] }
 0x183   :  { %4394 = vmatprep.subr.bf16.mxu1 %v4393_v14  ;;  %4204 = vmatpush1.bf16.msra.mxu0 %v4203_v31  ;;  %v7418_v57 = vld [vmem:[#allocation54_spill] sm:$0xff]  ;;  %v7420_v14 = vld [vmem:[#allocation15_spill] sm:$0xff]  ;;  %v7421_v31 = vld [vmem:[#allocation60_spill] sm:$0xff] }
 0x184   :  { %4206 = vmatprep.subr.bf16.mxu0 %v4205_v45  ;;  %v7419_v9 = vld [vmem:[#allocation14_spill] sm:$0xff]  ;;  %v7422_v45 = vld [vmem:[#allocation19_spill] sm:$0xff] }
 0x186   :  { %4396 = vmatpush1.bf16.msra.mxu1 %v4395_v30  ;;  %v7423_v30 = vld [vmem:[#allocation17_spill] sm:$0xff] }
 0x187   :  { %4398 = vmatprep.subr.bf16.mxu1 %v4397_v34  ;;  %4208 = vmatpush1.bf16.msra.mxu0 %v4207_v39  ;;  %v7424_v34 = vld [vmem:[#allocation81_spill] sm:$0xff]  ;;  %v7425_v39 = vld [vmem:[#allocation83_spill] sm:$0xff] }
 0x188   :  { %4210 = vmatprep.subr.bf16.mxu0 %v4209_v21  ;;  %v7426_v21 = vld [vmem:[#allocation89_spill] sm:$0xff] }
 0x18a   :  { %4400 = vmatpush1.bf16.msra.mxu1 %v4399_v51  ;;  %v7429_v51 = vld [vmem:[#allocation95_spill] sm:$0xff] }
 0x18b   :  { %4402 = vmatprep.subr.bf16.mxu1 %v4401_v15  ;;  %4212 = vmatpush1.bf16.msra.mxu0 %v4211_v48  ;;  %v7431_v15 = vand.u32 4294901760, %v7367_v6  ;;  %v7432_v48 = vand.u32 4294901760, %v7368_v58  ;;  %v7440_v6 = vand.u32 4294901760, %v7373_v19  ;;  %v7441_v58 = vand.u32 4294901760, %v7374_v24  ;;  %v7449_v24 = vld [vmem:[#allocation12_spill] sm:$0xff] }
 0x18c   :  { %4214 = vmatprep.subr.bf16.mxu0 %v4213_v56  ;;  %v7448_v19 = vand.u32 4294901760, %v7380_v10  ;;  %v7459_v10 = vand.u32 4294901760, %v7386_v12 }
 0x18d   :  { %v4249_v56 = vpack.c.bf16 %v7432_v48, %v7431_v15  ;;  %v4253_v15 = vpack.c.bf16 %v7441_v58, %v7440_v6  ;;  %v7442_v48 = vld [vmem:[#allocation66_spill] sm:$0xff]  ;;  %v7453_v58 = vld [vmem:[#allocation23_spill] sm:$0xff] }
 0x18e   :  { %4404 = vmatpush1.bf16.msra.mxu1 %v4403_v13  ;;  %v7433_v13 = vld [vmem:[#allocation98_spill] sm:$0xff] }
 0x18f   :  { %4406 = vmatprep.subr.bf16.mxu1 %v4405_v42  ;;  %4216 = vmatpush1.bf16.msra.mxu0 %v4215_v52  ;;  %v7434_v42 = vld [vmem:[#allocation63_spill] sm:$0xff]  ;;  %v7435_v52 = vld [vmem:[#allocation64_spill] sm:$0xff] }
 0x190   :  { %4218 = vmatprep.subr.bf16.mxu0 %v7402_v43 }
 0x192   :  { %4408 = vmatpush1.bf16.msra.mxu1 %v4407_v26  ;;  %2370 = vmatmul.mubr.f32.vlgmr.msra.gmra.mrb[2].mxu0 %v7403_v33  ;;  %v7436_v26 = vand.u32 4294901760, %v7369_v29  ;;  %v7444_v29 = vand.u32 4294901760, %v7376_v8  ;;  %v7454_v8 = vand.u32 4294901760, %v7453_v58  ;;  %v7473_v58 = vand.u32 4294901760, %v7305_v36 }
 0x193   :  { %4410 = vmatprep.subr.bf16.mxu1 %v7404_v1  ;;  %4220 = vmatpush1.bf16.msra.mxu0 %v7405_v5 }
 0x194   :  { %4222 = vmatprep.subr.bf16.mxu0 %v7406_v62  ;;  %2472 = vmatprep.mubr.f32.mxu0 %v6948_v18 }
 0x195   :  { %3225 = vmatmul.mubr.f32.vlgmr.msra.gmra.mrb[2].mxu1 %v7403_v33  ;;  %v7437_v33 = vand.u32 4294901760, %v7370_v40  ;;  %v7445_v40 = vand.u32 4294901760, %v7377_v55  ;;  %v7455_v55 = vld [vmem:[#allocation18_spill] sm:$0xff] }
 0x196   :  { %4412 = vmatpush1.bf16.msra.mxu1 %v7407_v47  ;;  %3327 = vmatprep.mubr.f32.mxu1 %v6948_v18 }
 0x197   :  { %4414 = vmatprep.subr.bf16.mxu1 %v7408_v54  ;;  %4224 = vmatpush1.bf16.msra.mxu0 %v7409_v41 }
 0x198   :  { %4226 = vmatprep.subr.bf16.mxu0 %v7410_v37 }
 0x19a   :  { %4416 = vmatpush1.bf16.msra.mxu1 %v7411_v16 }
 0x19b   :  { %4418 = vmatprep.subr.bf16.mxu1 %v7412_v28  ;;  %4228 = vmatpush1.bf16.msra.mxu0 %v7413_v3 }
 0x19c   :  { %4230 = vmatprep.subr.bf16.mxu0 %v7414_v60 }
 0x19e   :  { %4420 = vmatpush1.bf16.msra.mxu1 %v7415_v25 }
 0x19f   :  { %4422 = vmatprep.subr.bf16.mxu1 %v7416_v35  ;;  %4232 = vmatpush1.bf16.msra.mxu0 %v7417_v44 }
 0x1a0   :  { %4234 = vmatprep.subr.bf16.mxu0 %v7418_v57 }
 0x1a2   :  { %4424 = vmatpush1.bf16.msra.mxu1 %v7419_v9 }
 0x1a3   :  { %4426 = vmatprep.subr.bf16.mxu1 %v7420_v14  ;;  %4236 = vmatpush1.bf16.msra.mxu0 %v7421_v31 }
 0x1a4   :  { %4238 = vmatprep.subr.bf16.mxu0 %v7422_v45 }
 0x1a6   :  { %4428 = vmatpush1.bf16.msra.mxu1 %v7423_v30 }
 0x1a7   :  { %4430 = vmatprep.subr.bf16.mxu1 %v7424_v34  ;;  %4240 = vmatpush1.bf16.msra.mxu0 %v7425_v39 }
 0x1a8   :  { %4242 = vmatprep.subr.bf16.mxu0 %v7426_v21 }
 0x1aa   :  { %4432 = vmatpush1.bf16.msra.mxu1 %v7427_v4 }
 0x1ab   :  { %4434 = vmatprep.subr.bf16.mxu1 %v7428_v63  ;;  %4244 = vmatpush1.bf16.msra.mxu0 %v7429_v51  ;;  %v4441_v63 = vpack.c.bf16 %v7437_v33, %v7436_v26  ;;  %v7438_v51 = vand.u32 4294901760, %v7371_v50  ;;  %v4443_v26 = vpack.c.bf16 %v7445_v40, %v7444_v29  ;;  %v7446_v50 = vand.u32 4294901760, %v7378_v27  ;;  %v7451_v33 = vld [vmem:[#allocation22_spill] sm:$0xff] }
 0x1ac   :  { %4246 = vmatprep.subr.bf16.mxu0 %v7430_v7  ;;  %v7439_v7 = vand.u32 4294901760, %v7372_v2  ;;  %v7447_v2 = vand.u32 4294901760, %v7379_v46  ;;  %v7452_v6 = vand.u32 4294901760, %v7451_v33  ;;  %v7456_v27 = vand.u32 4294901760, %v7455_v55  ;;  %v7457_v46 = vld [vmem:[#allocation21_spill] sm:$0xff] }
 0x1ad   :  { %v7461_v40 = vand.u32 4294901760, %v7388_v20  ;;  %v7470_v20 = vand.u32 4294901760, %v7395_v22  ;;  %v7476_v55 = vand.u32 4294901760, %v7285_v11  ;;  %v6443_v22 = vld [vmem:[#allocation2] sm:$0xff]  ;;  %v7482_v11 = vld [vmem:[#allocation82_spill] sm:$0xff] }
 0x1ae   :  { %4436 = vmatpush1.bf16.msra.mxu1 %v7433_v13  ;;  %v4251_v4 = vpack.c.bf16 %v7439_v7, %v7438_v51  ;;  %v4445_v51 = vpack.c.bf16 %v7447_v2, %v7446_v50  ;;  %v7450_v7 = vand.u32 4294901760, %v7449_v24  ;;  %v7462_v50 = vld [vmem:[#allocation28_spill] sm:$0xff]  ;;  %v3609_v36 = vand.u32 2147483647, %v6443_v22 }
 0x1af   :  { %4438 = vmatprep.subr.bf16.mxu1 %v7434_v42  ;;  %4248 = vmatpush1.bf16.msra.mxu0 %v7435_v52  ;;  %v7443_v42 = vld [vmem:[#allocation79_spill] sm:$0xff]  ;;  %v7463_v2 = vand.u32 4294901760, %v7462_v50  ;;  %v7488_v50 = vld [vmem:[#allocation100_spill] sm:$0xff]  ;;  %vm3623_vm0 = vcmp.ge.f32.partialorder %v6443_v22, 0.0 }
 0x1b0   :  { %4250 = vmatprep.subr.bf16.mxu0 %v4249_v56  ;;  %v4255_v56 = vpack.c.bf16 %v7450_v7, %v7448_v19  ;;  %v7465_v19 = vld [vmem:[#allocation41_spill] sm:$0xff] }
 0x1b1   :  { %v7466_v24 = vand.u32 4294901760, %v7465_v19  ;;  %v7492_v19 = vld [vmem:[#allocation77_spill] sm:$0xff] }
 0x1b2   :  { %4440 = vmatpush1.bf16.msra.mxu1 %v7442_v48  ;;  %2476 = vmatmul.mubr.f32.vlgmr.msra.gmra.mrb[2].mxu0 %v7443_v42  ;;  %v4257_v48 = vpack.c.bf16 %v7454_v8, %v7452_v6 }
 0x1b3   :  { %4442 = vmatprep.subr.bf16.mxu1 %v4441_v63  ;;  %4252 = vmatpush1.bf16.msra.mxu0 %v4251_v4  ;;  %v7458_v4 = vand.u32 4294901760, %v7457_v46  ;;  %v3611_v46 = vsub.f32 0.0, %v3609_v36 }
 0x1b4   :  { %4254 = vmatprep.subr.bf16.mxu0 %v4253_v15  ;;  %2642 = vmatprep.mubr.f32.mxu0 %v6948_v18  ;;  %v7460_v15 = vand.u32 4294901760, %v7387_v49  ;;  %v7469_v49 = vand.u32 4294901760, %v7394_v23 }
 0x1b5   :  { %3331 = vmatmul.mubr.f32.vlgmr.msra.gmra.mrb[2].mxu1 %v7443_v42  ;;  %v4447_v63 = vpack.c.bf16 %v7458_v4, %v7456_v27  ;;  %v4259_v42 = vpack.c.bf16 %v7463_v2, %v7461_v40  ;;  %v7480_v27 = vld [vmem:[#allocation74_spill] sm:$0xff]  ;;  %v7487_v40 = vld [vmem:[#allocation55_spill] sm:$0xff]  ;;  %v7489_v2 = vld [vmem:[#allocation101_spill] sm:$0xff] }
 0x1b6   :  { %4444 = vmatpush1.bf16.msra.mxu1 %v4443_v26  ;;  %3497 = vmatprep.mubr.f32.mxu1 %v6948_v18  ;;  %v4449_v29 = vpack.c.bf16 %v7460_v15, %v7459_v10  ;;  %v7464_v26 = vand.u32 4294901760, %v7390_v38  ;;  %v4453_v33 = vpack.c.bf16 %v7470_v20, %v7469_v49  ;;  %v7472_v38 = vand.u32 4294901760, %v7397_v17  ;;  %v7477_v17 = vld [vmem:[#allocation69_spill] sm:$0xff]  ;;  %v7483_v4 = vld [vmem:[#allocation94_spill] sm:$0xff]  ;;  %v7485_v10 = vld [vmem:[#allocation96_spill] sm:$0xff] }
 0x1b7   :  { %4446 = vmatprep.subr.bf16.mxu1 %v4445_v51  ;;  %4256 = vmatpush1.bf16.msra.mxu0 %v4255_v56  ;;  %v7467_v51 = vand.u32 4294901760, %v7392_v59  ;;  %v7468_v56 = vand.u32 4294901760, %v7393_v53  ;;  %v7474_v59 = vand.u32 4294901760, %v7317_v0  ;;  %v7475_v53 = vand.u32 4294901760, %v7398_v61  ;;  %v7479_v0 = vld [vmem:[#allocation37_spill] sm:$0xff]  ;;  %v7481_v61 = vld [vmem:[#allocation36_spill] sm:$0xff] }
 0x1b8   :  { %4258 = vmatprep.subr.bf16.mxu0 %v4257_v48  ;;  %v4261_v7 = vpack.c.bf16 %v7466_v24, %v7464_v26  ;;  %v7471_v48 = vand.u32 4294901760, %v7396_v32  ;;  %v7478_v32 = vld [vmem:[#allocation71_spill] sm:$0xff] }
 0x1b9   :  { %v4451_v12 = vpack.c.bf16 %v7468_v56, %v7467_v51  ;;  %v4265_v8 = vpack.c.bf16 %v7474_v59, %v7473_v58  ;;  %v4455_v23 = vpack.c.bf16 %v7476_v55, %v7475_v53  ;;  %v7486_v15 = vld [vmem:[#allocation99_spill] sm:$0xff] }
 0x1ba   :  { %4448 = vmatpush1.bf16.msra.mxu1 %v4447_v63  ;;  %v4263_v6 = vpack.c.bf16 %v7472_v38, %v7471_v48  ;;  %v7484_v63 = vld [vmem:[#allocation102_spill] sm:$0xff]  ;;  %v7491_v26 = vld [vmem:[#allocation103_spill] sm:$0xff] }
 0x1bb   :  { %4450 = vmatprep.subr.bf16.mxu1 %v4449_v29  ;;  %4260 = vmatpush1.bf16.msra.mxu0 %v4259_v42  ;;  %v3613_v29 = vmul.f32 1.442695, %v3611_v46  ;;  %v7490_v42 = vld [vmem:[#allocation57_spill] sm:$0xff] }
 0x1bc   :  { %4262 = vmatprep.subr.bf16.mxu0 %v4261_v7 }
 0x1bd   :  { %4553 = vpow2.f32 %v3613_v29 }
 0x1be   :  { %4452 = vmatpush1.bf16.msra.mxu1 %v4451_v12 }
 0x1bf   :  { %4454 = vmatprep.subr.bf16.mxu1 %v4453_v33  ;;  %4264 = vmatpush1.bf16.msra.mxu0 %v4263_v6 }
 0x1c0   :  { %4266 = vmatprep.subr.bf16.mxu0 %v4265_v8 }
 0x1c2   :  { %4456 = vmatpush1.bf16.msra.mxu1 %v4455_v23 }
 0x1c3   :  { %4458 = vmatprep.subr.bf16.mxu1 %v7477_v17  ;;  %4268 = vmatpush1.bf16.msra.mxu0 %v7478_v32 }
 0x1c4   :  { %4270 = vmatprep.subr.bf16.mxu0 %v7479_v0 }
 0x1c6   :  { %4460 = vmatpush1.bf16.msra.mxu1 %v7480_v27  ;;  %v56_v27 = vld [vmem:[#allocation2 + $0x8] sm:$0xff] }
 0x1c7   :  { %4462 = vmatprep.subr.bf16.mxu1 %v7481_v61  ;;  %4272 = vmatpush1.bf16.msra.mxu0 %v7482_v11  ;;  %v3610_v61 = vand.u32 2147483647, %v56_v27  ;;  %vm3624_vm2 = vcmp.ge.f32.partialorder %v56_v27, 0.0 }
 0x1c8   :  { %4274 = vmatprep.subr.bf16.mxu0 %v7483_v4 }
 0x1c9   :  { %v3612_v11 = vsub.f32 0.0, %v3610_v61 }
 0x1ca   :  { %4464 = vmatpush1.bf16.msra.mxu1 %v7484_v63 }
 0x1cb   :  { %4466 = vmatprep.subr.bf16.mxu1 %v7485_v10  ;;  %4276 = vmatpush1.bf16.msra.mxu0 %v7486_v15  ;;  %v3615_v46 = vmul.f32 1.442695, %v3612_v11 }
 0x1cc   :  { %4278 = vmatprep.subr.bf16.mxu0 %v7487_v40 }
 0x1ce   :  { %4468 = vmatpush1.bf16.msra.mxu1 %v7488_v50 }
 0x1cf   :  { %4470 = vmatprep.subr.bf16.mxu1 %v7489_v2  ;;  %4280 = vmatpush1.bf16.msra.mxu0 %v7490_v42 }
 0x1d0   :  { %4282 = vmatprep.subr.bf16.mxu0 %v7402_v43  ;;  %v4554_v43 = vpop.eup %4553 }
 0x1d2   :  { %4472 = vmatpush1.bf16.msra.mxu1 %v7491_v26  ;;  %2644 = vmatmul.mubr.f32.vlgmr.msra.gmra.mrb[2].mxu0 %v7492_v19 }
 0x1d3   :  { %4474 = vmatprep.subr.bf16.mxu1 %v7404_v1  ;;  %4284 = vmatpush1.bf16.msra.mxu0 %v7405_v5  ;;  %v3617_v1 = vadd.f32 1.0, %v4554_v43  ;;  %v7493_v5 = vld [vmem:[#allocation86_spill] sm:$0xff] }
 0x1d4   :  { %4286 = vmatprep.subr.bf16.mxu0 %v7406_v62  ;;  %2746 = vmatprep.mubr.f32.mxu0 %v6948_v18  ;;  %v7494_v62 = vld [vmem:[#allocation92_spill] sm:$0xff] }
 0x1d5   :  { %3499 = vmatmul.mubr.f32.vlgmr.msra.gmra.mrb[2].mxu1 %v7492_v19  ;;  %4555 = vrcp.f32 %v3617_v1 }
 0x1d6   :  { %4476 = vmatpush1.bf16.msra.mxu1 %v7407_v47  ;;  %3601 = vmatprep.mubr.f32.mxu1 %v6948_v18  ;;  %v7495_v47 = vld [vmem:[#allocation95_spill] sm:$0xff]  ;;  %4557 = vlog2.f32 %v3617_v1 }
 0x1d7   :  { %4478 = vmatprep.subr.bf16.mxu1 %v7408_v54  ;;  %4288 = vmatpush1.bf16.msra.mxu0 %v7409_v41  ;;  %v7496_v54 = vld [vmem:[#allocation56_spill] sm:$0xff]  ;;  %4559 = vpow2.f32 %v3615_v46 }
 0x1d8   :  { %4290 = vmatprep.subr.bf16.mxu0 %v7410_v37  ;;  %v7497_v37 = vld [vmem:[#allocation63_spill] sm:$0xff] }
 0x1da   :  { %4480 = vmatpush1.bf16.msra.mxu1 %v7411_v16 }
 0x1db   :  { %4482 = vmatprep.subr.bf16.mxu1 %v7412_v28  ;;  %4292 = vmatpush1.bf16.msra.mxu0 %v7413_v3  ;;  %v7498_v28 = vld [vmem:[#allocation66_spill] sm:$0xff] }
 0x1dc   :  { %4294 = vmatprep.subr.bf16.mxu0 %v7414_v60  ;;  %v57_v60 = vld [vmem:[#allocation5] sm:$0xff] }
 0x1dd   :  { %v59_v50 = vunpack.c.h.bf16 %v57_v60 }
 0x1de   :  { %4484 = vmatpush1.bf16.msra.mxu1 %v7415_v25  ;;  %v58_v25 = vunpack.c.l.bf16 %v57_v60 }
 0x1df   :  { %4486 = vmatprep.subr.bf16.mxu1 %v7416_v35  ;;  %4296 = vmatpush1.bf16.msra.mxu0 %v7417_v44  ;;  %v4556_v18 = vpop.eup %4555  ;;  %v3652_v44 = vmul.f32 -0.5, %v4554_v43 }
 0x1e0   :  { %4298 = vmatprep.subr.bf16.mxu0 %v7418_v57  ;;  %v3625_v41 = vmul.f32 %v4556_v18, %v4554_v43 }
 0x1e2   :  { %4488 = vmatpush1.bf16.msra.mxu1 %v7419_v9  ;;  %v3627_v16 = vsel %vm3623_vm0, %v4556_v18, %v3625_v41  ;;  %v3653_v9 = vadd.f32 1.0, %v3652_v44  ;;  %v3630_v18 = vmul.f32 -0.5, %v59_v50 }
 0x1e3   :  { %4490 = vmatprep.subr.bf16.mxu1 %v7420_v14  ;;  %4300 = vmatpush1.bf16.msra.mxu0 %v7421_v31  ;;  %v3633_v3 = vmul.f32 2.0, %v3627_v16  ;;  %v4558_v14 = vpop.eup %4557  ;;  %v4665_v31 = vmov 1983009808  }
 0x1e4   :  { %4302 = vmatprep.subr.bf16.mxu0 %v7422_v45  ;;  %v3684_v45 = vunpack.c.l.s4 %v4665_v31  ;;  %v3651_v24 = vmul.f32 0.6931472, %v4558_v14  ;;  %v3654_v7 = vmul.f32 %v4554_v43, %v3653_v9  ;;  %v4560_v4 = vpop.eup %4559 }
 0x1e5   :  { %v3635_v35 = vsub.f32 1.0, %v3633_v3  ;;  %v3618_v63 = vadd.f32 1.0, %v4560_v4  ;;  %v3661_v42 = vmul.f32 -0.5, %v4560_v4  ;;  %v3664_v1 = vand.u32 2147483647, %v4560_v4 }
 0x1e6   :  { %4492 = vmatpush1.bf16.msra.mxu1 %v7423_v30  ;;  %v3686_v30 = vlaneseq  ;;  %v3685_v51 = vunpack.c.0.s8 %v3684_v45 }
 0x1e7   :  { %4494 = vmatprep.subr.bf16.mxu1 %v7424_v34  ;;  %4304 = vmatpush1.bf16.msra.mxu0 %v7425_v39  ;;  %v3637_v57 = vmul.f32 %v3635_v35, %v58_v25  ;;  %v3655_v34 = vand.u32 2147483647, %v4554_v43  ;;  %v3629_v39 = vmul.f32 -0.5, %v58_v25  ;;  %4561 = vrcp.f32 %v3618_v63 }
 0x1e8   :  { %4306 = vmatprep.subr.bf16.mxu0 %v7426_v21  ;;  %v3687_v56 = vshrl.u32 %v3686_v30, 7  ;;  %4563 = vlog2.f32 %v3618_v63  ;;  %vm3665_vm3 = vcmp.lt.f32.partialorder %v3664_v1, 0.0004427343 }
 0x1e9   :  { %v3639_v21 = vadd.f32 %v3637_v57, %v3627_v16  ;;  %vm3656_vm1 = vcmp.lt.f32.partialorder %v3655_v34, 0.0004427343  ;;  %v3631_v12 = vadd.f32 0.75, %v3629_v39 }
 0x1ea   :  { %4496 = vmatpush1.bf16.msra.mxu1 %v7493_v5  ;;  %v3657_v48 = vsel %vm3656_vm1, %v3654_v7, %v3651_v24  ;;  %v3688_v6 = vsub.s32 %v3685_v51, %v3687_v56 }
 0x1eb   :  { %4498 = vmatprep.subr.bf16.mxu1 %v7494_v62  ;;  %4308 = vmatpush1.bf16.msra.mxu0 %v7495_v47  ;;  %v3641_v49 = vmul.f32 %v3639_v21, %v3639_v21  ;;  %v3644_v62 = vmax.f32 %v56_v27, 0.0  ;;  %v3646_v47 = vmul.f32 %v59_v50, %v56_v27 }
 0x1ec   :  { %4310 = vmatprep.subr.bf16.mxu0 %v7496_v54 }
 0x1ed   :  { %v3669_v53 = vmul.f32 %v3641_v49, %v3631_v12 }
 0x1ee   :  { %4500 = vmatpush1.bf16.msra.mxu1 %v7433_v13  ;;  %v3643_v13 = vmax.f32 %v6443_v22, 0.0 }
 0x1ef   :  { %4502 = vmatprep.subr.bf16.mxu1 %v7497_v37  ;;  %4312 = vmatpush1.bf16.msra.mxu0 %v7435_v52  ;;  %v3645_v52 = vmul.f32 %v58_v25, %v6443_v22  ;;  %v3632_v37 = vadd.f32 0.75, %v3630_v18 }
 0x1f1   :  { %v3647_v20 = vsub.f32 %v3643_v13, %v3645_v52  ;;  %v4562_v10 = vpop.eup %4561 }
 0x1f2   :  { %4504 = vmatpush1.bf16.msra.mxu1 %v7498_v28  ;;  %2748 = vmatmul.mubr.f32.vlgmr.msra.gmra.mrb[2].mxu0 %v7492_v19  ;;  %v3626_v15 = vmul.f32 %v4562_v10, %v4560_v4  ;;  %v4564_v43 = vpop.eup %4563  ;;  %v3648_v28 = vsub.f32 %v3644_v62, %v3646_v47 }
 0x1f3   :  { %v3667_v8 = vadd.f32 %v3657_v48, %v3647_v20  ;;  %v3660_v54 = vmul.f32 0.6931472, %v4564_v43 }
 0x1f4   :  { %v3628_v29 = vsel %vm3624_vm2, %v4562_v10, %v3626_v15 }
 0x1f5   :  { %3603 = vmatmul.mubr.f32.vlgmr.msra.gmra.mrb[2].mxu1 %v7492_v19  ;;  %v3671_v32 = vmul.f32 %v3669_v53, %v3667_v8  ;;  %v3634_v40 = vmul.f32 2.0, %v3628_v29  ;;  %v3662_v19 = vadd.f32 1.0, %v3661_v42 }
 0x1f7   :  { %v3636_v2 = vsub.f32 1.0, %v3634_v40  ;;  %v3663_v41 = vmul.f32 %v4560_v4, %v3662_v19 }
 0x1f9   :  { %v3638_v26 = vmul.f32 %v3636_v2, %v59_v50  ;;  %v3666_v25 = vsel %vm3665_vm3, %v3663_v41, %v3660_v54 }
 0x1fa   :  { %v3668_v57 = vadd.f32 %v3666_v25, %v3648_v28 }
 0x1fb   :  { %v3640_v5 = vadd.f32 %v3638_v26, %v3628_v29 }
 0x1fc   :  { %v1039_v33 = vpop.f32.mrb[0].mxu0 }
 0x1fd   :  { %v1041_v38 = vpop.f32.mrb[1].mxu0  ;;  %v3642_v16 = vmul.f32 %v3640_v5, %v3640_v5 }
 0x1fe   :  { %v3681_v58 = vcombine.low %v1039_v33, %v1041_v38  ;;  %v1894_v59 = vpop.f32.mrb[0].mxu1 }
 0x1ff   :  { %v1896_v55 = vpop.f32.mrb[1].mxu1  ;;  %v3670_v9 = vmul.f32 %v3642_v16, %v3632_v37 }
 0x200   :  { %v3689_v23 = vrot.slane %v3681_v58, %v3688_v6  ;;  %v3682_v17 = vcombine.low %v1894_v59, %v1896_v55 }
 0x201   :  { %v3672_v34 = vmul.f32 %v3670_v9, %v3668_v57 }
 0x202   :  { %v3696_v22 = vrot.slane %v3682_v17, %v3688_v6 }
 0x204   :  { %v3697_v36 = vcombine.low %v3689_v23, %v3696_v22 }
 0x206   :  { %v3717_v0 = vmul.f32 %v3697_v36, %v3671_v32 }
 0x208   :  { %3719 = vst [vmem:[#allocation8] sm:$0xff] %v3717_v0 }
 0x2c5   :  { %v2749_v3 = vpop.f32.mrb[2].mxu0 }
 0x2c6   :  { %v2751_v35 = vpop.f32.mrb[3].mxu0 }
 0x2c7   :  { %v3698_v60 = vcombine.low %v2749_v3, %v2751_v35 }
 0x2c8   :  { %v3604_v44 = vpop.f32.mrb[2].mxu1 }
 0x2c9   :  { %v3606_v14 = vpop.f32.mrb[3].mxu1  ;;  %v3706_v31 = vrot.slane %v3698_v60, %v3688_v6 }
 0x2ca   :  { %v3699_v45 = vcombine.low %v3604_v44, %v3606_v14 }
 0x2cc   :  { %v3713_v30 = vrot.slane %v3699_v45, %v3688_v6 }
 0x2ce   :  { %v3714_v39 = vcombine.low %v3706_v31, %v3713_v30 }
 0x2d0   :  { %v3718_v21 = vmul.f32 %v3714_v39, %v3672_v34 }
 0x2d2   :  { %3720 = vst [vmem:[#allocation8 + $0x8] sm:$0xff] %v3718_v21 }
 0x2d3   :  { %4642 = shalt.err (!%p4639_p0)
}
 0x2d4   :  { %s4643_s30 = scalar_lea.hbm %s6518_s4, 256 }
 0x2d5   :  { %p4644_p1 = scmp.ne.s32.totalorder %s6518_s4, %s4643_s30  ;;  %p4647_p2 = scmp.lt.u32.totalorder %s4643_s30, %s6518_s4 }
 0x2d7   :  { %p4649_p3 = pnand %p4647_p2, %p4644_p1 }
 0x2d9   :  { %4652 = shalt.err (!%p4649_p3)
}
 0x2da   :  { %3730 = dma.vmem_to_hbm [thread:$0]  %s3728_s26, 256, %s6518_s4, [#allocation4]  }
 0x2db   :  { %4657 = dma.done.wait [#allocation4], 256  }
 0x2dc   :  { %4658 = vsyncadd [#allocation4], 4294967040 }
 0x2dd   :  { %3734 = vsyncpa [#allocation3], 1 }
 0x2de   :  { %3735 = vsyncpa [#allocation6], 1 }
 0x2df   :  { %3736 = vsyncpa [#allocation4], 1 }

</bundles_post_ra>
